<compile_context>
chip_gen: v6e
topology: v6e:2x2x1
jax: 0.10.0
libtpu: 0.0.40
codegen_flags: <defaults>
</compile_context>

<pallas_src>
import functools

import jax
import jax.numpy as jnp
import numpy as np
from jax import lax
from jax.experimental import pallas as pl
from jax.experimental.pallas import tpu as pltpu


def _round_up(x, m):
    return (x + m - 1) // m * m


# ----------------------------------------------------------------------------------
# Fused kernel: embed -> 5x conv-tanh (chain 1) -> 2x conv-tanh (chain 2) -> combine.
# ----------------------------------------------------------------------------------
def _convnet_kernel(w_ref, x_ref, o_ref, p1, p2, *, H, W, Wl, k, pad, n_pack, n1, n2):
    kk = k * k
    f32 = jnp.float32

    # ---- hoisted lane masks (JAX does not CSE broadcast_in_dim: build them once) ------
    col = lax.broadcasted_iota(jnp.int32, (H, Wl), 1)
    seam = {}
    for kw in range(k):
        d = kw - pad
        if d == 0:
            continue
        parts = []
        for i in range(n_pack):
            lo, hi = i * W, (i + 1) * W
            if d < 0:   # right-roll by -d: slot-local col < -d would read the left neighbour
                parts.append((col >= lo) & (col < lo - d))
            else:       # left-roll by  d: slot-local col >= W-d would read the right neighbour
                parts.append((col >= hi - d) & (col < hi))
        seam[kw] = functools.reduce(jnp.logical_or, parts)

    # ---- one 'same' cross-correlation over the packed plane held in scratch ref `p` ---
    def conv_acc(p, off):
        acc = jnp.zeros((H, Wl), f32)
        for kh in range(k):
            slab = p[kh:kh + H, :]                        # stencil-row slab (H, Wl)
            for kw in range(k):
                if kw == pad:
                    s = slab
                else:
                    # Lane rotate (XLU slot, co-issues with the VPU FMA).  Lanes that leaked
                    # across a sample slot (or wrapped) are zeroed, which also implements the
                    # left/right zero padding of every packed sample.
                    s = pltpu.roll(slab, shift=(pad - kw) % Wl, axis=1)
                    s = jnp.where(seam[kw], 0.0, s)
                acc = acc + w_ref[off + kh * k + kw] * s  # scalar weight from SMEM
        return acc

    def layer(p, off):
        # Only rows [pad, pad+H) are ever rewritten: the zero border rows (top/bottom
        # padding) survive the whole kernel from the single zero-fill below.
        p[pad:pad + H, :] = jnp.tanh(conv_acc(p, off))

    # ---- embed the n_pack raw samples into the packed, zero-bordered plane ------------
    p1[...] = jnp.zeros(p1.shape, f32)
    for i in range(n_pack):
        p1[pad:pad + H, i * W:(i + 1) * W] = x_ref[i, 0].astype(f32)
    p2[...] = p1[...]

    # ---- chain 1 (n1 layers) and chain 2 (n2 layers); last layer of each fused below --
    for l in range(n1 - 1):
        layer(p1, l * kk)
    for l in range(n2 - 1):
        layer(p2, (n1 + l) * kk)

    # ---- final layers + `y1 + 2/3*y2` combine; lane-dense (H, Wl) store ---------------
    a1 = conv_acc(p1, (n1 - 1) * kk)
    a2 = conv_acc(p2, (n1 + n2 - 1) * kk)
    o_ref[0, 0] = jnp.tanh(a1) + (2.0 / 3.0) * jnp.tanh(a2)


# ----------------------------------------------------------------------------------
# Forward pass (semantics of _ConvNet_.forward).
# ----------------------------------------------------------------------------------
def convnet_forward(x, weights1, weights2):
    """x: (B, 1, H, W); weights1: (n1, k, k); weights2: (n2, k, k) -> (B, 1, H, W) f32."""
    B, C, H, W = x.shape
    assert C == 1, "ConvNet is single-channel"
    n1, k = int(weights1.shape[0]), int(weights1.shape[-1])
    n2 = int(weights2.shape[0])
    assert k % 2 == 1, "'same' padding layout assumes an odd kernel size"
    pad = k // 2

    # Lane packing: n_pack samples share the 128-lane axis so tanh/FMA/roll work is spent
    # on real pixels instead of zero pad lanes (W=64 -> 2 samples per vreg row).
    n_pack = max(1, min(128 // W, B))
    Wl = _round_up(n_pack * W, 128)                # lane-dense working width
    Ha = _round_up(H + 2 * pad, 8)                 # scratch rows incl. zero borders
    B_pad = _round_up(B, n_pack)
    G = B_pad // n_pack

    xf = x.astype(jnp.float32)
    if B_pad != B:
        xf = jnp.pad(xf, ((0, B_pad - B), (0, 0), (0, 0), (0, 0)))

    # All (n1+n2)*k*k weights as ONE flat SMEM array (no per-layer concat / tiny DMAs).
    wflat = jnp.concatenate(
        [weights1.reshape(-1), weights2.reshape(-1)]).astype(jnp.float32)

    kern = functools.partial(_convnet_kernel, H=H, W=W, Wl=Wl, k=k, pad=pad,
                             n_pack=n_pack, n1=n1, n2=n2)

    out = pl.pallas_call(
        kern,
        out_shape=jax.ShapeDtypeStruct((G, 1, H, Wl), jnp.float32),
        grid=(G,),
        in_specs=[
            pl.BlockSpec(memory_space=pltpu.MemorySpace.SMEM),           # flat weights
            pl.BlockSpec((n_pack, 1, H, W), lambda g: (g, 0, 0, 0)),     # raw samples
        ],
        out_specs=pl.BlockSpec((1, 1, H, Wl), lambda g: (g, 0, 0, 0)),   # lane-dense
        scratch_shapes=[pltpu.VMEM((Ha, Wl), jnp.float32),               # y1 plane
                        pltpu.VMEM((Ha, Wl), jnp.float32)],              # y2 plane
        compiler_params=pltpu.CompilerParams(dimension_semantics=("parallel",)),
    )(wflat, xf)

    # Un-pack the lane-packed output back to (B, 1, H, W): pure layout plumbing.
    y = out[:, 0, :, :n_pack * W].reshape(G, H, n_pack, W)
    y = jnp.moveaxis(y, 2, 1).reshape(B_pad, 1, H, W)
    return y[:B]


def convnet_init_weights(kernel_size, initial_kernel, n1=5, n2=2):
    """Matches _ConvNet_.__init__: every conv weight is a centered delta * initial_kernel."""
    w = jnp.zeros((kernel_size, kernel_size), jnp.float32)
    w = w.at[kernel_size // 2, kernel_size // 2].set(jnp.float32(initial_kernel))
    return jnp.stack([w] * n1), jnp.stack([w] * n2)


# ----------------------------------------------------------------------------------
# Pure-JAX reference (for numerical validation only).
# ----------------------------------------------------------------------------------
def _ref_forward(x, weights1, weights2):
    k = weights1.shape[-1]
    pad = k // 2

    def conv(v, w):
        return lax.conv_general_dilated(
            v, w.reshape(1, 1, k, k), (1, 1), [(pad, pad), (pad, pad)],
            dimension_numbers=("NCHW", "OIHW", "NCHW"),
            precision=lax.Precision.HIGHEST)

    y1 = x
    for i in range(weights1.shape[0]):
        y1 = jnp.tanh(conv(y1, weights1[i]))
    y2 = x
    for i in range(weights2.shape[0]):
        y2 = jnp.tanh(conv(y2, weights2[i]))
    return y1 + (2.0 / 3.0) * y2


if __name__ == "__main__":
    B, H, W = 2, 64, 64
    kernel_size = 3
    initial_kernel = 0.5

    key = jax.random.PRNGKey(0)
    kx, kw = jax.random.split(key)
    x = jax.random.normal(kx, (B, 1, H, W), jnp.float32)

    # Parameters exactly as the module's __init__ builds them (delta stencil * initial_kernel).
    weights1, weights2 = convnet_init_weights(kernel_size, initial_kernel)

    fwd = jax.jit(convnet_forward)
    out = fwd(x, weights1, weights2)
    jax.block_until_ready(out)

    # Validate against the XLA reference: module-init weights, random non-symmetric stencils
    # (exercise every tap / lane-roll / seam-mask path), and an odd batch (batch-pad + unpack).
    ref0 = _ref_forward(x, weights1, weights2)
    np.testing.assert_allclose(np.asarray(out), np.asarray(ref0), rtol=2e-3, atol=2e-3)

    wr = 0.3 * jax.random.normal(kw, (7, kernel_size, kernel_size), jnp.float32)
    out_r = fwd(x, wr[:5], wr[5:])
    ref_r = _ref_forward(x, wr[:5], wr[5:])
    np.testing.assert_allclose(np.asarray(out_r), np.asarray(ref_r), rtol=2e-3, atol=2e-3)

    x3 = jax.random.normal(kx, (3, 1, H, W), jnp.float32)
    out3 = fwd(x3, wr[:5], wr[5:])
    ref3 = _ref_forward(x3, wr[:5], wr[5:])
    np.testing.assert_allclose(np.asarray(out3), np.asarray(ref3), rtol=2e-3, atol=2e-3)

    print("KERNEL_OK")
</pallas_src>

<mosaic_0001>
module attributes {stable_mosaic.version = 11 : i64} {
  func.func @_convnet_kernel(%arg0: i32, %arg1: memref<63xf32, #tpu.memory_space<smem>>, %arg2: memref<2x1x64x64xf32, #tpu.memory_space<vmem>>, %arg3: memref<1x1x64x128xf32, #tpu.memory_space<vmem>>, %arg4: memref<72x128xf32, #tpu.memory_space<vmem>>, %arg5: memref<72x128xf32, #tpu.memory_space<vmem>>) attributes {dimension_semantics = [#tpu.dimension_semantics<parallel>], iteration_bounds = array<i64: 1>, scalar_prefetch = 0 : i64, scratch_operands = 2 : i64, tpu.core_type = #tpu.core_type<tc>, window_params = [{transform_indices = @transform_0, window_bounds = array<i64: 63>}, {transform_indices = @transform_1, window_bounds = array<i64: 2, 1, 64, 64>}, {transform_indices = @transform_2, window_bounds = array<i64: 1, 1, 64, 128>}]} {
    %0 = tpu.iota {dimensions = array<i32: 1>} : vector<64x128xi32>
    %c0_i32 = arith.constant 0 : i32
    %1 = vector.broadcast %c0_i32 : i32 to vector<64x128xi32>
    %2 = arith.cmpi sge, %0, %1 : vector<64x128xi32>
    %c1_i32 = arith.constant 1 : i32
    %3 = vector.broadcast %c1_i32 : i32 to vector<64x128xi32>
    %4 = arith.cmpi slt, %0, %3 : vector<64x128xi32>
    %5 = arith.andi %2, %4 : vector<64x128xi1>
    %c64_i32 = arith.constant 64 : i32
    %6 = vector.broadcast %c64_i32 : i32 to vector<64x128xi32>
    %7 = arith.cmpi sge, %0, %6 : vector<64x128xi32>
    %c65_i32 = arith.constant 65 : i32
    %8 = vector.broadcast %c65_i32 : i32 to vector<64x128xi32>
    %9 = arith.cmpi slt, %0, %8 : vector<64x128xi32>
    %10 = arith.andi %7, %9 : vector<64x128xi1>
    %11 = arith.ori %5, %10 : vector<64x128xi1>
    %c63_i32 = arith.constant 63 : i32
    %12 = vector.broadcast %c63_i32 : i32 to vector<64x128xi32>
    %13 = arith.cmpi sge, %0, %12 : vector<64x128xi32>
    %c64_i32_0 = arith.constant 64 : i32
    %14 = vector.broadcast %c64_i32_0 : i32 to vector<64x128xi32>
    %15 = arith.cmpi slt, %0, %14 : vector<64x128xi32>
    %16 = arith.andi %13, %15 : vector<64x128xi1>
    %c127_i32 = arith.constant 127 : i32
    %17 = vector.broadcast %c127_i32 : i32 to vector<64x128xi32>
    %18 = arith.cmpi sge, %0, %17 : vector<64x128xi32>
    %c128_i32 = arith.constant 128 : i32
    %19 = vector.broadcast %c128_i32 : i32 to vector<64x128xi32>
    %20 = arith.cmpi slt, %0, %19 : vector<64x128xi32>
    %21 = arith.andi %18, %20 : vector<64x128xi1>
    %22 = arith.ori %16, %21 : vector<64x128xi1>
    %cst = arith.constant 0.000000e+00 : f32
    %23 = vector.broadcast %cst : f32 to vector<72x128xf32>
    %c0 = arith.constant 0 : index
    %c0_1 = arith.constant 0 : index
    %24 = vector.load %arg4[%c0, %c0_1] : memref<72x128xf32, #tpu.memory_space<vmem>>, vector<72x128xf32>
    tpu.vector_store %arg4[%c0, %c0_1], %23 {strides = array<i32>} : memref<72x128xf32, #tpu.memory_space<vmem>>, vector<72x128xf32>,
    %c0_2 = arith.constant 0 : index
    %c0_3 = arith.constant 0 : index
    %c0_4 = arith.constant 0 : index
    %c0_5 = arith.constant 0 : index
    %25 = vector.load %arg2[%c0_2, %c0_3, %c0_4, %c0_5] : memref<2x1x64x64xf32, #tpu.memory_space<vmem>>, vector<1x1x64x64xf32>
    %26 = vector.shape_cast %25 : vector<1x1x64x64xf32> to vector<64x64xf32>
    %c1 = arith.constant 1 : index
    %c0_6 = arith.constant 0 : index
    %27 = vector.load %arg4[%c1, %c0_6] : memref<72x128xf32, #tpu.memory_space<vmem>>, vector<64x64xf32>
    tpu.vector_store %arg4[%c1, %c0_6], %26 {strides = array<i32>} : memref<72x128xf32, #tpu.memory_space<vmem>>, vector<64x64xf32>,
    %c1_7 = arith.constant 1 : index
    %c0_8 = arith.constant 0 : index
    %c0_9 = arith.constant 0 : index
    %c0_10 = arith.constant 0 : index
    %28 = vector.load %arg2[%c1_7, %c0_8, %c0_9, %c0_10] : memref<2x1x64x64xf32, #tpu.memory_space<vmem>>, vector<1x1x64x64xf32>
    %29 = vector.shape_cast %28 : vector<1x1x64x64xf32> to vector<64x64xf32>
    %c1_11 = arith.constant 1 : index
    %c64 = arith.constant 64 : index
    %30 = vector.load %arg4[%c1_11, %c64] : memref<72x128xf32, #tpu.memory_space<vmem>>, vector<64x64xf32>
    tpu.vector_store %arg4[%c1_11, %c64], %29 {strides = array<i32>} : memref<72x128xf32, #tpu.memory_space<vmem>>, vector<64x64xf32>,
    %c0_12 = arith.constant 0 : index
    %c0_13 = arith.constant 0 : index
    %31 = vector.load %arg4[%c0_12, %c0_13] : memref<72x128xf32, #tpu.memory_space<vmem>>, vector<72x128xf32>
    %c0_14 = arith.constant 0 : index
    %c0_15 = arith.constant 0 : index
    %32 = vector.load %arg5[%c0_14, %c0_15] : memref<72x128xf32, #tpu.memory_space<vmem>>, vector<72x128xf32>
    tpu.vector_store %arg5[%c0_14, %c0_15], %31 {strides = array<i32>} : memref<72x128xf32, #tpu.memory_space<vmem>>, vector<72x128xf32>,
    %cst_16 = arith.constant 0.000000e+00 : f32
    %33 = vector.broadcast %cst_16 : f32 to vector<64x128xf32>
    %c0_17 = arith.constant 0 : index
    %c0_18 = arith.constant 0 : index
    %34 = vector.load %arg4[%c0_17, %c0_18] : memref<72x128xf32, #tpu.memory_space<vmem>>, vector<64x128xf32>
    %c1_i32_19 = arith.constant 1 : i32
    %35 = tpu.dynamic_rotate %34 by %c1_i32_19 dim 1 : vector<64x128xf32>, i32 -> vector<64x128xf32>
    %cst_20 = arith.constant 0.000000e+00 : f32
    %36 = vector.broadcast %cst_20 : f32 to vector<64x128xf32>
    %37 = arith.select %11, %36, %35 : vector<64x128xi1>, vector<64x128xf32>
    %c0_21 = arith.constant 0 : index
    %38 = memref.load %arg1[%c0_21] : memref<63xf32, #tpu.memory_space<smem>>
    %39 = vector.broadcast %38 : f32 to vector<64x128xf32>
    %40 = arith.mulf %39, %37 : vector<64x128xf32>
    %41 = arith.addf %33, %40 : vector<64x128xf32>
    %c1_22 = arith.constant 1 : index
    %42 = memref.load %arg1[%c1_22] : memref<63xf32, #tpu.memory_space<smem>>
    %43 = vector.broadcast %42 : f32 to vector<64x128xf32>
    %44 = arith.mulf %43, %34 : vector<64x128xf32>
    %45 = arith.addf %41, %44 : vector<64x128xf32>
    %c127_i32_23 = arith.constant 127 : i32
    %46 = tpu.dynamic_rotate %34 by %c127_i32_23 dim 1 : vector<64x128xf32>, i32 -> vector<64x128xf32>
    %cst_24 = arith.constant 0.000000e+00 : f32
    %47 = vector.broadcast %cst_24 : f32 to vector<64x128xf32>
    %48 = arith.select %22, %47, %46 : vector<64x128xi1>, vector<64x128xf32>
    %c2 = arith.constant 2 : index
    %49 = memref.load %arg1[%c2] : memref<63xf32, #tpu.memory_space<smem>>
    %50 = vector.broadcast %49 : f32 to vector<64x128xf32>
    %51 = arith.mulf %50, %48 : vector<64x128xf32>
    %52 = arith.addf %45, %51 : vector<64x128xf32>
    %c1_25 = arith.constant 1 : index
    %c0_26 = arith.constant 0 : index
    %53 = vector.load %arg4[%c1_25, %c0_26] : memref<72x128xf32, #tpu.memory_space<vmem>>, vector<64x128xf32>
    %c1_i32_27 = arith.constant 1 : i32
    %54 = tpu.dynamic_rotate %53 by %c1_i32_27 dim 1 : vector<64x128xf32>, i32 -> vector<64x128xf32>
    %cst_28 = arith.constant 0.000000e+00 : f32
    %55 = vector.broadcast %cst_28 : f32 to vector<64x128xf32>
    %56 = arith.select %11, %55, %54 : vector<64x128xi1>, vector<64x128xf32>
    %c3 = arith.constant 3 : index
    %57 = memref.load %arg1[%c3] : memref<63xf32, #tpu.memory_space<smem>>
    %58 = vector.broadcast %57 : f32 to vector<64x128xf32>
    %59 = arith.mulf %58, %56 : vector<64x128xf32>
    %60 = arith.addf %52, %59 : vector<64x128xf32>
    %c4 = arith.constant 4 : index
    %61 = memref.load %arg1[%c4] : memref<63xf32, #tpu.memory_space<smem>>
    %62 = vector.broadcast %61 : f32 to vector<64x128xf32>
    %63 = arith.mulf %62, %53 : vector<64x128xf32>
    %64 = arith.addf %60, %63 : vector<64x128xf32>
    %c127_i32_29 = arith.constant 127 : i32
    %65 = tpu.dynamic_rotate %53 by %c127_i32_29 dim 1 : vector<64x128xf32>, i32 -> vector<64x128xf32>
    %cst_30 = arith.constant 0.000000e+00 : f32
    %66 = vector.broadcast %cst_30 : f32 to vector<64x128xf32>
    %67 = arith.select %22, %66, %65 : vector<64x128xi1>, vector<64x128xf32>
    %c5 = arith.constant 5 : index
    %68 = memref.load %arg1[%c5] : memref<63xf32, #tpu.memory_space<smem>>
    %69 = vector.broadcast %68 : f32 to vector<64x128xf32>
    %70 = arith.mulf %69, %67 : vector<64x128xf32>
    %71 = arith.addf %64, %70 : vector<64x128xf32>
    %c2_31 = arith.constant 2 : index
    %c0_32 = arith.constant 0 : index
    %72 = vector.load %arg4[%c2_31, %c0_32] : memref<72x128xf32, #tpu.memory_space<vmem>>, vector<64x128xf32>
    %c1_i32_33 = arith.constant 1 : i32
    %73 = tpu.dynamic_rotate %72 by %c1_i32_33 dim 1 : vector<64x128xf32>, i32 -> vector<64x128xf32>
    %cst_34 = arith.constant 0.000000e+00 : f32
    %74 = vector.broadcast %cst_34 : f32 to vector<64x128xf32>
    %75 = arith.select %11, %74, %73 : vector<64x128xi1>, vector<64x128xf32>
    %c6 = arith.constant 6 : index
    %76 = memref.load %arg1[%c6] : memref<63xf32, #tpu.memory_space<smem>>
    %77 = vector.broadcast %76 : f32 to vector<64x128xf32>
    %78 = arith.mulf %77, %75 : vector<64x128xf32>
    %79 = arith.addf %71, %78 : vector<64x128xf32>
    %c7 = arith.constant 7 : index
    %80 = memref.load %arg1[%c7] : memref<63xf32, #tpu.memory_space<smem>>
    %81 = vector.broadcast %80 : f32 to vector<64x128xf32>
    %82 = arith.mulf %81, %72 : vector<64x128xf32>
    %83 = arith.addf %79, %82 : vector<64x128xf32>
    %c127_i32_35 = arith.constant 127 : i32
    %84 = tpu.dynamic_rotate %72 by %c127_i32_35 dim 1 : vector<64x128xf32>, i32 -> vector<64x128xf32>
    %cst_36 = arith.constant 0.000000e+00 : f32
    %85 = vector.broadcast %cst_36 : f32 to vector<64x128xf32>
    %86 = arith.select %22, %85, %84 : vector<64x128xi1>, vector<64x128xf32>
    %c8 = arith.constant 8 : index
    %87 = memref.load %arg1[%c8] : memref<63xf32, #tpu.memory_space<smem>>
    %88 = vector.broadcast %87 : f32 to vector<64x128xf32>
    %89 = arith.mulf %88, %86 : vector<64x128xf32>
    %90 = arith.addf %83, %89 : vector<64x128xf32>
    %91 = math.tanh %90 : vector<64x128xf32>
    %c1_37 = arith.constant 1 : index
    %c0_38 = arith.constant 0 : index
    %92 = vector.load %arg4[%c1_37, %c0_38] : memref<72x128xf32, #tpu.memory_space<vmem>>, vector<64x128xf32>
    tpu.vector_store %arg4[%c1_37, %c0_38], %91 {strides = array<i32>} : memref<72x128xf32, #tpu.memory_space<vmem>>, vector<64x128xf32>,
    %cst_39 = arith.constant 0.000000e+00 : f32
    %93 = vector.broadcast %cst_39 : f32 to vector<64x128xf32>
    %c0_40 = arith.constant 0 : index
    %c0_41 = arith.constant 0 : index
    %94 = vector.load %arg4[%c0_40, %c0_41] : memref<72x128xf32, #tpu.memory_space<vmem>>, vector<64x128xf32>
    %c1_i32_42 = arith.constant 1 : i32
    %95 = tpu.dynamic_rotate %94 by %c1_i32_42 dim 1 : vector<64x128xf32>, i32 -> vector<64x128xf32>
    %cst_43 = arith.constant 0.000000e+00 : f32
    %96 = vector.broadcast %cst_43 : f32 to vector<64x128xf32>
    %97 = arith.select %11, %96, %95 : vector<64x128xi1>, vector<64x128xf32>
    %c9 = arith.constant 9 : index
    %98 = memref.load %arg1[%c9] : memref<63xf32, #tpu.memory_space<smem>>
    %99 = vector.broadcast %98 : f32 to vector<64x128xf32>
    %100 = arith.mulf %99, %97 : vector<64x128xf32>
    %101 = arith.addf %93, %100 : vector<64x128xf32>
    %c10 = arith.constant 10 : index
    %102 = memref.load %arg1[%c10] : memref<63xf32, #tpu.memory_space<smem>>
    %103 = vector.broadcast %102 : f32 to vector<64x128xf32>
    %104 = arith.mulf %103, %94 : vector<64x128xf32>
    %105 = arith.addf %101, %104 : vector<64x128xf32>
    %c127_i32_44 = arith.constant 127 : i32
    %106 = tpu.dynamic_rotate %94 by %c127_i32_44 dim 1 : vector<64x128xf32>, i32 -> vector<64x128xf32>
    %cst_45 = arith.constant 0.000000e+00 : f32
    %107 = vector.broadcast %cst_45 : f32 to vector<64x128xf32>
    %108 = arith.select %22, %107, %106 : vector<64x128xi1>, vector<64x128xf32>
    %c11 = arith.constant 11 : index
    %109 = memref.load %arg1[%c11] : memref<63xf32, #tpu.memory_space<smem>>
    %110 = vector.broadcast %109 : f32 to vector<64x128xf32>
    %111 = arith.mulf %110, %108 : vector<64x128xf32>
    %112 = arith.addf %105, %111 : vector<64x128xf32>
    %c1_46 = arith.constant 1 : index
    %c0_47 = arith.constant 0 : index
    %113 = vector.load %arg4[%c1_46, %c0_47] : memref<72x128xf32, #tpu.memory_space<vmem>>, vector<64x128xf32>
    %c1_i32_48 = arith.constant 1 : i32
    %114 = tpu.dynamic_rotate %113 by %c1_i32_48 dim 1 : vector<64x128xf32>, i32 -> vector<64x128xf32>
    %cst_49 = arith.constant 0.000000e+00 : f32
    %115 = vector.broadcast %cst_49 : f32 to vector<64x128xf32>
    %116 = arith.select %11, %115, %114 : vector<64x128xi1>, vector<64x128xf32>
    %c12 = arith.constant 12 : index
    %117 = memref.load %arg1[%c12] : memref<63xf32, #tpu.memory_space<smem>>
    %118 = vector.broadcast %117 : f32 to vector<64x128xf32>
    %119 = arith.mulf %118, %116 : vector<64x128xf32>
    %120 = arith.addf %112, %119 : vector<64x128xf32>
    %c13 = arith.constant 13 : index
    %121 = memref.load %arg1[%c13] : memref<63xf32, #tpu.memory_space<smem>>
    %122 = vector.broadcast %121 : f32 to vector<64x128xf32>
    %123 = arith.mulf %122, %113 : vector<64x128xf32>
    %124 = arith.addf %120, %123 : vector<64x128xf32>
    %c127_i32_50 = arith.constant 127 : i32
    %125 = tpu.dynamic_rotate %113 by %c127_i32_50 dim 1 : vector<64x128xf32>, i32 -> vector<64x128xf32>
    %cst_51 = arith.constant 0.000000e+00 : f32
    %126 = vector.broadcast %cst_51 : f32 to vector<64x128xf32>
    %127 = arith.select %22, %126, %125 : vector<64x128xi1>, vector<64x128xf32>
    %c14 = arith.constant 14 : index
    %128 = memref.load %arg1[%c14] : memref<63xf32, #tpu.memory_space<smem>>
    %129 = vector.broadcast %128 : f32 to vector<64x128xf32>
    %130 = arith.mulf %129, %127 : vector<64x128xf32>
    %131 = arith.addf %124, %130 : vector<64x128xf32>
    %c2_52 = arith.constant 2 : index
    %c0_53 = arith.constant 0 : index
    %132 = vector.load %arg4[%c2_52, %c0_53] : memref<72x128xf32, #tpu.memory_space<vmem>>, vector<64x128xf32>
    %c1_i32_54 = arith.constant 1 : i32
    %133 = tpu.dynamic_rotate %132 by %c1_i32_54 dim 1 : vector<64x128xf32>, i32 -> vector<64x128xf32>
    %cst_55 = arith.constant 0.000000e+00 : f32
    %134 = vector.broadcast %cst_55 : f32 to vector<64x128xf32>
    %135 = arith.select %11, %134, %133 : vector<64x128xi1>, vector<64x128xf32>
    %c15 = arith.constant 15 : index
    %136 = memref.load %arg1[%c15] : memref<63xf32, #tpu.memory_space<smem>>
    %137 = vector.broadcast %136 : f32 to vector<64x128xf32>
    %138 = arith.mulf %137, %135 : vector<64x128xf32>
    %139 = arith.addf %131, %138 : vector<64x128xf32>
    %c16 = arith.constant 16 : index
    %140 = memref.load %arg1[%c16] : memref<63xf32, #tpu.memory_space<smem>>
    %141 = vector.broadcast %140 : f32 to vector<64x128xf32>
    %142 = arith.mulf %141, %132 : vector<64x128xf32>
    %143 = arith.addf %139, %142 : vector<64x128xf32>
    %c127_i32_56 = arith.constant 127 : i32
    %144 = tpu.dynamic_rotate %132 by %c127_i32_56 dim 1 : vector<64x128xf32>, i32 -> vector<64x128xf32>
    %cst_57 = arith.constant 0.000000e+00 : f32
    %145 = vector.broadcast %cst_57 : f32 to vector<64x128xf32>
    %146 = arith.select %22, %145, %144 : vector<64x128xi1>, vector<64x128xf32>
    %c17 = arith.constant 17 : index
    %147 = memref.load %arg1[%c17] : memref<63xf32, #tpu.memory_space<smem>>
    %148 = vector.broadcast %147 : f32 to vector<64x128xf32>
    %149 = arith.mulf %148, %146 : vector<64x128xf32>
    %150 = arith.addf %143, %149 : vector<64x128xf32>
    %151 = math.tanh %150 : vector<64x128xf32>
    %c1_58 = arith.constant 1 : index
    %c0_59 = arith.constant 0 : index
    %152 = vector.load %arg4[%c1_58, %c0_59] : memref<72x128xf32, #tpu.memory_space<vmem>>, vector<64x128xf32>
    tpu.vector_store %arg4[%c1_58, %c0_59], %151 {strides = array<i32>} : memref<72x128xf32, #tpu.memory_space<vmem>>, vector<64x128xf32>,
    %cst_60 = arith.constant 0.000000e+00 : f32
    %153 = vector.broadcast %cst_60 : f32 to vector<64x128xf32>
    %c0_61 = arith.constant 0 : index
    %c0_62 = arith.constant 0 : index
    %154 = vector.load %arg4[%c0_61, %c0_62] : memref<72x128xf32, #tpu.memory_space<vmem>>, vector<64x128xf32>
    %c1_i32_63 = arith.constant 1 : i32
    %155 = tpu.dynamic_rotate %154 by %c1_i32_63 dim 1 : vector<64x128xf32>, i32 -> vector<64x128xf32>
    %cst_64 = arith.constant 0.000000e+00 : f32
    %156 = vector.broadcast %cst_64 : f32 to vector<64x128xf32>
    %157 = arith.select %11, %156, %155 : vector<64x128xi1>, vector<64x128xf32>
    %c18 = arith.constant 18 : index
    %158 = memref.load %arg1[%c18] : memref<63xf32, #tpu.memory_space<smem>>
    %159 = vector.broadcast %158 : f32 to vector<64x128xf32>
    %160 = arith.mulf %159, %157 : vector<64x128xf32>
    %161 = arith.addf %153, %160 : vector<64x128xf32>
    %c19 = arith.constant 19 : index
    %162 = memref.load %arg1[%c19] : memref<63xf32, #tpu.memory_space<smem>>
    %163 = vector.broadcast %162 : f32 to vector<64x128xf32>
    %164 = arith.mulf %163, %154 : vector<64x128xf32>
    %165 = arith.addf %161, %164 : vector<64x128xf32>
    %c127_i32_65 = arith.constant 127 : i32
    %166 = tpu.dynamic_rotate %154 by %c127_i32_65 dim 1 : vector<64x128xf32>, i32 -> vector<64x128xf32>
    %cst_66 = arith.constant 0.000000e+00 : f32
    %167 = vector.broadcast %cst_66 : f32 to vector<64x128xf32>
    %168 = arith.select %22, %167, %166 : vector<64x128xi1>, vector<64x128xf32>
    %c20 = arith.constant 20 : index
    %169 = memref.load %arg1[%c20] : memref<63xf32, #tpu.memory_space<smem>>
    %170 = vector.broadcast %169 : f32 to vector<64x128xf32>
    %171 = arith.mulf %170, %168 : vector<64x128xf32>
    %172 = arith.addf %165, %171 : vector<64x128xf32>
    %c1_67 = arith.constant 1 : index
    %c0_68 = arith.constant 0 : index
    %173 = vector.load %arg4[%c1_67, %c0_68] : memref<72x128xf32, #tpu.memory_space<vmem>>, vector<64x128xf32>
    %c1_i32_69 = arith.constant 1 : i32
    %174 = tpu.dynamic_rotate %173 by %c1_i32_69 dim 1 : vector<64x128xf32>, i32 -> vector<64x128xf32>
    %cst_70 = arith.constant 0.000000e+00 : f32
    %175 = vector.broadcast %cst_70 : f32 to vector<64x128xf32>
    %176 = arith.select %11, %175, %174 : vector<64x128xi1>, vector<64x128xf32>
    %c21 = arith.constant 21 : index
    %177 = memref.load %arg1[%c21] : memref<63xf32, #tpu.memory_space<smem>>
    %178 = vector.broadcast %177 : f32 to vector<64x128xf32>
    %179 = arith.mulf %178, %176 : vector<64x128xf32>
    %180 = arith.addf %172, %179 : vector<64x128xf32>
    %c22 = arith.constant 22 : index
    %181 = memref.load %arg1[%c22] : memref<63xf32, #tpu.memory_space<smem>>
    %182 = vector.broadcast %181 : f32 to vector<64x128xf32>
    %183 = arith.mulf %182, %173 : vector<64x128xf32>
    %184 = arith.addf %180, %183 : vector<64x128xf32>
    %c127_i32_71 = arith.constant 127 : i32
    %185 = tpu.dynamic_rotate %173 by %c127_i32_71 dim 1 : vector<64x128xf32>, i32 -> vector<64x128xf32>
    %cst_72 = arith.constant 0.000000e+00 : f32
    %186 = vector.broadcast %cst_72 : f32 to vector<64x128xf32>
    %187 = arith.select %22, %186, %185 : vector<64x128xi1>, vector<64x128xf32>
    %c23 = arith.constant 23 : index
    %188 = memref.load %arg1[%c23] : memref<63xf32, #tpu.memory_space<smem>>
    %189 = vector.broadcast %188 : f32 to vector<64x128xf32>
    %190 = arith.mulf %189, %187 : vector<64x128xf32>
    %191 = arith.addf %184, %190 : vector<64x128xf32>
    %c2_73 = arith.constant 2 : index
    %c0_74 = arith.constant 0 : index
    %192 = vector.load %arg4[%c2_73, %c0_74] : memref<72x128xf32, #tpu.memory_space<vmem>>, vector<64x128xf32>
    %c1_i32_75 = arith.constant 1 : i32
    %193 = tpu.dynamic_rotate %192 by %c1_i32_75 dim 1 : vector<64x128xf32>, i32 -> vector<64x128xf32>
    %cst_76 = arith.constant 0.000000e+00 : f32
    %194 = vector.broadcast %cst_76 : f32 to vector<64x128xf32>
    %195 = arith.select %11, %194, %193 : vector<64x128xi1>, vector<64x128xf32>
    %c24 = arith.constant 24 : index
    %196 = memref.load %arg1[%c24] : memref<63xf32, #tpu.memory_space<smem>>
    %197 = vector.broadcast %196 : f32 to vector<64x128xf32>
    %198 = arith.mulf %197, %195 : vector<64x128xf32>
    %199 = arith.addf %191, %198 : vector<64x128xf32>
    %c25 = arith.constant 25 : index
    %200 = memref.load %arg1[%c25] : memref<63xf32, #tpu.memory_space<smem>>
    %201 = vector.broadcast %200 : f32 to vector<64x128xf32>
    %202 = arith.mulf %201, %192 : vector<64x128xf32>
    %203 = arith.addf %199, %202 : vector<64x128xf32>
    %c127_i32_77 = arith.constant 127 : i32
    %204 = tpu.dynamic_rotate %192 by %c127_i32_77 dim 1 : vector<64x128xf32>, i32 -> vector<64x128xf32>
    %cst_78 = arith.constant 0.000000e+00 : f32
    %205 = vector.broadcast %cst_78 : f32 to vector<64x128xf32>
    %206 = arith.select %22, %205, %204 : vector<64x128xi1>, vector<64x128xf32>
    %c26 = arith.constant 26 : index
    %207 = memref.load %arg1[%c26] : memref<63xf32, #tpu.memory_space<smem>>
    %208 = vector.broadcast %207 : f32 to vector<64x128xf32>
    %209 = arith.mulf %208, %206 : vector<64x128xf32>
    %210 = arith.addf %203, %209 : vector<64x128xf32>
    %211 = math.tanh %210 : vector<64x128xf32>
    %c1_79 = arith.constant 1 : index
    %c0_80 = arith.constant 0 : index
    %212 = vector.load %arg4[%c1_79, %c0_80] : memref<72x128xf32, #tpu.memory_space<vmem>>, vector<64x128xf32>
    tpu.vector_store %arg4[%c1_79, %c0_80], %211 {strides = array<i32>} : memref<72x128xf32, #tpu.memory_space<vmem>>, vector<64x128xf32>,
    %cst_81 = arith.constant 0.000000e+00 : f32
    %213 = vector.broadcast %cst_81 : f32 to vector<64x128xf32>
    %c0_82 = arith.constant 0 : index
    %c0_83 = arith.constant 0 : index
    %214 = vector.load %arg4[%c0_82, %c0_83] : memref<72x128xf32, #tpu.memory_space<vmem>>, vector<64x128xf32>
    %c1_i32_84 = arith.constant 1 : i32
    %215 = tpu.dynamic_rotate %214 by %c1_i32_84 dim 1 : vector<64x128xf32>, i32 -> vector<64x128xf32>
    %cst_85 = arith.constant 0.000000e+00 : f32
    %216 = vector.broadcast %cst_85 : f32 to vector<64x128xf32>
    %217 = arith.select %11, %216, %215 : vector<64x128xi1>, vector<64x128xf32>
    %c27 = arith.constant 27 : index
    %218 = memref.load %arg1[%c27] : memref<63xf32, #tpu.memory_space<smem>>
    %219 = vector.broadcast %218 : f32 to vector<64x128xf32>
    %220 = arith.mulf %219, %217 : vector<64x128xf32>
    %221 = arith.addf %213, %220 : vector<64x128xf32>
    %c28 = arith.constant 28 : index
    %222 = memref.load %arg1[%c28] : memref<63xf32, #tpu.memory_space<smem>>
    %223 = vector.broadcast %222 : f32 to vector<64x128xf32>
    %224 = arith.mulf %223, %214 : vector<64x128xf32>
    %225 = arith.addf %221, %224 : vector<64x128xf32>
    %c127_i32_86 = arith.constant 127 : i32
    %226 = tpu.dynamic_rotate %214 by %c127_i32_86 dim 1 : vector<64x128xf32>, i32 -> vector<64x128xf32>
    %cst_87 = arith.constant 0.000000e+00 : f32
    %227 = vector.broadcast %cst_87 : f32 to vector<64x128xf32>
    %228 = arith.select %22, %227, %226 : vector<64x128xi1>, vector<64x128xf32>
    %c29 = arith.constant 29 : index
    %229 = memref.load %arg1[%c29] : memref<63xf32, #tpu.memory_space<smem>>
    %230 = vector.broadcast %229 : f32 to vector<64x128xf32>
    %231 = arith.mulf %230, %228 : vector<64x128xf32>
    %232 = arith.addf %225, %231 : vector<64x128xf32>
    %c1_88 = arith.constant 1 : index
    %c0_89 = arith.constant 0 : index
    %233 = vector.load %arg4[%c1_88, %c0_89] : memref<72x128xf32, #tpu.memory_space<vmem>>, vector<64x128xf32>
    %c1_i32_90 = arith.constant 1 : i32
    %234 = tpu.dynamic_rotate %233 by %c1_i32_90 dim 1 : vector<64x128xf32>, i32 -> vector<64x128xf32>
    %cst_91 = arith.constant 0.000000e+00 : f32
    %235 = vector.broadcast %cst_91 : f32 to vector<64x128xf32>
    %236 = arith.select %11, %235, %234 : vector<64x128xi1>, vector<64x128xf32>
    %c30 = arith.constant 30 : index
    %237 = memref.load %arg1[%c30] : memref<63xf32, #tpu.memory_space<smem>>
    %238 = vector.broadcast %237 : f32 to vector<64x128xf32>
    %239 = arith.mulf %238, %236 : vector<64x128xf32>
    %240 = arith.addf %232, %239 : vector<64x128xf32>
    %c31 = arith.constant 31 : index
    %241 = memref.load %arg1[%c31] : memref<63xf32, #tpu.memory_space<smem>>
    %242 = vector.broadcast %241 : f32 to vector<64x128xf32>
    %243 = arith.mulf %242, %233 : vector<64x128xf32>
    %244 = arith.addf %240, %243 : vector<64x128xf32>
    %c127_i32_92 = arith.constant 127 : i32
    %245 = tpu.dynamic_rotate %233 by %c127_i32_92 dim 1 : vector<64x128xf32>, i32 -> vector<64x128xf32>
    %cst_93 = arith.constant 0.000000e+00 : f32
    %246 = vector.broadcast %cst_93 : f32 to vector<64x128xf32>
    %247 = arith.select %22, %246, %245 : vector<64x128xi1>, vector<64x128xf32>
    %c32 = arith.constant 32 : index
    %248 = memref.load %arg1[%c32] : memref<63xf32, #tpu.memory_space<smem>>
    %249 = vector.broadcast %248 : f32 to vector<64x128xf32>
    %250 = arith.mulf %249, %247 : vector<64x128xf32>
    %251 = arith.addf %244, %250 : vector<64x128xf32>
    %c2_94 = arith.constant 2 : index
    %c0_95 = arith.constant 0 : index
    %252 = vector.load %arg4[%c2_94, %c0_95] : memref<72x128xf32, #tpu.memory_space<vmem>>, vector<64x128xf32>
    %c1_i32_96 = arith.constant 1 : i32
    %253 = tpu.dynamic_rotate %252 by %c1_i32_96 dim 1 : vector<64x128xf32>, i32 -> vector<64x128xf32>
    %cst_97 = arith.constant 0.000000e+00 : f32
    %254 = vector.broadcast %cst_97 : f32 to vector<64x128xf32>
    %255 = arith.select %11, %254, %253 : vector<64x128xi1>, vector<64x128xf32>
    %c33 = arith.constant 33 : index
    %256 = memref.load %arg1[%c33] : memref<63xf32, #tpu.memory_space<smem>>
    %257 = vector.broadcast %256 : f32 to vector<64x128xf32>
    %258 = arith.mulf %257, %255 : vector<64x128xf32>
    %259 = arith.addf %251, %258 : vector<64x128xf32>
    %c34 = arith.constant 34 : index
    %260 = memref.load %arg1[%c34] : memref<63xf32, #tpu.memory_space<smem>>
    %261 = vector.broadcast %260 : f32 to vector<64x128xf32>
    %262 = arith.mulf %261, %252 : vector<64x128xf32>
    %263 = arith.addf %259, %262 : vector<64x128xf32>
    %c127_i32_98 = arith.constant 127 : i32
    %264 = tpu.dynamic_rotate %252 by %c127_i32_98 dim 1 : vector<64x128xf32>, i32 -> vector<64x128xf32>
    %cst_99 = arith.constant 0.000000e+00 : f32
    %265 = vector.broadcast %cst_99 : f32 to vector<64x128xf32>
    %266 = arith.select %22, %265, %264 : vector<64x128xi1>, vector<64x128xf32>
    %c35 = arith.constant 35 : index
    %267 = memref.load %arg1[%c35] : memref<63xf32, #tpu.memory_space<smem>>
    %268 = vector.broadcast %267 : f32 to vector<64x128xf32>
    %269 = arith.mulf %268, %266 : vector<64x128xf32>
    %270 = arith.addf %263, %269 : vector<64x128xf32>
    %271 = math.tanh %270 : vector<64x128xf32>
    %c1_100 = arith.constant 1 : index
    %c0_101 = arith.constant 0 : index
    %272 = vector.load %arg4[%c1_100, %c0_101] : memref<72x128xf32, #tpu.memory_space<vmem>>, vector<64x128xf32>
    tpu.vector_store %arg4[%c1_100, %c0_101], %271 {strides = array<i32>} : memref<72x128xf32, #tpu.memory_space<vmem>>, vector<64x128xf32>,
    %cst_102 = arith.constant 0.000000e+00 : f32
    %273 = vector.broadcast %cst_102 : f32 to vector<64x128xf32>
    %c0_103 = arith.constant 0 : index
    %c0_104 = arith.constant 0 : index
    %274 = vector.load %arg5[%c0_103, %c0_104] : memref<72x128xf32, #tpu.memory_space<vmem>>, vector<64x128xf32>
    %c1_i32_105 = arith.constant 1 : i32
    %275 = tpu.dynamic_rotate %274 by %c1_i32_105 dim 1 : vector<64x128xf32>, i32 -> vector<64x128xf32>
    %cst_106 = arith.constant 0.000000e+00 : f32
    %276 = vector.broadcast %cst_106 : f32 to vector<64x128xf32>
    %277 = arith.select %11, %276, %275 : vector<64x128xi1>, vector<64x128xf32>
    %c45 = arith.constant 45 : index
    %278 = memref.load %arg1[%c45] : memref<63xf32, #tpu.memory_space<smem>>
    %279 = vector.broadcast %278 : f32 to vector<64x128xf32>
    %280 = arith.mulf %279, %277 : vector<64x128xf32>
    %281 = arith.addf %273, %280 : vector<64x128xf32>
    %c46 = arith.constant 46 : index
    %282 = memref.load %arg1[%c46] : memref<63xf32, #tpu.memory_space<smem>>
    %283 = vector.broadcast %282 : f32 to vector<64x128xf32>
    %284 = arith.mulf %283, %274 : vector<64x128xf32>
    %285 = arith.addf %281, %284 : vector<64x128xf32>
    %c127_i32_107 = arith.constant 127 : i32
    %286 = tpu.dynamic_rotate %274 by %c127_i32_107 dim 1 : vector<64x128xf32>, i32 -> vector<64x128xf32>
    %cst_108 = arith.constant 0.000000e+00 : f32
    %287 = vector.broadcast %cst_108 : f32 to vector<64x128xf32>
    %288 = arith.select %22, %287, %286 : vector<64x128xi1>, vector<64x128xf32>
    %c47 = arith.constant 47 : index
    %289 = memref.load %arg1[%c47] : memref<63xf32, #tpu.memory_space<smem>>
    %290 = vector.broadcast %289 : f32 to vector<64x128xf32>
    %291 = arith.mulf %290, %288 : vector<64x128xf32>
    %292 = arith.addf %285, %291 : vector<64x128xf32>
    %c1_109 = arith.constant 1 : index
    %c0_110 = arith.constant 0 : index
    %293 = vector.load %arg5[%c1_109, %c0_110] : memref<72x128xf32, #tpu.memory_space<vmem>>, vector<64x128xf32>
    %c1_i32_111 = arith.constant 1 : i32
    %294 = tpu.dynamic_rotate %293 by %c1_i32_111 dim 1 : vector<64x128xf32>, i32 -> vector<64x128xf32>
    %cst_112 = arith.constant 0.000000e+00 : f32
    %295 = vector.broadcast %cst_112 : f32 to vector<64x128xf32>
    %296 = arith.select %11, %295, %294 : vector<64x128xi1>, vector<64x128xf32>
    %c48 = arith.constant 48 : index
    %297 = memref.load %arg1[%c48] : memref<63xf32, #tpu.memory_space<smem>>
    %298 = vector.broadcast %297 : f32 to vector<64x128xf32>
    %299 = arith.mulf %298, %296 : vector<64x128xf32>
    %300 = arith.addf %292, %299 : vector<64x128xf32>
    %c49 = arith.constant 49 : index
    %301 = memref.load %arg1[%c49] : memref<63xf32, #tpu.memory_space<smem>>
    %302 = vector.broadcast %301 : f32 to vector<64x128xf32>
    %303 = arith.mulf %302, %293 : vector<64x128xf32>
    %304 = arith.addf %300, %303 : vector<64x128xf32>
    %c127_i32_113 = arith.constant 127 : i32
    %305 = tpu.dynamic_rotate %293 by %c127_i32_113 dim 1 : vector<64x128xf32>, i32 -> vector<64x128xf32>
    %cst_114 = arith.constant 0.000000e+00 : f32
    %306 = vector.broadcast %cst_114 : f32 to vector<64x128xf32>
    %307 = arith.select %22, %306, %305 : vector<64x128xi1>, vector<64x128xf32>
    %c50 = arith.constant 50 : index
    %308 = memref.load %arg1[%c50] : memref<63xf32, #tpu.memory_space<smem>>
    %309 = vector.broadcast %308 : f32 to vector<64x128xf32>
    %310 = arith.mulf %309, %307 : vector<64x128xf32>
    %311 = arith.addf %304, %310 : vector<64x128xf32>
    %c2_115 = arith.constant 2 : index
    %c0_116 = arith.constant 0 : index
    %312 = vector.load %arg5[%c2_115, %c0_116] : memref<72x128xf32, #tpu.memory_space<vmem>>, vector<64x128xf32>
    %c1_i32_117 = arith.constant 1 : i32
    %313 = tpu.dynamic_rotate %312 by %c1_i32_117 dim 1 : vector<64x128xf32>, i32 -> vector<64x128xf32>
    %cst_118 = arith.constant 0.000000e+00 : f32
    %314 = vector.broadcast %cst_118 : f32 to vector<64x128xf32>
    %315 = arith.select %11, %314, %313 : vector<64x128xi1>, vector<64x128xf32>
    %c51 = arith.constant 51 : index
    %316 = memref.load %arg1[%c51] : memref<63xf32, #tpu.memory_space<smem>>
    %317 = vector.broadcast %316 : f32 to vector<64x128xf32>
    %318 = arith.mulf %317, %315 : vector<64x128xf32>
    %319 = arith.addf %311, %318 : vector<64x128xf32>
    %c52 = arith.constant 52 : index
    %320 = memref.load %arg1[%c52] : memref<63xf32, #tpu.memory_space<smem>>
    %321 = vector.broadcast %320 : f32 to vector<64x128xf32>
    %322 = arith.mulf %321, %312 : vector<64x128xf32>
    %323 = arith.addf %319, %322 : vector<64x128xf32>
    %c127_i32_119 = arith.constant 127 : i32
    %324 = tpu.dynamic_rotate %312 by %c127_i32_119 dim 1 : vector<64x128xf32>, i32 -> vector<64x128xf32>
    %cst_120 = arith.constant 0.000000e+00 : f32
    %325 = vector.broadcast %cst_120 : f32 to vector<64x128xf32>
    %326 = arith.select %22, %325, %324 : vector<64x128xi1>, vector<64x128xf32>
    %c53 = arith.constant 53 : index
    %327 = memref.load %arg1[%c53] : memref<63xf32, #tpu.memory_space<smem>>
    %328 = vector.broadcast %327 : f32 to vector<64x128xf32>
    %329 = arith.mulf %328, %326 : vector<64x128xf32>
    %330 = arith.addf %323, %329 : vector<64x128xf32>
    %331 = math.tanh %330 : vector<64x128xf32>
    %c1_121 = arith.constant 1 : index
    %c0_122 = arith.constant 0 : index
    %332 = vector.load %arg5[%c1_121, %c0_122] : memref<72x128xf32, #tpu.memory_space<vmem>>, vector<64x128xf32>
    tpu.vector_store %arg5[%c1_121, %c0_122], %331 {strides = array<i32>} : memref<72x128xf32, #tpu.memory_space<vmem>>, vector<64x128xf32>,
    %cst_123 = arith.constant 0.000000e+00 : f32
    %333 = vector.broadcast %cst_123 : f32 to vector<64x128xf32>
    %c0_124 = arith.constant 0 : index
    %c0_125 = arith.constant 0 : index
    %334 = vector.load %arg4[%c0_124, %c0_125] : memref<72x128xf32, #tpu.memory_space<vmem>>, vector<64x128xf32>
    %c1_i32_126 = arith.constant 1 : i32
    %335 = tpu.dynamic_rotate %334 by %c1_i32_126 dim 1 : vector<64x128xf32>, i32 -> vector<64x128xf32>
    %cst_127 = arith.constant 0.000000e+00 : f32
    %336 = vector.broadcast %cst_127 : f32 to vector<64x128xf32>
    %337 = arith.select %11, %336, %335 : vector<64x128xi1>, vector<64x128xf32>
    %c36 = arith.constant 36 : index
    %338 = memref.load %arg1[%c36] : memref<63xf32, #tpu.memory_space<smem>>
    %339 = vector.broadcast %338 : f32 to vector<64x128xf32>
    %340 = arith.mulf %339, %337 : vector<64x128xf32>
    %341 = arith.addf %333, %340 : vector<64x128xf32>
    %c37 = arith.constant 37 : index
    %342 = memref.load %arg1[%c37] : memref<63xf32, #tpu.memory_space<smem>>
    %343 = vector.broadcast %342 : f32 to vector<64x128xf32>
    %344 = arith.mulf %343, %334 : vector<64x128xf32>
    %345 = arith.addf %341, %344 : vector<64x128xf32>
    %c127_i32_128 = arith.constant 127 : i32
    %346 = tpu.dynamic_rotate %334 by %c127_i32_128 dim 1 : vector<64x128xf32>, i32 -> vector<64x128xf32>
    %cst_129 = arith.constant 0.000000e+00 : f32
    %347 = vector.broadcast %cst_129 : f32 to vector<64x128xf32>
    %348 = arith.select %22, %347, %346 : vector<64x128xi1>, vector<64x128xf32>
    %c38 = arith.constant 38 : index
    %349 = memref.load %arg1[%c38] : memref<63xf32, #tpu.memory_space<smem>>
    %350 = vector.broadcast %349 : f32 to vector<64x128xf32>
    %351 = arith.mulf %350, %348 : vector<64x128xf32>
    %352 = arith.addf %345, %351 : vector<64x128xf32>
    %c1_130 = arith.constant 1 : index
    %c0_131 = arith.constant 0 : index
    %353 = vector.load %arg4[%c1_130, %c0_131] : memref<72x128xf32, #tpu.memory_space<vmem>>, vector<64x128xf32>
    %c1_i32_132 = arith.constant 1 : i32
    %354 = tpu.dynamic_rotate %353 by %c1_i32_132 dim 1 : vector<64x128xf32>, i32 -> vector<64x128xf32>
    %cst_133 = arith.constant 0.000000e+00 : f32
    %355 = vector.broadcast %cst_133 : f32 to vector<64x128xf32>
    %356 = arith.select %11, %355, %354 : vector<64x128xi1>, vector<64x128xf32>
    %c39 = arith.constant 39 : index
    %357 = memref.load %arg1[%c39] : memref<63xf32, #tpu.memory_space<smem>>
    %358 = vector.broadcast %357 : f32 to vector<64x128xf32>
    %359 = arith.mulf %358, %356 : vector<64x128xf32>
    %360 = arith.addf %352, %359 : vector<64x128xf32>
    %c40 = arith.constant 40 : index
    %361 = memref.load %arg1[%c40] : memref<63xf32, #tpu.memory_space<smem>>
    %362 = vector.broadcast %361 : f32 to vector<64x128xf32>
    %363 = arith.mulf %362, %353 : vector<64x128xf32>
    %364 = arith.addf %360, %363 : vector<64x128xf32>
    %c127_i32_134 = arith.constant 127 : i32
    %365 = tpu.dynamic_rotate %353 by %c127_i32_134 dim 1 : vector<64x128xf32>, i32 -> vector<64x128xf32>
    %cst_135 = arith.constant 0.000000e+00 : f32
    %366 = vector.broadcast %cst_135 : f32 to vector<64x128xf32>
    %367 = arith.select %22, %366, %365 : vector<64x128xi1>, vector<64x128xf32>
    %c41 = arith.constant 41 : index
    %368 = memref.load %arg1[%c41] : memref<63xf32, #tpu.memory_space<smem>>
    %369 = vector.broadcast %368 : f32 to vector<64x128xf32>
    %370 = arith.mulf %369, %367 : vector<64x128xf32>
    %371 = arith.addf %364, %370 : vector<64x128xf32>
    %c2_136 = arith.constant 2 : index
    %c0_137 = arith.constant 0 : index
    %372 = vector.load %arg4[%c2_136, %c0_137] : memref<72x128xf32, #tpu.memory_space<vmem>>, vector<64x128xf32>
    %c1_i32_138 = arith.constant 1 : i32
    %373 = tpu.dynamic_rotate %372 by %c1_i32_138 dim 1 : vector<64x128xf32>, i32 -> vector<64x128xf32>
    %cst_139 = arith.constant 0.000000e+00 : f32
    %374 = vector.broadcast %cst_139 : f32 to vector<64x128xf32>
    %375 = arith.select %11, %374, %373 : vector<64x128xi1>, vector<64x128xf32>
    %c42 = arith.constant 42 : index
    %376 = memref.load %arg1[%c42] : memref<63xf32, #tpu.memory_space<smem>>
    %377 = vector.broadcast %376 : f32 to vector<64x128xf32>
    %378 = arith.mulf %377, %375 : vector<64x128xf32>
    %379 = arith.addf %371, %378 : vector<64x128xf32>
    %c43 = arith.constant 43 : index
    %380 = memref.load %arg1[%c43] : memref<63xf32, #tpu.memory_space<smem>>
    %381 = vector.broadcast %380 : f32 to vector<64x128xf32>
    %382 = arith.mulf %381, %372 : vector<64x128xf32>
    %383 = arith.addf %379, %382 : vector<64x128xf32>
    %c127_i32_140 = arith.constant 127 : i32
    %384 = tpu.dynamic_rotate %372 by %c127_i32_140 dim 1 : vector<64x128xf32>, i32 -> vector<64x128xf32>
    %cst_141 = arith.constant 0.000000e+00 : f32
    %385 = vector.broadcast %cst_141 : f32 to vector<64x128xf32>
    %386 = arith.select %22, %385, %384 : vector<64x128xi1>, vector<64x128xf32>
    %c44 = arith.constant 44 : index
    %387 = memref.load %arg1[%c44] : memref<63xf32, #tpu.memory_space<smem>>
    %388 = vector.broadcast %387 : f32 to vector<64x128xf32>
    %389 = arith.mulf %388, %386 : vector<64x128xf32>
    %390 = arith.addf %383, %389 : vector<64x128xf32>
    %cst_142 = arith.constant 0.000000e+00 : f32
    %391 = vector.broadcast %cst_142 : f32 to vector<64x128xf32>
    %c0_143 = arith.constant 0 : index
    %c0_144 = arith.constant 0 : index
    %392 = vector.load %arg5[%c0_143, %c0_144] : memref<72x128xf32, #tpu.memory_space<vmem>>, vector<64x128xf32>
    %c1_i32_145 = arith.constant 1 : i32
    %393 = tpu.dynamic_rotate %392 by %c1_i32_145 dim 1 : vector<64x128xf32>, i32 -> vector<64x128xf32>
    %cst_146 = arith.constant 0.000000e+00 : f32
    %394 = vector.broadcast %cst_146 : f32 to vector<64x128xf32>
    %395 = arith.select %11, %394, %393 : vector<64x128xi1>, vector<64x128xf32>
    %c54 = arith.constant 54 : index
    %396 = memref.load %arg1[%c54] : memref<63xf32, #tpu.memory_space<smem>>
    %397 = vector.broadcast %396 : f32 to vector<64x128xf32>
    %398 = arith.mulf %397, %395 : vector<64x128xf32>
    %399 = arith.addf %391, %398 : vector<64x128xf32>
    %c55 = arith.constant 55 : index
    %400 = memref.load %arg1[%c55] : memref<63xf32, #tpu.memory_space<smem>>
    %401 = vector.broadcast %400 : f32 to vector<64x128xf32>
    %402 = arith.mulf %401, %392 : vector<64x128xf32>
    %403 = arith.addf %399, %402 : vector<64x128xf32>
    %c127_i32_147 = arith.constant 127 : i32
    %404 = tpu.dynamic_rotate %392 by %c127_i32_147 dim 1 : vector<64x128xf32>, i32 -> vector<64x128xf32>
    %cst_148 = arith.constant 0.000000e+00 : f32
    %405 = vector.broadcast %cst_148 : f32 to vector<64x128xf32>
    %406 = arith.select %22, %405, %404 : vector<64x128xi1>, vector<64x128xf32>
    %c56 = arith.constant 56 : index
    %407 = memref.load %arg1[%c56] : memref<63xf32, #tpu.memory_space<smem>>
    %408 = vector.broadcast %407 : f32 to vector<64x128xf32>
    %409 = arith.mulf %408, %406 : vector<64x128xf32>
    %410 = arith.addf %403, %409 : vector<64x128xf32>
    %c1_149 = arith.constant 1 : index
    %c0_150 = arith.constant 0 : index
    %411 = vector.load %arg5[%c1_149, %c0_150] : memref<72x128xf32, #tpu.memory_space<vmem>>, vector<64x128xf32>
    %c1_i32_151 = arith.constant 1 : i32
    %412 = tpu.dynamic_rotate %411 by %c1_i32_151 dim 1 : vector<64x128xf32>, i32 -> vector<64x128xf32>
    %cst_152 = arith.constant 0.000000e+00 : f32
    %413 = vector.broadcast %cst_152 : f32 to vector<64x128xf32>
    %414 = arith.select %11, %413, %412 : vector<64x128xi1>, vector<64x128xf32>
    %c57 = arith.constant 57 : index
    %415 = memref.load %arg1[%c57] : memref<63xf32, #tpu.memory_space<smem>>
    %416 = vector.broadcast %415 : f32 to vector<64x128xf32>
    %417 = arith.mulf %416, %414 : vector<64x128xf32>
    %418 = arith.addf %410, %417 : vector<64x128xf32>
    %c58 = arith.constant 58 : index
    %419 = memref.load %arg1[%c58] : memref<63xf32, #tpu.memory_space<smem>>
    %420 = vector.broadcast %419 : f32 to vector<64x128xf32>
    %421 = arith.mulf %420, %411 : vector<64x128xf32>
    %422 = arith.addf %418, %421 : vector<64x128xf32>
    %c127_i32_153 = arith.constant 127 : i32
    %423 = tpu.dynamic_rotate %411 by %c127_i32_153 dim 1 : vector<64x128xf32>, i32 -> vector<64x128xf32>
    %cst_154 = arith.constant 0.000000e+00 : f32
    %424 = vector.broadcast %cst_154 : f32 to vector<64x128xf32>
    %425 = arith.select %22, %424, %423 : vector<64x128xi1>, vector<64x128xf32>
    %c59 = arith.constant 59 : index
    %426 = memref.load %arg1[%c59] : memref<63xf32, #tpu.memory_space<smem>>
    %427 = vector.broadcast %426 : f32 to vector<64x128xf32>
    %428 = arith.mulf %427, %425 : vector<64x128xf32>
    %429 = arith.addf %422, %428 : vector<64x128xf32>
    %c2_155 = arith.constant 2 : index
    %c0_156 = arith.constant 0 : index
    %430 = vector.load %arg5[%c2_155, %c0_156] : memref<72x128xf32, #tpu.memory_space<vmem>>, vector<64x128xf32>
    %c1_i32_157 = arith.constant 1 : i32
    %431 = tpu.dynamic_rotate %430 by %c1_i32_157 dim 1 : vector<64x128xf32>, i32 -> vector<64x128xf32>
    %cst_158 = arith.constant 0.000000e+00 : f32
    %432 = vector.broadcast %cst_158 : f32 to vector<64x128xf32>
    %433 = arith.select %11, %432, %431 : vector<64x128xi1>, vector<64x128xf32>
    %c60 = arith.constant 60 : index
    %434 = memref.load %arg1[%c60] : memref<63xf32, #tpu.memory_space<smem>>
    %435 = vector.broadcast %434 : f32 to vector<64x128xf32>
    %436 = arith.mulf %435, %433 : vector<64x128xf32>
    %437 = arith.addf %429, %436 : vector<64x128xf32>
    %c61 = arith.constant 61 : index
    %438 = memref.load %arg1[%c61] : memref<63xf32, #tpu.memory_space<smem>>
    %439 = vector.broadcast %438 : f32 to vector<64x128xf32>
    %440 = arith.mulf %439, %430 : vector<64x128xf32>
    %441 = arith.addf %437, %440 : vector<64x128xf32>
    %c127_i32_159 = arith.constant 127 : i32
    %442 = tpu.dynamic_rotate %430 by %c127_i32_159 dim 1 : vector<64x128xf32>, i32 -> vector<64x128xf32>
    %cst_160 = arith.constant 0.000000e+00 : f32
    %443 = vector.broadcast %cst_160 : f32 to vector<64x128xf32>
    %444 = arith.select %22, %443, %442 : vector<64x128xi1>, vector<64x128xf32>
    %c62 = arith.constant 62 : index
    %445 = memref.load %arg1[%c62] : memref<63xf32, #tpu.memory_space<smem>>
    %446 = vector.broadcast %445 : f32 to vector<64x128xf32>
    %447 = arith.mulf %446, %444 : vector<64x128xf32>
    %448 = arith.addf %441, %447 : vector<64x128xf32>
    %449 = math.tanh %390 : vector<64x128xf32>
    %450 = math.tanh %448 : vector<64x128xf32>
    %cst_161 = arith.constant 0.666666686 : f32
    %451 = vector.broadcast %cst_161 : f32 to vector<64x128xf32>
    %452 = arith.mulf %451, %450 : vector<64x128xf32>
    %453 = arith.addf %449, %452 : vector<64x128xf32>
    %c0_162 = arith.constant 0 : index
    %c0_163 = arith.constant 0 : index
    %c0_164 = arith.constant 0 : index
    %c0_165 = arith.constant 0 : index
    %454 = vector.load %arg3[%c0_162, %c0_163, %c0_164, %c0_165] : memref<1x1x64x128xf32, #tpu.memory_space<vmem>>, vector<1x1x64x128xf32>
    %455 = vector.shape_cast %454 : vector<1x1x64x128xf32> to vector<64x128xf32>
    %456 = vector.shape_cast %453 : vector<64x128xf32> to vector<1x1x64x128xf32>
    tpu.vector_store %arg3[%c0_162, %c0_163, %c0_164, %c0_165], %456 {strides = array<i32>} : memref<1x1x64x128xf32, #tpu.memory_space<vmem>>, vector<1x1x64x128xf32>,
    return
  }
  func.func @transform_0(%arg0: i32) -> i32 {
    %c0_i32 = arith.constant 0 : i32
    %c0_i32_0 = arith.constant 0 : i32
    return %c0_i32 : i32
  }
  func.func @transform_1(%arg0: i32) -> (i32, i32, i32, i32) {
    %c0_i32 = arith.constant 0 : i32
    %c0_i32_0 = arith.constant 0 : i32
    %c0_i32_1 = arith.constant 0 : i32
    %c0_i32_2 = arith.constant 0 : i32
    return %arg0, %c0_i32, %c0_i32_0, %c0_i32_1 : i32, i32, i32, i32
  }
  func.func @transform_2(%arg0: i32) -> (i32, i32, i32, i32) {
    %c0_i32 = arith.constant 0 : i32
    %c0_i32_0 = arith.constant 0 : i32
    %c0_i32_1 = arith.constant 0 : i32
    %c0_i32_2 = arith.constant 0 : i32
    return %arg0, %c0_i32, %c0_i32_0, %c0_i32_1 : i32, i32, i32, i32
  }
}

</mosaic_0001>

<bundles_post_ra>
// kernel: squeeze.1
= control target key start
LH: loop header
LB: loop body
LE: loop exit
PB: predicated region body
PF: predicated region fallthrough
CT: control target
= control target key end

     0   :  { %vm3_vm0 = vcmask 523264   ;;  %s714_s12 = smov 64   ;;  %s973_s0 = inlined_call_operand.vmem [shape: f32[1,1,64,128], index: 0, kind: input, shape index: {}]   ;;  %s974_s1 = inlined_call_operand.vmem [shape: f32[1,64,2,64], index: 1, kind: output, shape index: {}]  }
   0x1   :  { %v644_v0 = vld [vmem:[%s973_s0 + $0x10] sm:$0xff]   ;;  %v55_v1 = vld [vmem:[%s973_s0] sm:$0xff]   ;;  %v645_v2 = vld [vmem:[%s973_s0 + $0x18] sm:$0xff]  }
   0x2   :  { %74 = vrot.lane.b32.xlu1 %v644_v0, %s714_s12  ;;  %56 = vrot.lane.b32.xlu0 %v55_v1, %s714_s12  ;;  %v643_v3 = vld [vmem:[%s973_s0 + $0x8] sm:$0xff]   ;;  %17 = vst.msk [vmem:[#allocation0 + $0x80] ss:$8 sm:$0xf] %vm3_vm0, %v644_v0   ;;  %v646_v5 = vld [vmem:[%s973_s0 + $0x20] sm:$0xff]  }
   0x3   :  { %v647_v4 = vld [vmem:[%s973_s0 + $0x28] sm:$0xff]   ;;  %19 = vst.msk [vmem:[#allocation0 + $0x80] ss:$8 sm:$0xf0] %vm3_vm0, %v644_v0   ;;  %v649_v6 = vld [vmem:[%s973_s0 + $0x38] sm:$0xff]   ;;  %v648_v7 = vld [vmem:[%s973_s0 + $0x30] sm:$0xff]  }
   0x4   :  { %4 = vst.msk [vmem:[#allocation0] ss:$8 sm:$0xf] %vm3_vm0, %v55_v1   ;;  %5 = vst.msk [vmem:[#allocation0] ss:$8 sm:$0xf0] %vm3_vm0, %v55_v1  }
   0x5   :  { %24 = vst.msk [vmem:[#allocation0 + $0xc0] ss:$8 sm:$0xf] %vm3_vm0, %v645_v2   ;;  %26 = vst.msk [vmem:[#allocation0 + $0xc0] ss:$8 sm:$0xf0] %vm3_vm0, %v645_v2  }
   0x6   :  { %10 = vst.msk [vmem:[#allocation0 + $0x40] ss:$8 sm:$0xf] %vm3_vm0, %v643_v3   ;;  %12 = vst.msk [vmem:[#allocation0 + $0x40] ss:$8 sm:$0xf0] %vm3_vm0, %v643_v3   ;;  %83 = vrot.lane.b32.xlu1 %v645_v2, %s714_s12  ;;  %65 = vrot.lane.b32.xlu0 %v643_v3, %s714_s12 }
   0x7   :  { %38 = vst.msk [vmem:[#allocation0 + $0x140] ss:$8 sm:$0xf] %vm3_vm0, %v647_v4   ;;  %40 = vst.msk [vmem:[#allocation0 + $0x140] ss:$8 sm:$0xf0] %vm3_vm0, %v647_v4  }
   0x8   :  { %31 = vst.msk [vmem:[#allocation0 + $0x100] ss:$8 sm:$0xf] %vm3_vm0, %v646_v5   ;;  %33 = vst.msk [vmem:[#allocation0 + $0x100] ss:$8 sm:$0xf0] %vm3_vm0, %v646_v5  }
   0x9   :  { %52 = vst.msk [vmem:[#allocation0 + $0x1c0] ss:$8 sm:$0xf] %vm3_vm0, %v649_v6   ;;  %54 = vst.msk [vmem:[#allocation0 + $0x1c0] ss:$8 sm:$0xf0] %vm3_vm0, %v649_v6  }
   0xa   :  { %45 = vst.msk [vmem:[#allocation0 + $0x180] ss:$8 sm:$0xf] %vm3_vm0, %v648_v7   ;;  %47 = vst.msk [vmem:[#allocation0 + $0x180] ss:$8 sm:$0xf0] %vm3_vm0, %v648_v7   ;;  %101 = vrot.lane.b32.xlu1 %v647_v4, %s714_s12  ;;  %92 = vrot.lane.b32.xlu0 %v646_v5, %s714_s12 }
   0xe   :  { %119 = vrot.lane.b32.xlu1 %v649_v6, %s714_s12  ;;  %110 = vrot.lane.b32.xlu0 %v648_v7, %s714_s12 }
  0x74   :  { %v75_v8 = vpop.permute.xlu1 %74   ;;  %v57_v9 = vpop.permute.xlu0 %56  }
  0x75   :  { %78 = vst.msk [vmem:[#allocation0 + $0x81] ss:$8 sm:$0xf] %vm3_vm0, %v75_v8   ;;  %80 = vst.msk [vmem:[#allocation0 + $0x81] ss:$8 sm:$0xf0] %vm3_vm0, %v75_v8  }
  0x76   :  { %60 = vst.msk [vmem:[#allocation0 + $0x1] ss:$8 sm:$0xf] %vm3_vm0, %v57_v9   ;;  %62 = vst.msk [vmem:[#allocation0 + $0x1] ss:$8 sm:$0xf0] %vm3_vm0, %v57_v9  }
  0x78   :  { %v84_v10 = vpop.permute.xlu1 %83   ;;  %v66_v11 = vpop.permute.xlu0 %65  }
  0x79   :  { %87 = vst.msk [vmem:[#allocation0 + $0xc1] ss:$8 sm:$0xf] %vm3_vm0, %v84_v10   ;;  %89 = vst.msk [vmem:[#allocation0 + $0xc1] ss:$8 sm:$0xf0] %vm3_vm0, %v84_v10  }
  0x7a   :  { %69 = vst.msk [vmem:[#allocation0 + $0x41] ss:$8 sm:$0xf] %vm3_vm0, %v66_v11   ;;  %71 = vst.msk [vmem:[#allocation0 + $0x41] ss:$8 sm:$0xf0] %vm3_vm0, %v66_v11  }
  0x7c   :  { %v239_v12 = vld [vmem:[#allocation0 + $0x80] sm:$0x3]  ;;  %v246_v13 = vld [vmem:[#allocation0 + $0x88] sm:$0x3]  ;;  %v253_v14 = vld [vmem:[#allocation0 + $0x90] sm:$0x3]  ;;  %v102_v15 = vpop.permute.xlu1 %101   ;;  %v93_v16 = vpop.permute.xlu0 %92  }
  0x7d   :  { %665 = vst [vmem:[%s974_s1 + $0x20] sm:$0x3] %v239_v12  ;;  %666 = vst [vmem:[%s974_s1 + $0x22] sm:$0x3] %v246_v13  ;;  %v260_v17 = vld [vmem:[#allocation0 + $0x98] sm:$0x3] }
  0x7e   :  { %667 = vst [vmem:[%s974_s1 + $0x24] sm:$0x3] %v253_v14  ;;  %v267_v18 = vld [vmem:[#allocation0 + $0xa0] sm:$0x3]  ;;  %v274_v19 = vld [vmem:[#allocation0 + $0xa8] sm:$0x3] }
  0x7f   :  { %105 = vst.msk [vmem:[#allocation0 + $0x141] ss:$8 sm:$0xf] %vm3_vm0, %v102_v15   ;;  %107 = vst.msk [vmem:[#allocation0 + $0x141] ss:$8 sm:$0xf0] %vm3_vm0, %v102_v15  }
  0x80   :  { %96 = vst.msk [vmem:[#allocation0 + $0x101] ss:$8 sm:$0xf] %vm3_vm0, %v93_v16   ;;  %98 = vst.msk [vmem:[#allocation0 + $0x101] ss:$8 sm:$0xf0] %vm3_vm0, %v93_v16   ;;  %v120_v29 = vpop.permute.xlu1 %119   ;;  %v111_v30 = vpop.permute.xlu0 %110  }
  0x81   :  { %668 = vst [vmem:[%s974_s1 + $0x26] sm:$0x3] %v260_v17  ;;  %669 = vst [vmem:[%s974_s1 + $0x28] sm:$0x3] %v267_v18  ;;  %v281_v20 = vld [vmem:[#allocation0 + $0xb0] sm:$0x3] }
  0x82   :  { %670 = vst [vmem:[%s974_s1 + $0x2a] sm:$0x3] %v274_v19  ;;  %v288_v21 = vld [vmem:[#allocation0 + $0xb8] sm:$0x3]  ;;  %v130_v22 = vld [vmem:[#allocation0] sm:$0x3] }
  0x83   :  { %671 = vst [vmem:[%s974_s1 + $0x2c] sm:$0x3] %v281_v20  ;;  %672 = vst [vmem:[%s974_s1 + $0x2e] sm:$0x3] %v288_v21  ;;  %v135_v23 = vld [vmem:[#allocation0 + $0x8] sm:$0x3] }
  0x84   :  { %133 = vst [vmem:[%s974_s1] sm:$0x3] %v130_v22  ;;  %v141_v24 = vld [vmem:[#allocation0 + $0x10] sm:$0x3]  ;;  %v148_v25 = vld [vmem:[#allocation0 + $0x18] sm:$0x3] }
  0x85   :  { %650 = vst [vmem:[%s974_s1 + $0x2] sm:$0x3] %v135_v23  ;;  %651 = vst [vmem:[%s974_s1 + $0x4] sm:$0x3] %v141_v24  ;;  %v155_v26 = vld [vmem:[#allocation0 + $0x20] sm:$0x3] }
  0x86   :  { %652 = vst [vmem:[%s974_s1 + $0x6] sm:$0x3] %v148_v25  ;;  %v162_v27 = vld [vmem:[#allocation0 + $0x28] sm:$0x3]  ;;  %v169_v28 = vld [vmem:[#allocation0 + $0x30] sm:$0x3] }
  0x87   :  { %653 = vst [vmem:[%s974_s1 + $0x8] sm:$0x3] %v155_v26  ;;  %654 = vst [vmem:[%s974_s1 + $0xa] sm:$0x3] %v162_v27  ;;  %v176_v31 = vld [vmem:[#allocation0 + $0x38] sm:$0x3] }
  0x88   :  { %655 = vst [vmem:[%s974_s1 + $0xc] sm:$0x3] %v169_v28  ;;  %v295_v32 = vld [vmem:[#allocation0 + $0xc0] sm:$0x3]  ;;  %v302_v33 = vld [vmem:[#allocation0 + $0xc8] sm:$0x3] }
  0x89   :  { %123 = vst.msk [vmem:[#allocation0 + $0x1c1] ss:$8 sm:$0xf] %vm3_vm0, %v120_v29   ;;  %125 = vst.msk [vmem:[#allocation0 + $0x1c1] ss:$8 sm:$0xf0] %vm3_vm0, %v120_v29  }
  0x8a   :  { %114 = vst.msk [vmem:[#allocation0 + $0x181] ss:$8 sm:$0xf] %vm3_vm0, %v111_v30   ;;  %116 = vst.msk [vmem:[#allocation0 + $0x181] ss:$8 sm:$0xf0] %vm3_vm0, %v111_v30  }
  0x8b   :  { %656 = vst [vmem:[%s974_s1 + $0xe] sm:$0x3] %v176_v31  ;;  %673 = vst [vmem:[%s974_s1 + $0x30] sm:$0x3] %v295_v32  ;;  %v309_v34 = vld [vmem:[#allocation0 + $0xd0] sm:$0x3] }
  0x8c   :  { %674 = vst [vmem:[%s974_s1 + $0x32] sm:$0x3] %v302_v33  ;;  %v316_v35 = vld [vmem:[#allocation0 + $0xd8] sm:$0x3]  ;;  %v323_v36 = vld [vmem:[#allocation0 + $0xe0] sm:$0x3] }
  0x8d   :  { %675 = vst [vmem:[%s974_s1 + $0x34] sm:$0x3] %v309_v34  ;;  %676 = vst [vmem:[%s974_s1 + $0x36] sm:$0x3] %v316_v35  ;;  %v330_v37 = vld [vmem:[#allocation0 + $0xe8] sm:$0x3] }
  0x8e   :  { %677 = vst [vmem:[%s974_s1 + $0x38] sm:$0x3] %v323_v36  ;;  %v337_v38 = vld [vmem:[#allocation0 + $0xf0] sm:$0x3]  ;;  %v344_v39 = vld [vmem:[#allocation0 + $0xf8] sm:$0x3] }
  0x8f   :  { %678 = vst [vmem:[%s974_s1 + $0x3a] sm:$0x3] %v330_v37  ;;  %679 = vst [vmem:[%s974_s1 + $0x3c] sm:$0x3] %v337_v38  ;;  %v183_v40 = vld [vmem:[#allocation0 + $0x40] sm:$0x3] }
  0x90   :  { %680 = vst [vmem:[%s974_s1 + $0x3e] sm:$0x3] %v344_v39  ;;  %v190_v41 = vld [vmem:[#allocation0 + $0x48] sm:$0x3]  ;;  %v197_v42 = vld [vmem:[#allocation0 + $0x50] sm:$0x3] }
  0x91   :  { %657 = vst [vmem:[%s974_s1 + $0x10] sm:$0x3] %v183_v40  ;;  %658 = vst [vmem:[%s974_s1 + $0x12] sm:$0x3] %v190_v41  ;;  %v204_v43 = vld [vmem:[#allocation0 + $0x58] sm:$0x3] }
  0x92   :  { %659 = vst [vmem:[%s974_s1 + $0x14] sm:$0x3] %v197_v42  ;;  %v211_v44 = vld [vmem:[#allocation0 + $0x60] sm:$0x3]  ;;  %v218_v45 = vld [vmem:[#allocation0 + $0x68] sm:$0x3] }
  0x93   :  { %660 = vst [vmem:[%s974_s1 + $0x16] sm:$0x3] %v204_v43  ;;  %661 = vst [vmem:[%s974_s1 + $0x18] sm:$0x3] %v211_v44  ;;  %v225_v46 = vld [vmem:[#allocation0 + $0x70] sm:$0x3] }
  0x94   :  { %662 = vst [vmem:[%s974_s1 + $0x1a] sm:$0x3] %v218_v45  ;;  %v232_v47 = vld [vmem:[#allocation0 + $0x78] sm:$0x3]  ;;  %v407_v48 = vld [vmem:[#allocation0 + $0x140] sm:$0x3] }
  0x95   :  { %663 = vst [vmem:[%s974_s1 + $0x1c] sm:$0x3] %v225_v46  ;;  %664 = vst [vmem:[%s974_s1 + $0x1e] sm:$0x3] %v232_v47  ;;  %v414_v49 = vld [vmem:[#allocation0 + $0x148] sm:$0x3] }
  0x96   :  { %689 = vst [vmem:[%s974_s1 + $0x50] sm:$0x3] %v407_v48  ;;  %v421_v50 = vld [vmem:[#allocation0 + $0x150] sm:$0x3]  ;;  %v428_v51 = vld [vmem:[#allocation0 + $0x158] sm:$0x3] }
  0x97   :  { %690 = vst [vmem:[%s974_s1 + $0x52] sm:$0x3] %v414_v49  ;;  %691 = vst [vmem:[%s974_s1 + $0x54] sm:$0x3] %v421_v50  ;;  %v435_v52 = vld [vmem:[#allocation0 + $0x160] sm:$0x3] }
  0x98   :  { %692 = vst [vmem:[%s974_s1 + $0x56] sm:$0x3] %v428_v51  ;;  %v442_v53 = vld [vmem:[#allocation0 + $0x168] sm:$0x3]  ;;  %v449_v54 = vld [vmem:[#allocation0 + $0x170] sm:$0x3] }
  0x99   :  { %693 = vst [vmem:[%s974_s1 + $0x58] sm:$0x3] %v435_v52  ;;  %694 = vst [vmem:[%s974_s1 + $0x5a] sm:$0x3] %v442_v53  ;;  %v456_v55 = vld [vmem:[#allocation0 + $0x178] sm:$0x3] }
  0x9a   :  { %695 = vst [vmem:[%s974_s1 + $0x5c] sm:$0x3] %v449_v54  ;;  %v351_v56 = vld [vmem:[#allocation0 + $0x100] sm:$0x3]  ;;  %v358_v57 = vld [vmem:[#allocation0 + $0x108] sm:$0x3] }
  0x9b   :  { %696 = vst [vmem:[%s974_s1 + $0x5e] sm:$0x3] %v456_v55  ;;  %681 = vst [vmem:[%s974_s1 + $0x40] sm:$0x3] %v351_v56  ;;  %v365_v58 = vld [vmem:[#allocation0 + $0x110] sm:$0x3] }
  0x9c   :  { %682 = vst [vmem:[%s974_s1 + $0x42] sm:$0x3] %v358_v57  ;;  %v372_v59 = vld [vmem:[#allocation0 + $0x118] sm:$0x3]  ;;  %v379_v60 = vld [vmem:[#allocation0 + $0x120] sm:$0x3] }
  0x9d   :  { %683 = vst [vmem:[%s974_s1 + $0x44] sm:$0x3] %v365_v58  ;;  %684 = vst [vmem:[%s974_s1 + $0x46] sm:$0x3] %v372_v59  ;;  %v386_v61 = vld [vmem:[#allocation0 + $0x128] sm:$0x3] }
  0x9e   :  { %685 = vst [vmem:[%s974_s1 + $0x48] sm:$0x3] %v379_v60  ;;  %v393_v62 = vld [vmem:[#allocation0 + $0x130] sm:$0x3]  ;;  %v400_v63 = vld [vmem:[#allocation0 + $0x138] sm:$0x3] }
  0x9f   :  { %686 = vst [vmem:[%s974_s1 + $0x4a] sm:$0x3] %v386_v61  ;;  %687 = vst [vmem:[%s974_s1 + $0x4c] sm:$0x3] %v393_v62  ;;  %v519_v0 = vld [vmem:[#allocation0 + $0x1c0] sm:$0x3] }
  0xa0   :  { %688 = vst [vmem:[%s974_s1 + $0x4e] sm:$0x3] %v400_v63  ;;  %v526_v1 = vld [vmem:[#allocation0 + $0x1c8] sm:$0x3]  ;;  %v533_v2 = vld [vmem:[#allocation0 + $0x1d0] sm:$0x3] }
  0xa1   :  { %705 = vst [vmem:[%s974_s1 + $0x70] sm:$0x3] %v519_v0  ;;  %706 = vst [vmem:[%s974_s1 + $0x72] sm:$0x3] %v526_v1  ;;  %v540_v3 = vld [vmem:[#allocation0 + $0x1d8] sm:$0x3] }
  0xa2   :  { %707 = vst [vmem:[%s974_s1 + $0x74] sm:$0x3] %v533_v2  ;;  %v547_v4 = vld [vmem:[#allocation0 + $0x1e0] sm:$0x3]  ;;  %v554_v5 = vld [vmem:[#allocation0 + $0x1e8] sm:$0x3] }
  0xa3   :  { %708 = vst [vmem:[%s974_s1 + $0x76] sm:$0x3] %v540_v3  ;;  %709 = vst [vmem:[%s974_s1 + $0x78] sm:$0x3] %v547_v4  ;;  %v561_v6 = vld [vmem:[#allocation0 + $0x1f0] sm:$0x3] }
  0xa4   :  { %710 = vst [vmem:[%s974_s1 + $0x7a] sm:$0x3] %v554_v5  ;;  %v568_v7 = vld [vmem:[#allocation0 + $0x1f8] sm:$0x3]  ;;  %v463_v8 = vld [vmem:[#allocation0 + $0x180] sm:$0x3] }
  0xa5   :  { %711 = vst [vmem:[%s974_s1 + $0x7c] sm:$0x3] %v561_v6  ;;  %712 = vst [vmem:[%s974_s1 + $0x7e] sm:$0x3] %v568_v7  ;;  %v470_v9 = vld [vmem:[#allocation0 + $0x188] sm:$0x3] }
  0xa6   :  { %697 = vst [vmem:[%s974_s1 + $0x60] sm:$0x3] %v463_v8  ;;  %v477_v10 = vld [vmem:[#allocation0 + $0x190] sm:$0x3]  ;;  %v484_v11 = vld [vmem:[#allocation0 + $0x198] sm:$0x3] }
  0xa7   :  { %698 = vst [vmem:[%s974_s1 + $0x62] sm:$0x3] %v470_v9  ;;  %699 = vst [vmem:[%s974_s1 + $0x64] sm:$0x3] %v477_v10  ;;  %v491_v12 = vld [vmem:[#allocation0 + $0x1a0] sm:$0x3] }
  0xa8   :  { %700 = vst [vmem:[%s974_s1 + $0x66] sm:$0x3] %v484_v11  ;;  %v498_v13 = vld [vmem:[#allocation0 + $0x1a8] sm:$0x3]  ;;  %v505_v14 = vld [vmem:[#allocation0 + $0x1b0] sm:$0x3] }
  0xa9   :  { %701 = vst [vmem:[%s974_s1 + $0x68] sm:$0x3] %v491_v12  ;;  %702 = vst [vmem:[%s974_s1 + $0x6a] sm:$0x3] %v498_v13  ;;  %v512_v15 = vld [vmem:[#allocation0 + $0x1b8] sm:$0x3] }
  0xaa   :  { %703 = vst [vmem:[%s974_s1 + $0x6c] sm:$0x3] %v505_v14  ;;  %704 = vst [vmem:[%s974_s1 + $0x6e] sm:$0x3] %v512_v15 }

// kernel: convnet_forward.1
= control target key start
LH: loop header
LB: loop body
LE: loop exit
PB: predicated region body
PF: predicated region fallthrough
CT: control target
= control target key end

     0   :  { %7 = vsyncpa [#allocation6], 0  ;;  %s6405_s0 = inlined_call_operand.vmem [shape: f32[63], index: 0, kind: input, shape index: {}]   ;;  %s6406_s1 = inlined_call_operand.hbm [shape: f32[2,1,64,64], index: 1, kind: input, shape index: {}]   ;;  %s6407_s2 = inlined_call_operand.vmem [shape: f32[1,1,64,128], index: 2, kind: output, shape index: {}]  }
   0x1   :  { %s15_s11 = sshll.u32 %s6405_s0, 4  ;;  %s16_s11 = int_to_ptr.vmem [resolvable:$true] %s15_s11 }
   0x2   :  { %8 = vsyncpa [#allocation5], 0  ;;  %s2798_s12 = scalar_lea.vmem %s16_s11, 16  ;;  %p2803_p1 = scmp.lt.s32.totalorder %s16_s11, %s16_s11 }
   0x3   :  { %p2799_p0 = scmp.ne.s32.totalorder %s16_s11, %s2798_s12  ;;  %p2804_p2 = scmp.lt.s32.totalorder %s2798_s12, %s2798_s12 }
   0x5   :  { %p2805_p3 = por %p2804_p2, %p2803_p1 }
   0x7   :  { %p2806_p4 = pnand %p2805_p3, %p2799_p0 }
   0x9   :  { %2809 = shalt.err (!%p2806_p4)
}
   0xa   :  { %s2834_s13 = smov [#allocation4]   ;;  %s2835_s14 = smov [#allocation7]  }
   0xb   :  { %18 = dma.vmem_to_smem %s16_s11, 16, %s2834_s13, [#allocation6]  }
   0xc   :  { %s24_s15 = sshll.u32 %s2835_s14, 4  ;;  %s25_s15 = int_to_ptr.vmem [resolvable:$true] %s24_s15 }
   0xd   :  { %s2818_s16 = scalar_lea.vmem %s25_s15, 2048  ;;  %p2823_p6 = scmp.lt.s32.totalorder %s25_s15, %s25_s15 }
   0xe   :  { %p2819_p5 = scmp.ne.s32.totalorder %s25_s15, %s2818_s16  ;;  %p2824_p7 = scmp.lt.s32.totalorder %s2818_s16, %s2818_s16 }
  0x10   :  { %p2825_p8 = por %p2824_p7, %p2823_p6 }
  0x12   :  { %p2826_p9 = pnand %p2825_p8, %p2819_p5 }
  0x14   :  { %2829 = shalt.err (!%p2826_p9)
}
  0x15   :  { %s2836_s0 = smov 128   ;;  %s2837_s17 = smov 8  }
  0x16   :  { %30 = dma.hbm_to_vmem [thread:$0]  %s6406_s1, 2048, %s25_s15, [#allocation5], %s2836_s0, %s2836_s0, %s2837_s17  }
  0x17   :  { %2830 = dma.done.wait [#allocation6], 16  }
  0x18   :  { %2831 = vsyncadd [#allocation6], 4294967280 }
  0x19   :  { %2832 = dma.done.wait [#allocation5], 2048  }
  0x1a   :  { %2833 = vsyncadd [#allocation5], 4294965248 }
  0x1b   :  { %37 = sfence }
  0x1c   :  { %v83_v0 = vld [vmem:[#allocation7 + $0x50] sm:$0xff]  ;;  %v81_v1 = vld [vmem:[#allocation7 + $0x40] sm:$0xff]  ;;  %s2838_s20 = smov 64   ;;  %v2839_v2 = vmov 0.0   ;;  %vm71_vm0 = vcmask 523264   ;;  %v84_v3 = vld [vmem:[#allocation7 + $0x58] sm:$0xff] }
  0x1d   :  { %101 = vrot.lane.b32.xlu1 %v83_v0, %s2838_s20  ;;  %97 = vrot.lane.b32.xlu0 %v81_v1, %s2838_s20  ;;  %56 = vst [vmem:[#allocation2 + $0x10] sm:$0xff] %v2839_v2  ;;  %57 = vst [vmem:[#allocation2 + $0x18] sm:$0xff] %v2839_v2  ;;  %v82_v4 = vld [vmem:[#allocation7 + $0x48] sm:$0xff]  ;;  %v65_v5 = vld [vmem:[#allocation7 + $0x10] sm:$0xff]  ;;  %vm121_vm1 = vcmask 1048064   ;;  %s2840_s1 = smov 1  }
  0x1e   :  { %54 = vst [vmem:[#allocation2] sm:$0xff] %v2839_v2  ;;  %55 = vst [vmem:[#allocation2 + $0x8] sm:$0xff] %v2839_v2  ;;  %v63_v6 = vld [vmem:[#allocation7] sm:$0xff]  ;;  %v66_v7 = vld [vmem:[#allocation7 + $0x18] sm:$0xff]  ;;  %s2841_s21 = smov 127   ;;  %s2587_s22 = sld [smem:[#allocation4 + $0x4]] }
  0x1f   :  { %58 = vst [vmem:[#allocation2 + $0x20] sm:$0xff] %v2839_v2  ;;  %59 = vst [vmem:[#allocation2 + $0x28] sm:$0xff] %v2839_v2  ;;  %v64_v8 = vld [vmem:[#allocation7 + $0x8] sm:$0xff]  ;;  %v67_v10 = vld [vmem:[#allocation7 + $0x20] sm:$0xff]  ;;  %s2584_s23 = sld [smem:[#allocation4 + $0x1]] }
  0x20   :  { %60 = vst [vmem:[#allocation2 + $0x30] sm:$0xff] %v2839_v2  ;;  %61 = vst [vmem:[#allocation2 + $0x38] sm:$0xff] %v2839_v2  ;;  %v68_v9 = vld [vmem:[#allocation7 + $0x28] sm:$0xff]  ;;  %v70_v11 = vld [vmem:[#allocation7 + $0x38] sm:$0xff]  ;;  %s2590_s24 = sld [smem:[#allocation4 + $0x7]] }
  0x21   :  { %62 = vst [vmem:[#allocation2 + $0x40] sm:$0xff] %v2839_v2  ;;  %74 = vst.msk [vmem:[#allocation2 + $0x11] sm:$0xff] %vm71_vm0, %v65_v5  ;;  %103 = vrot.lane.b32.xlu1 %v84_v3, %s2838_s20  ;;  %99 = vrot.lane.b32.xlu0 %v82_v4, %s2838_s20  ;;  %v69_v12 = vld [vmem:[#allocation7 + $0x30] sm:$0xff]  ;;  %v86_v13 = vld [vmem:[#allocation7 + $0x68] sm:$0xff]  ;;  %s180_s25 = sld [smem:[#allocation4]] }
  0x22   :  { %72 = vst.msk [vmem:[#allocation2 + $0x1] sm:$0xff] %vm71_vm0, %v63_v6  ;;  %75 = vst.msk [vmem:[#allocation2 + $0x19] sm:$0xff] %vm71_vm0, %v66_v7  ;;  %v85_v14 = vld [vmem:[#allocation7 + $0x60] sm:$0xff]  ;;  %v88_v15 = vld [vmem:[#allocation7 + $0x78] sm:$0xff]  ;;  %s3159_s26 = sld [smem:[#allocation4 + $0x2]] }
  0x23   :  { %73 = vst.msk [vmem:[#allocation2 + $0x9] sm:$0xff] %vm71_vm0, %v64_v8  ;;  %77 = vst.msk [vmem:[#allocation2 + $0x29] sm:$0xff] %vm71_vm0, %v68_v9  ;;  %v87_v16 = vld [vmem:[#allocation7 + $0x70] sm:$0xff]  ;;  %s3189_s27 = sld [smem:[#allocation4 + $0x3]] }
  0x24   :  { %76 = vst.msk [vmem:[#allocation2 + $0x21] sm:$0xff] %vm71_vm0, %v67_v10  ;;  %79 = vst.msk [vmem:[#allocation2 + $0x39] sm:$0xff] %vm71_vm0, %v70_v11  ;;  %v38_v11 = vlaneseq  ;;  %s3201_s28 = sld [smem:[#allocation4 + $0x5]] }
  0x25   :  { %78 = vst.msk [vmem:[#allocation2 + $0x31] sm:$0xff] %vm71_vm0, %v69_v12  ;;  %107 = vrot.lane.b32.xlu1 %v86_v13, %s2838_s20  ;;  %105 = vrot.lane.b32.xlu0 %v85_v14, %s2838_s20  ;;  %s3217_s29 = sld [smem:[#allocation4 + $0x6]] }
  0x26   :  { %v3147_v14 = vand.u32 127, %v38_v11  ;;  %s3230_s30 = sld [smem:[#allocation4 + $0x8]] }
  0x27   :  { %s2620_s3 = sld [smem:[#allocation4 + $0x2e]] }
  0x28   :  { %vm43_vm2 = vcmp.ge.s32.totalorder %v3147_v14, 64  ;;  %vm44_vm3 = vcmp.lt.s32.totalorder %v3147_v14, 65  ;;  %vm41_vm4 = vcmp.lt.s32.totalorder %v3147_v14, 1  ;;  %vm47_vm7 = vcmp.ge.s32.totalorder %v3147_v14, 63  ;;  %s2623_s4 = sld [smem:[#allocation4 + $0x31]] }
  0x29   :  { %111 = vrot.lane.b32.xlu1 %v88_v15, %s2838_s20  ;;  %109 = vrot.lane.b32.xlu0 %v87_v16, %s2838_s20  ;;  %vm45_vm5 = vmand %vm43_vm2, %vm44_vm3  ;;  %vm48_vm8 = vcmp.lt.s32.totalorder %v3147_v14, 64  ;;  %vm50_vm9 = vcmp.ge.s32.totalorder %v3147_v14, 127  ;;  %s2626_s5 = sld [smem:[#allocation4 + $0x34]] }
  0x2a   :  { %vm3191_vm6 = vmor %vm41_vm4, %vm45_vm5  ;;  %s3776_s6 = sld [smem:[#allocation4 + $0x2d]] }
  0x2b   :  { %vm3254_vm10 = vmand %vm47_vm7, %vm48_vm8  ;;  %s3780_s7 = sld [smem:[#allocation4 + $0xd]] }
  0x2c   :  { %vm3298_vm11 = vmor %vm3254_vm10, %vm50_vm9  ;;  %s3784_s8 = sld [smem:[#allocation4 + $0xa]] }
  0x2d   :  { %s3786_s9 = sld [smem:[#allocation4 + $0x10]] }
  0x2e   :  { %s3788_s10 = sld [smem:[#allocation4 + $0x2f]] }
  0x2f   :  { %s3792_s11 = sld [smem:[#allocation4 + $0x30]] }
  0x30   :  { %s3802_s12 = sld [smem:[#allocation4 + $0x32]] }
  0x31   :  { %s3810_s13 = sld [smem:[#allocation4 + $0x33]] }
  0x32   :  { %s3821_s14 = sld [smem:[#allocation4 + $0x9]] }
  0x33   :  { %s3922_s15 = sld [smem:[#allocation4 + $0xb]] }
  0x34   :  { %s4042_s16 = sld [smem:[#allocation4 + $0xc]] }
  0x35   :  { %s4116_s0 = sld [smem:[#allocation4 + $0xe]] }
  0x36   :  { %s4124_s17 = sld [smem:[#allocation4 + $0xf]] }
  0x37   :  { %s4130_s18 = sld [smem:[#allocation4 + $0x11]] }
  0x38   :  { %s4380_s19 = sld [smem:[#allocation4 + $0x35]] }
  0x39   :  { %s2605_s20 = sld [smem:[#allocation4 + $0x16]] }
  0x8f   :  { %v102_v17 = vpop.permute.xlu1 %101  ;;  %v98_v18 = vpop.permute.xlu0 %97 }
  0x90   :  { %124 = vst.msk [vmem:[#allocation2 + $0x11] sm:$0xff] %vm121_vm1, %v102_v17  ;;  %122 = vst.msk [vmem:[#allocation2 + $0x1] sm:$0xff] %vm121_vm1, %v98_v18  ;;  %v309_v17 = vstv %s2587_s22  ;;  %v199_v18 = vstv %s2584_s23  ;;  %s2602_s22 = sld [smem:[#allocation4 + $0x13]] }
  0x91   :  { %s2608_s23 = sld [smem:[#allocation4 + $0x19]] }
  0x93   :  { %v104_v19 = vpop.permute.xlu1 %103  ;;  %v100_v20 = vpop.permute.xlu0 %99 }
  0x94   :  { %125 = vst.msk [vmem:[#allocation2 + $0x19] sm:$0xff] %vm121_vm1, %v104_v19  ;;  %123 = vst.msk [vmem:[#allocation2 + $0x9] sm:$0xff] %vm121_vm1, %v100_v20 }
  0x97   :  { %v2883_v21 = vld [vmem:[#allocation2] sm:$0xff]  ;;  %v108_v22 = vpop.permute.xlu1 %107  ;;  %v106_v23 = vpop.permute.xlu0 %105  ;;  %v2949_v36 = vld [vmem:[#allocation2 + $0x11] sm:$0xff] }
  0x98   :  { %139 = vst [vmem:[#allocation3] sm:$0xff] %v2883_v21  ;;  %127 = vst.msk [vmem:[#allocation2 + $0x29] sm:$0xff] %vm121_vm1, %v108_v22  ;;  %156 = vrot.lane.b32.xlu0 %v2883_v21, %s2840_s1  ;;  %v2941_v34 = vld [vmem:[#allocation2 + $0x1] sm:$0xff]  ;;  %v3187_v11 = vmul.f32 %v199_v18, %v2883_v21 }
  0x99   :  { %126 = vst.msk [vmem:[#allocation2 + $0x21] sm:$0xff] %vm121_vm1, %v106_v23  ;;  %v3176_v23 = vstv %s2590_s24  ;;  %s2601_s24 = sld [smem:[#allocation4 + $0x12]] }
  0x9a   :  { %6474 = vst [vmem:[#allocation22_spill] sm:$0xff] %v3176_v23 }
  0x9b   :  { %v2890_v24 = vld [vmem:[#allocation2 + $0x18] sm:$0xff]  ;;  %v2892_v25 = vld [vmem:[#allocation2 + $0x8] sm:$0xff]  ;;  %v2894_v26 = vld [vmem:[#allocation2 + $0x10] sm:$0xff]  ;;  %v112_v27 = vpop.permute.xlu1 %111  ;;  %v110_v28 = vpop.permute.xlu0 %109 }
  0x9c   :  { %142 = vst [vmem:[#allocation3 + $0x18] sm:$0xff] %v2890_v24  ;;  %140 = vst [vmem:[#allocation3 + $0x8] sm:$0xff] %v2892_v25  ;;  %158 = vrot.lane.b32.xlu1 %v2892_v25, %s2840_s1  ;;  %160 = vrot.lane.b32.xlu0 %v2894_v26, %s2840_s1  ;;  %v2947_v35 = vld [vmem:[#allocation2 + $0x9] sm:$0xff]  ;;  %v2955_v37 = vld [vmem:[#allocation2 + $0x19] sm:$0xff] }
  0x9d   :  { %141 = vst [vmem:[#allocation3 + $0x10] sm:$0xff] %v2894_v26  ;;  %129 = vst.msk [vmem:[#allocation2 + $0x39] sm:$0xff] %vm121_vm1, %v112_v27  ;;  %v2989_v42 = vld [vmem:[#allocation2 + $0x2] sm:$0xff]  ;;  %v2995_v43 = vld [vmem:[#allocation2 + $0xa] sm:$0xff]  ;;  %v3179_v27 = vmul.f32 %v309_v17, %v2941_v34 }
  0x9e   :  { %128 = vst.msk [vmem:[#allocation2 + $0x31] sm:$0xff] %vm121_vm1, %v110_v28  ;;  %v2997_v44 = vld [vmem:[#allocation2 + $0x12] sm:$0xff]  ;;  %v3182_v28 = vmul.f32 %v309_v17, %v2949_v36 }
  0x9f   :  { %v2963_v39 = vld [vmem:[#allocation2 + $0x29] sm:$0xff] }
  0xa0   :  { %v2905_v29 = vld [vmem:[#allocation2 + $0x20] sm:$0xff]  ;;  %v2907_v30 = vld [vmem:[#allocation2 + $0x28] sm:$0xff]  ;;  %162 = vrot.lane.b32.xlu1 %v2890_v24, %s2840_s1 }
  0xa1   :  { %143 = vst [vmem:[#allocation3 + $0x20] sm:$0xff] %v2905_v29  ;;  %144 = vst [vmem:[#allocation3 + $0x28] sm:$0xff] %v2907_v30  ;;  %164 = vrot.lane.b32.xlu0 %v2905_v29, %s2840_s1  ;;  %v2957_v38 = vld [vmem:[#allocation2 + $0x21] sm:$0xff] }
  0xa2   :  { %v3003_v45 = vld [vmem:[#allocation2 + $0x1a] sm:$0xff]  ;;  %v3005_v46 = vld [vmem:[#allocation2 + $0x22] sm:$0xff] }
  0xa3   :  { %v3083_v57 = vld [vmem:[#allocation3 + $0x1] sm:$0xff] }
  0xa4   :  { %v138_v31 = vld [vmem:[#allocation2 + $0x40] sm:$0xff]  ;;  %166 = vrot.lane.b32.xlu1 %v2907_v30, %s2840_s1  ;;  %6465 = vst [vmem:[#allocation13_spill] sm:$0xff] %v3083_v57  ;;  %v3093_v60 = vld [vmem:[#allocation3 + $0x9] sm:$0xff] }
  0xa5   :  { %v2915_v32 = vld [vmem:[#allocation2 + $0x30] sm:$0xff]  ;;  %v2917_v33 = vld [vmem:[#allocation2 + $0x38] sm:$0xff]  ;;  %147 = vst [vmem:[#allocation3 + $0x40] sm:$0xff] %v138_v31  ;;  %6466 = vst [vmem:[#allocation14_spill] sm:$0xff] %v3093_v60  ;;  %v3184_v31 = vstv %s180_s25  ;;  %s4811_s25 = sld [smem:[#allocation4 + $0x14]] }
  0xa6   :  { %145 = vst [vmem:[#allocation3 + $0x30] sm:$0xff] %v2915_v32  ;;  %146 = vst [vmem:[#allocation3 + $0x38] sm:$0xff] %v2917_v33  ;;  %168 = vrot.lane.b32.xlu0 %v2915_v32, %s2840_s1  ;;  %v2965_v40 = vld [vmem:[#allocation2 + $0x31] sm:$0xff]  ;;  %v2971_v41 = vld [vmem:[#allocation2 + $0x39] sm:$0xff] }
  0xa7   :  { %v3011_v47 = vld [vmem:[#allocation2 + $0x2a] sm:$0xff]  ;;  %v3013_v48 = vld [vmem:[#allocation2 + $0x32] sm:$0xff]  ;;  %v3019_v49 = vld [vmem:[#allocation2 + $0x3a] sm:$0xff] }
  0xa8   :  { %170 = vrot.lane.b32.xlu1 %v2917_v33, %s2840_s1  ;;  %6462 = vst [vmem:[#allocation10_spill] sm:$0xff] %v3011_v47  ;;  %6463 = vst [vmem:[#allocation11_spill] sm:$0xff] %v3013_v48  ;;  %v3095_v61 = vld [vmem:[#allocation3 + $0x11] sm:$0xff]  ;;  %v3105_v0 = vld [vmem:[#allocation3 + $0x19] sm:$0xff] }
  0xa9   :  { %6464 = vst [vmem:[#allocation12_spill] sm:$0xff] %v3019_v49  ;;  %6467 = vst [vmem:[#allocation15_spill] sm:$0xff] %v3095_v61  ;;  %v3107_v1 = vld [vmem:[#allocation3 + $0x21] sm:$0xff] }
  0xaa   :  { %216 = vrot.lane.b32.xlu0 %v2883_v21, %s2841_s21  ;;  %6468 = vst [vmem:[#allocation16_spill] sm:$0xff] %v3105_v0  ;;  %6469 = vst [vmem:[#allocation17_spill] sm:$0xff] %v3107_v1  ;;  %v3170_v22 = vld [vmem:[#allocation3 + $0x2] sm:$0xff] }
  0xab   :  { %6473 = vst [vmem:[#allocation21_spill] sm:$0xff] %v3170_v22 }
  0xac   :  { %218 = vrot.lane.b32.xlu1 %v2892_v25, %s2841_s21 }
  0xad   :  { %v3117_v4 = vld [vmem:[#allocation3 + $0x29] sm:$0xff]  ;;  %v3119_v5 = vld [vmem:[#allocation3 + $0x31] sm:$0xff]  ;;  %v3129_v8 = vld [vmem:[#allocation3 + $0x39] sm:$0xff] }
  0xae   :  { %220 = vrot.lane.b32.xlu0 %v2894_v26, %s2841_s21  ;;  %6470 = vst [vmem:[#allocation18_spill] sm:$0xff] %v3117_v4  ;;  %6471 = vst [vmem:[#allocation19_spill] sm:$0xff] %v3119_v5 }
  0xaf   :  { %6472 = vst [vmem:[#allocation20_spill] sm:$0xff] %v3129_v8 }
  0xb0   :  { %222 = vrot.lane.b32.xlu1 %v2890_v24, %s2841_s21 }
  0xb2   :  { %224 = vrot.lane.b32.xlu0 %v2905_v29, %s2841_s21 }
  0xb4   :  { %226 = vrot.lane.b32.xlu1 %v2907_v30, %s2841_s21 }
  0xb6   :  { %228 = vrot.lane.b32.xlu0 %v2915_v32, %s2841_s21 }
  0xb8   :  { %230 = vrot.lane.b32.xlu1 %v2917_v33, %s2841_s21 }
  0xba   :  { %266 = vrot.lane.b32.xlu0 %v2941_v34, %s2840_s1 }
  0xbc   :  { %268 = vrot.lane.b32.xlu1 %v2947_v35, %s2840_s1 }
  0xbe   :  { %270 = vrot.lane.b32.xlu0 %v2949_v36, %s2840_s1 }
  0xc0   :  { %272 = vrot.lane.b32.xlu1 %v2955_v37, %s2840_s1 }
  0xc2   :  { %274 = vrot.lane.b32.xlu0 %v2957_v38, %s2840_s1 }
  0xc4   :  { %276 = vrot.lane.b32.xlu1 %v2963_v39, %s2840_s1 }
  0xc6   :  { %278 = vrot.lane.b32.xlu0 %v2965_v40, %s2840_s1 }
  0xc8   :  { %280 = vrot.lane.b32.xlu1 %v2971_v41, %s2840_s1 }
  0xca   :  { %326 = vrot.lane.b32.xlu0 %v2941_v34, %s2841_s21 }
  0xcc   :  { %328 = vrot.lane.b32.xlu1 %v2947_v35, %s2841_s21 }
  0xce   :  { %330 = vrot.lane.b32.xlu0 %v2949_v36, %s2841_s21  ;;  %v3206_v36 = vmul.f32 %v309_v17, %v2947_v35  ;;  %v3228_v35 = vmul.f32 %v3176_v23, %v2989_v42 }
  0xd0   :  { %332 = vrot.lane.b32.xlu1 %v2955_v37, %s2841_s21 }
  0xd2   :  { %334 = vrot.lane.b32.xlu0 %v2957_v38, %s2841_s21 }
  0xd4   :  { %336 = vrot.lane.b32.xlu1 %v2963_v39, %s2841_s21 }
  0xd6   :  { %338 = vrot.lane.b32.xlu0 %v2965_v40, %s2841_s21 }
  0xd8   :  { %340 = vrot.lane.b32.xlu1 %v2971_v41, %s2841_s21 }
  0xda   :  { %376 = vrot.lane.b32.xlu0 %v2989_v42, %s2840_s1 }
  0xdc   :  { %378 = vrot.lane.b32.xlu1 %v2995_v43, %s2840_s1 }
  0xde   :  { %380 = vrot.lane.b32.xlu0 %v2997_v44, %s2840_s1 }
  0xe0   :  { %382 = vrot.lane.b32.xlu1 %v3003_v45, %s2840_s1 }
  0xe2   :  { %384 = vrot.lane.b32.xlu0 %v3005_v46, %s2840_s1 }
  0xe4   :  { %386 = vrot.lane.b32.xlu1 %v3011_v47, %s2840_s1 }
  0xe6   :  { %388 = vrot.lane.b32.xlu0 %v3013_v48, %s2840_s1 }
  0xe8   :  { %390 = vrot.lane.b32.xlu1 %v3019_v49, %s2840_s1 }
  0xea   :  { %436 = vrot.lane.b32.xlu0 %v2989_v42, %s2841_s21 }
  0xec   :  { %438 = vrot.lane.b32.xlu1 %v2995_v43, %s2841_s21 }
  0xee   :  { %440 = vrot.lane.b32.xlu0 %v2997_v44, %s2841_s21 }
  0xf0   :  { %442 = vrot.lane.b32.xlu1 %v3003_v45, %s2841_s21 }
  0xf2   :  { %444 = vrot.lane.b32.xlu0 %v3005_v46, %s2841_s21 }
  0xf4   :  { %446 = vrot.lane.b32.xlu1 %v3011_v47, %s2841_s21 }
  0xf6   :  { %448 = vrot.lane.b32.xlu0 %v3013_v48, %s2841_s21  ;;  %v3286_v48 = vmul.f32 %v3176_v23, %v3005_v46  ;;  %v3307_v46 = vmul.f32 %v309_v17, %v2965_v40 }
  0xf8   :  { %450 = vrot.lane.b32.xlu1 %v3019_v49, %s2841_s21  ;;  %v3282_v49 = vld [vmem:[#allocation3 + $0x22] sm:$0xff]  ;;  %6484 = vst [vmem:[#allocation28_spill] sm:$0xff] %v3286_v48 }
  0xf9   :  { %6483 = vst [vmem:[#allocation27_spill] sm:$0xff] %v3282_v49 }
  0xfa   :  { %1540 = vrot.lane.b32.xlu0 %v2883_v21, %s2840_s1 }
  0xfc   :  { %1542 = vrot.lane.b32.xlu1 %v2892_v25, %s2840_s1 }
  0xfe   :  { %1544 = vrot.lane.b32.xlu0 %v2894_v26, %s2840_s1 }
 0x100   :  { %1546 = vrot.lane.b32.xlu1 %v2890_v24, %s2840_s1 }
 0x102   :  { %1548 = vrot.lane.b32.xlu0 %v2905_v29, %s2840_s1 }
 0x104   :  { %1550 = vrot.lane.b32.xlu1 %v2907_v30, %s2840_s1 }
 0x106   :  { %1552 = vrot.lane.b32.xlu0 %v2915_v32, %s2840_s1 }
 0x108   :  { %1554 = vrot.lane.b32.xlu1 %v2917_v33, %s2840_s1 }
 0x10a   :  { %1600 = vrot.lane.b32.xlu0 %v2883_v21, %s2841_s21  ;;  %v3057_v50 = vpop.permute.xlu0 %156 }
 0x10c   :  { %1602 = vrot.lane.b32.xlu1 %v2892_v25, %s2841_s21 }
 0x10e   :  { %1604 = vrot.lane.b32.xlu0 %v2894_v26, %s2841_s21  ;;  %v3063_v51 = vpop.permute.xlu1 %158  ;;  %v3065_v52 = vpop.permute.xlu0 %160 }
 0x10f   :  { %v173_v42 = vsel %vm3191_vm6, 0.0, %v3063_v51 }
 0x110   :  { %1606 = vrot.lane.b32.xlu1 %v2890_v24, %s2841_s21  ;;  %v183_v47 = vmul.f32 %v3184_v31, %v173_v42 }
 0x112   :  { %1608 = vrot.lane.b32.xlu0 %v2905_v29, %s2841_s21  ;;  %v3071_v53 = vpop.permute.xlu1 %162 }
 0x113   :  { %v3073_v54 = vpop.permute.xlu0 %164 }
 0x114   :  { %1610 = vrot.lane.b32.xlu1 %v2907_v30, %s2841_s21 }
 0x116   :  { %1612 = vrot.lane.b32.xlu0 %v2915_v32, %s2841_s21  ;;  %v3079_v55 = vpop.permute.xlu1 %166 }
 0x118   :  { %v3081_v56 = vpop.permute.xlu0 %168  ;;  %1614 = vrot.lane.b32.xlu1 %v2917_v33, %s2841_s21 }
 0x119   :  { %v178_v42 = vsel %vm3191_vm6, 0.0, %v3081_v56 }
 0x11a   :  { %1650 = vrot.lane.b32.xlu0 %v3083_v57, %s2840_s1  ;;  %v3089_v58 = vpop.permute.xlu1 %170 }
 0x11b   :  { %v179_v40 = vsel %vm3191_vm6, 0.0, %v3089_v58 }
 0x11c   :  { %v3091_v59 = vpop.permute.xlu0 %216  ;;  %1652 = vrot.lane.b32.xlu1 %v3093_v60, %s2840_s1  ;;  %v189_v48 = vmul.f32 %v3184_v31, %v179_v40 }
 0x11e   :  { %1654 = vrot.lane.b32.xlu0 %v3095_v61, %s2840_s1  ;;  %v3101_v62 = vpop.permute.xlu1 %218 }
 0x11f   :  { %v233_v58 = vsel %vm3298_vm11, 0.0, %v3101_v62 }
 0x120   :  { %v3103_v63 = vpop.permute.xlu0 %220  ;;  %1656 = vrot.lane.b32.xlu1 %v3105_v0, %s2840_s1 }
 0x122   :  { %1658 = vrot.lane.b32.xlu0 %v3107_v1, %s2840_s1  ;;  %v3113_v2 = vpop.permute.xlu1 %222 }
 0x124   :  { %v3115_v3 = vpop.permute.xlu0 %224  ;;  %1660 = vrot.lane.b32.xlu1 %v3117_v4, %s2840_s1 }
 0x126   :  { %1662 = vrot.lane.b32.xlu0 %v3119_v5, %s2840_s1  ;;  %v3125_v6 = vpop.permute.xlu1 %226 }
 0x128   :  { %v3127_v7 = vpop.permute.xlu0 %228  ;;  %1664 = vrot.lane.b32.xlu1 %v3129_v8, %s2840_s1 }
 0x12a   :  { %1710 = vrot.lane.b32.xlu0 %v3083_v57, %s2841_s21  ;;  %v3135_v9 = vpop.permute.xlu1 %230  ;;  %v172_v57 = vsel %vm3191_vm6, 0.0, %v3057_v50  ;;  %v205_v50 = vmul.f32 %v199_v18, %v2907_v30  ;;  %v3280_v30 = vld [vmem:[#allocation3 + $0x1a] sm:$0xff] }
 0x12b   :  { %6482 = vst [vmem:[#allocation26_spill] sm:$0xff] %v3280_v30 }
 0x12c   :  { %v3137_v10 = vpop.permute.xlu0 %266  ;;  %1712 = vrot.lane.b32.xlu1 %v3093_v60, %s2841_s21  ;;  %v3220_v60 = vstv %s3159_s26  ;;  %s4813_s26 = sld [smem:[#allocation4 + $0x15]] }
 0x12d   :  { %v282_v62 = vsel %vm3191_vm6, 0.0, %v3137_v10  ;;  %v237_v10 = vsel %vm3298_vm11, 0.0, %v3125_v6 }
 0x12e   :  { %1714 = vrot.lane.b32.xlu0 %v3095_v61, %s2841_s21  ;;  %v3143_v12 = vpop.permute.xlu1 %268  ;;  %v3215_v61 = vld [vmem:[#allocation3 + $0x12] sm:$0xff] }
 0x12f   :  { %6478 = vst [vmem:[#allocation24_spill] sm:$0xff] %v3215_v61 }
 0x130   :  { %v3145_v13 = vpop.permute.xlu0 %270  ;;  %1716 = vrot.lane.b32.xlu1 %v3105_v0, %s2841_s21  ;;  %v3213_v0 = vld [vmem:[#allocation3 + $0xa] sm:$0xff] }
 0x131   :  { %6477 = vst [vmem:[#allocation23_spill] sm:$0xff] %v3213_v0  ;;  %v284_v6 = vsel %vm3191_vm6, 0.0, %v3145_v13 }
 0x132   :  { %1718 = vrot.lane.b32.xlu0 %v3107_v1, %s2841_s21  ;;  %v3153_v15 = vpop.permute.xlu1 %272  ;;  %v203_v1 = vmul.f32 %v199_v18, %v2890_v24  ;;  %v3234_v24 = vmul.f32 %v3176_v23, %v2995_v43 }
 0x134   :  { %v3155_v16 = vpop.permute.xlu0 %274  ;;  %1720 = vrot.lane.b32.xlu1 %v3117_v4, %s2841_s21  ;;  %v3209_v4 = vmul.f32 %v309_v17, %v2955_v37  ;;  %v3241_v37 = vmul.f32 %v309_v17, %v2957_v38  ;;  %v3259_v38 = vmul.f32 %v309_v17, %v2963_v39  ;;  %v176_v39 = vsel %vm3191_vm6, 0.0, %v3073_v54 }
 0x135   :  { %v207_v54 = vmul.f32 %v199_v18, %v2917_v33  ;;  %v3310_v33 = vmul.f32 %v309_v17, %v2971_v41  ;;  %v286_v13 = vsel %vm3191_vm6, 0.0, %v3155_v16 }
 0x136   :  { %1722 = vrot.lane.b32.xlu0 %v3119_v5, %s2841_s21  ;;  %v3165_v19 = vpop.permute.xlu1 %276  ;;  %v201_v5 = vmul.f32 %v199_v18, %v2892_v25  ;;  %v202_v25 = vmul.f32 %v199_v18, %v2894_v26  ;;  %v3238_v26 = vmul.f32 %v3176_v23, %v2997_v44  ;;  %v174_v44 = vsel %vm3191_vm6, 0.0, %v3065_v52 }
 0x137   :  { %v206_v52 = vmul.f32 %v199_v18, %v2915_v32 }
 0x138   :  { %v3167_v20 = vpop.permute.xlu0 %278  ;;  %1724 = vrot.lane.b32.xlu1 %v3129_v8, %s2841_s21 }
 0x13a   :  { %1760 = vrot.lane.b32.xlu0 %v3170_v22, %s2840_s1  ;;  %v3199_v34 = vpop.permute.xlu1 %280  ;;  %v175_v22 = vsel %vm3191_vm6, 0.0, %v3071_v53  ;;  %v177_v53 = vsel %vm3191_vm6, 0.0, %v3079_v55  ;;  %v184_v55 = vmul.f32 %v3184_v31, %v174_v44  ;;  %v3333_v44 = vstv %s3201_s28  ;;  %s4842_s28 = sld [smem:[#allocation4 + $0x18]] }
 0x13b   :  { %v185_v14 = vmul.f32 %v3184_v31, %v175_v22  ;;  %v187_v17 = vmul.f32 %v3184_v31, %v177_v53  ;;  %v232_v22 = vsel %vm3298_vm11, 0.0, %v3091_v59  ;;  %v3347_v53 = vstv %s3230_s30  ;;  %s2614_s30 = sld [smem:[#allocation4 + $0x1f]] }
 0x13c   :  { %v3203_v21 = vpop.permute.xlu0 %326  ;;  %1762 = vrot.lane.b32.xlu1 %v3213_v0, %s2840_s1  ;;  %v3271_v0 = vmul.f32 %v3176_v23, %v3003_v45  ;;  %v182_v45 = vmul.f32 %v3184_v31, %v172_v57  ;;  %v3314_v57 = vstv %s3189_s27  ;;  %v210_v23 = vadd.f32 %v202_v25, %v184_v55  ;;  %s4828_s27 = sld [smem:[#allocation4 + $0x17]] }
 0x13d   :  { %v188_v59 = vmul.f32 %v3184_v31, %v178_v42  ;;  %v213_v25 = vadd.f32 %v205_v50, %v187_v17  ;;  %v243_v55 = vmul.f32 %v3220_v60, %v233_v58  ;;  %v238_v50 = vsel %vm3298_vm11, 0.0, %v3127_v7 }
 0x13e   :  { %1764 = vrot.lane.b32.xlu0 %v3215_v61, %s2840_s1  ;;  %v204_v61 = vmul.f32 %v199_v18, %v2905_v29  ;;  %v3265_v51 = vpop.permute.xlu1 %328  ;;  %6481 = vst [vmem:[#allocation25_spill] sm:$0xff] %v3271_v0  ;;  %v186_v18 = vmul.f32 %v3184_v31, %v176_v39  ;;  %v3335_v39 = vld [vmem:[#allocation3 + $0x2a] sm:$0xff]  ;;  %v208_v56 = vadd.f32 %v3187_v11, %v182_v45  ;;  %v234_v0 = vsel %vm3298_vm11, 0.0, %v3103_v63 }
 0x13f   :  { %6487 = vst [vmem:[#allocation29_spill] sm:$0xff] %v3335_v39  ;;  %v211_v11 = vadd.f32 %v203_v1, %v185_v14  ;;  %v235_v31 = vsel %vm3298_vm11, 0.0, %v3113_v2  ;;  %v244_v63 = vmul.f32 %v3220_v60, %v234_v0  ;;  %v236_v1 = vsel %vm3298_vm11, 0.0, %v3115_v3 }
 0x140   :  { %v3267_v29 = vpop.permute.xlu0 %330  ;;  %1766 = vrot.lane.b32.xlu1 %v3280_v30, %s2840_s1  ;;  %v209_v30 = vadd.f32 %v201_v5, %v183_v47  ;;  %v212_v47 = vadd.f32 %v204_v61, %v186_v18  ;;  %v242_v5 = vmul.f32 %v3220_v60, %v232_v22  ;;  %v283_v61 = vsel %vm3191_vm6, 0.0, %v3143_v12 }
 0x141   :  { %v214_v14 = vadd.f32 %v206_v52, %v188_v59  ;;  %v215_v2 = vadd.f32 %v207_v54, %v189_v48  ;;  %v239_v12 = vsel %vm3298_vm11, 0.0, %v3135_v9  ;;  %v292_v0 = vmul.f32 %v3314_v57, %v282_v62 }
 0x142   :  { %1768 = vrot.lane.b32.xlu0 %v3282_v49, %s2840_s1  ;;  %v3324_v43 = vpop.permute.xlu1 %332  ;;  %v3338_v49 = vstv %s3217_s29  ;;  %v250_v18 = vadd.f32 %v242_v5, %v208_v56  ;;  %v245_v42 = vmul.f32 %v3220_v60, %v235_v31  ;;  %v293_v3 = vmul.f32 %v3314_v57, %v283_v61  ;;  %s4853_s29 = sld [smem:[#allocation4 + $0x1a]] }
 0x143   :  { %v246_v48 = vmul.f32 %v3220_v60, %v236_v1  ;;  %v247_v52 = vmul.f32 %v3220_v60, %v237_v10  ;;  %v248_v9 = vmul.f32 %v3220_v60, %v238_v50  ;;  %v285_v54 = vsel %vm3191_vm6, 0.0, %v3153_v15 }
 0x144   :  { %v3326_v41 = vpop.permute.xlu0 %334  ;;  %1770 = vrot.lane.b32.xlu1 %v3335_v39, %s2840_s1  ;;  %v251_v17 = vadd.f32 %v243_v55, %v209_v30  ;;  %v252_v22 = vadd.f32 %v244_v63, %v210_v23  ;;  %v249_v56 = vmul.f32 %v3220_v60, %v239_v12  ;;  %v300_v58 = vadd.f32 %v292_v0, %v250_v18 }
 0x145   :  { %v294_v59 = vmul.f32 %v3314_v57, %v284_v6  ;;  %v287_v5 = vsel %vm3191_vm6, 0.0, %v3165_v19  ;;  %v288_v62 = vsel %vm3191_vm6, 0.0, %v3167_v20  ;;  %v253_v15 = vadd.f32 %v245_v42, %v211_v11 }
 0x146   :  { %v3358_v45 = vpop.permute.xlu1 %336  ;;  %v301_v30 = vadd.f32 %v293_v3, %v251_v17  ;;  %v295_v23 = vmul.f32 %v3314_v57, %v285_v54  ;;  %v342_v60 = vsel %vm3298_vm11, 0.0, %v3203_v21  ;;  %v254_v31 = vadd.f32 %v246_v48, %v212_v47 }
 0x147   :  { %v255_v61 = vadd.f32 %v247_v52, %v213_v25  ;;  %v256_v63 = vadd.f32 %v248_v9, %v214_v14  ;;  %v296_v1 = vmul.f32 %v3314_v57, %v286_v13  ;;  %v257_v19 = vadd.f32 %v249_v56, %v215_v2 }
 0x148   :  { %v3360_v39 = vpop.permute.xlu0 %338  ;;  %v297_v10 = vmul.f32 %v3314_v57, %v287_v5  ;;  %v298_v20 = vmul.f32 %v3314_v57, %v288_v62  ;;  %v302_v50 = vadd.f32 %v294_v59, %v252_v22  ;;  %v318_v12 = vadd.f32 %v3179_v27, %v300_v58 }
 0x149   :  { %v352_v21 = vmul.f32 %v3333_v44, %v342_v60  ;;  %v343_v47 = vsel %vm3298_vm11, 0.0, %v3265_v51  ;;  %v303_v25 = vadd.f32 %v295_v23, %v253_v15  ;;  %v289_v14 = vsel %vm3191_vm6, 0.0, %v3199_v34 }
 0x14a   :  { %v3388_v40 = vpop.permute.xlu1 %340  ;;  %v319_v2 = vadd.f32 %v3206_v36, %v301_v30  ;;  %v344_v0 = vsel %vm3298_vm11, 0.0, %v3267_v29  ;;  %v304_v27 = vadd.f32 %v296_v1, %v254_v31  ;;  %v345_v3 = vsel %vm3298_vm11, 0.0, %v3324_v43 }
 0x14b   :  { %v306_v34 = vadd.f32 %v298_v20, %v256_v63  ;;  %v353_v36 = vmul.f32 %v3333_v44, %v343_v47  ;;  %v346_v29 = vsel %vm3298_vm11, 0.0, %v3326_v41  ;;  %v299_v48 = vmul.f32 %v3314_v57, %v289_v14 }
 0x14c   :  { %v377_v7 = vpop.permute.xlu0 %376  ;;  %v360_v52 = vadd.f32 %v352_v21, %v318_v12  ;;  %v354_v9 = vmul.f32 %v3333_v44, %v344_v0  ;;  %v320_v54 = vadd.f32 %v3182_v28, %v302_v50  ;;  %v321_v17 = vadd.f32 %v3209_v4, %v303_v25 }
 0x14d   :  { %v392_v11 = vsel %vm3191_vm6, 0.0, %v377_v7  ;;  %v305_v7 = vadd.f32 %v297_v10, %v255_v61  ;;  %v355_v22 = vmul.f32 %v3333_v44, %v345_v3  ;;  %v356_v41 = vmul.f32 %v3333_v44, %v346_v29 }
 0x14e   :  { %v379_v16 = vpop.permute.xlu1 %378  ;;  %v402_v51 = vmul.f32 %v3338_v49, %v392_v11  ;;  %v361_v62 = vadd.f32 %v353_v36, %v319_v2  ;;  %v322_v28 = vadd.f32 %v3241_v37, %v304_v27  ;;  %v307_v30 = vadd.f32 %v299_v48, %v257_v19 }
 0x14f   :  { %v393_v6 = vsel %vm3191_vm6, 0.0, %v379_v16  ;;  %v323_v4 = vadd.f32 %v3259_v38, %v305_v7  ;;  %v362_v23 = vadd.f32 %v354_v9, %v320_v54  ;;  %v347_v60 = vsel %vm3298_vm11, 0.0, %v3358_v45  ;;  %v6488_v9 = vld [vmem:[#allocation25_spill] sm:$0xff] }
 0x150   :  { %v381_v55 = vpop.permute.xlu0 %380  ;;  %v403_v56 = vmul.f32 %v3338_v49, %v393_v6  ;;  %v410_v59 = vadd.f32 %v402_v51, %v360_v52  ;;  %v324_v16 = vadd.f32 %v3307_v46, %v306_v34  ;;  %v363_v1 = vadd.f32 %v355_v22, %v321_v17  ;;  %v6489_v17 = vld [vmem:[#allocation28_spill] sm:$0xff] }
 0x151   :  { %v394_v43 = vsel %vm3191_vm6, 0.0, %v381_v55  ;;  %v348_v55 = vsel %vm3298_vm11, 0.0, %v3360_v39  ;;  %v364_v19 = vadd.f32 %v356_v41, %v322_v28  ;;  %v357_v50 = vmul.f32 %v3333_v44, %v347_v60  ;;  %v6492_v28 = vld [vmem:[#allocation11_spill] sm:$0xff] }
 0x152   :  { %v383_v18 = vpop.permute.xlu1 %382  ;;  %v404_v15 = vmul.f32 %v3338_v49, %v394_v43  ;;  %v411_v31 = vadd.f32 %v403_v56, %v361_v62  ;;  %v428_v10 = vadd.f32 %v3228_v35, %v410_v59  ;;  %v358_v12 = vmul.f32 %v3333_v44, %v348_v55 }
 0x153   :  { %v395_v57 = vsel %vm3191_vm6, 0.0, %v383_v18  ;;  %v325_v21 = vadd.f32 %v3310_v33, %v307_v30  ;;  %v349_v35 = vsel %vm3298_vm11, 0.0, %v3388_v40  ;;  %v365_v7 = vadd.f32 %v357_v50, %v323_v4 }
 0x154   :  { %v385_v42 = vpop.permute.xlu0 %384  ;;  %v405_v61 = vmul.f32 %v3338_v49, %v395_v57  ;;  %v412_v20 = vadd.f32 %v404_v15, %v362_v23  ;;  %v429_v0 = vadd.f32 %v3234_v24, %v411_v31  ;;  %v366_v24 = vadd.f32 %v358_v12, %v324_v16  ;;  %v6490_v57 = vld [vmem:[#allocation10_spill] sm:$0xff] }
 0x155   :  { %v396_v5 = vsel %vm3191_vm6, 0.0, %v385_v42  ;;  %v359_v34 = vmul.f32 %v3333_v44, %v349_v35 }
 0x156   :  { %v387_v13 = vpop.permute.xlu1 %386  ;;  %v406_v37 = vmul.f32 %v3338_v49, %v396_v5  ;;  %v413_v47 = vadd.f32 %v405_v61, %v363_v1  ;;  %v430_v51 = vadd.f32 %v3238_v26, %v412_v20  ;;  %v6491_v5 = vld [vmem:[#allocation22_spill] sm:$0xff] }
 0x157   :  { %v397_v46 = vsel %vm3191_vm6, 0.0, %v387_v13  ;;  %v425_v62 = vmul.f32 %v6491_v5, %v6490_v57  ;;  %v426_v4 = vmul.f32 %v6491_v5, %v6492_v28  ;;  %v367_v15 = vadd.f32 %v359_v34, %v325_v21 }
 0x158   :  { %v389_v58 = vpop.permute.xlu0 %388  ;;  %v414_v25 = vadd.f32 %v406_v37, %v364_v19  ;;  %v407_v42 = vmul.f32 %v3338_v49, %v397_v46  ;;  %v431_v43 = vadd.f32 %v6488_v9, %v413_v47 }
 0x159   :  { %v398_v39 = vsel %vm3191_vm6, 0.0, %v389_v58 }
 0x15a   :  { %v391_v38 = vpop.permute.xlu1 %390  ;;  %v408_v27 = vmul.f32 %v3338_v49, %v398_v39  ;;  %v432_v22 = vadd.f32 %v6489_v17, %v414_v25  ;;  %v415_v56 = vadd.f32 %v407_v42, %v365_v7 }
 0x15b   :  { %v399_v36 = vsel %vm3191_vm6, 0.0, %v391_v38 }
 0x15c   :  { %v437_v63 = vpop.permute.xlu0 %436  ;;  %v416_v13 = vadd.f32 %v408_v27, %v366_v24  ;;  %v409_v44 = vmul.f32 %v3338_v49, %v399_v36  ;;  %v433_v55 = vadd.f32 %v425_v62, %v415_v56 }
 0x15d   :  { %v452_v45 = vsel %vm3298_vm11, 0.0, %v437_v63 }
 0x15e   :  { %v462_v11 = vmul.f32 %v3347_v53, %v452_v45  ;;  %v439_v2 = vpop.permute.xlu1 %438  ;;  %v434_v31 = vadd.f32 %v426_v4, %v416_v13  ;;  %v417_v37 = vadd.f32 %v409_v44, %v367_v15 }
 0x15f   :  { %v453_v3 = vsel %vm3298_vm11, 0.0, %v439_v2 }
 0x160   :  { %v470_v14 = vadd.f32 %v462_v11, %v428_v10  ;;  %v441_v18 = vpop.permute.xlu0 %440  ;;  %v463_v40 = vmul.f32 %v3347_v53, %v453_v3  ;;  %v6493_v10 = vld [vmem:[#allocation12_spill] sm:$0xff] }
 0x161   :  { %v454_v33 = vsel %vm3298_vm11, 0.0, %v441_v18  ;;  %v427_v45 = vmul.f32 %v6491_v5, %v6493_v10 }
 0x162   :  { %2654 = vtanh.f32 %v470_v14  ;;  %v464_v6 = vmul.f32 %v3347_v53, %v454_v33  ;;  %v471_v29 = vadd.f32 %v463_v40, %v429_v0  ;;  %v443_v52 = vpop.permute.xlu1 %442 }
 0x163   :  { %v455_v26 = vsel %vm3298_vm11, 0.0, %v443_v52  ;;  %v435_v39 = vadd.f32 %v427_v45, %v417_v37  ;;  %v3730_v45 = vld [vmem:[#allocation3 + $0x32] sm:$0xff] }
 0x164   :  { %v472_v48 = vadd.f32 %v464_v6, %v430_v51  ;;  %v445_v54 = vpop.permute.xlu0 %444  ;;  %2656 = vtanh.f32 %v471_v29  ;;  %v465_v41 = vmul.f32 %v3347_v53, %v455_v26  ;;  %6515 = vst [vmem:[#allocation45_spill] sm:$0xff] %v3730_v45 }
 0x165   :  { %v456_v58 = vsel %vm3298_vm11, 0.0, %v445_v54 }
 0x166   :  { %v466_v59 = vmul.f32 %v3347_v53, %v456_v58  ;;  %2658 = vtanh.f32 %v472_v48  ;;  %v473_v30 = vadd.f32 %v465_v41, %v431_v43  ;;  %v447_v60 = vpop.permute.xlu1 %446 }
 0x167   :  { %v457_v49 = vsel %vm3298_vm11, 0.0, %v447_v60 }
 0x168   :  { %v474_v23 = vadd.f32 %v466_v59, %v432_v22  ;;  %v449_v16 = vpop.permute.xlu0 %448  ;;  %2660 = vtanh.f32 %v473_v30  ;;  %v467_v38 = vmul.f32 %v3347_v53, %v457_v49 }
 0x169   :  { %v458_v61 = vsel %vm3298_vm11, 0.0, %v449_v16 }
 0x16a   :  { %v468_v63 = vmul.f32 %v3347_v53, %v458_v61  ;;  %2662 = vtanh.f32 %v474_v23  ;;  %v475_v1 = vadd.f32 %v467_v38, %v433_v55  ;;  %v451_v20 = vpop.permute.xlu1 %450 }
 0x16b   :  { %v459_v46 = vsel %vm3298_vm11, 0.0, %v451_v20 }
 0x16c   :  { %v476_v19 = vadd.f32 %v468_v63, %v434_v31  ;;  %2664 = vtanh.f32 %v475_v1  ;;  %v469_v11 = vmul.f32 %v3347_v53, %v459_v46  ;;  %v3533_v14 = vpop.permute.xlu0 %1540  ;;  %v3736_v46 = vld [vmem:[#allocation3 + $0x3a] sm:$0xff] }
 0x16d   :  { %6517 = vst [vmem:[#allocation47_spill] sm:$0xff] %v3736_v46 }
 0x16e   :  { %2666 = vtanh.f32 %v476_v19  ;;  %v477_v12 = vadd.f32 %v469_v11, %v435_v39  ;;  %v3549_v27 = vpop.permute.xlu1 %1542  ;;  %v6518_v39 = vld [vmem:[#allocation21_spill] sm:$0xff] }
 0x16f   :  { %v3514_v50 = vpop.eup %2654 }
 0x170   :  { %486 = vst [vmem:[#allocation2 + $0x1] sm:$0xff] %v3514_v50  ;;  %2668 = vtanh.f32 %v477_v12  ;;  %v3556_v40 = vpop.permute.xlu0 %1544 }
 0x171   :  { %v3517_v21 = vpop.eup %2656 }
 0x172   :  { %487 = vst [vmem:[#allocation2 + $0x9] sm:$0xff] %v3517_v21  ;;  %v3566_v7 = vpop.permute.xlu1 %1546 }
 0x173   :  { %v3519_v35 = vpop.eup %2658 }
 0x174   :  { %488 = vst [vmem:[#allocation2 + $0x11] sm:$0xff] %v3519_v35  ;;  %v3574_v34 = vpop.permute.xlu0 %1548 }
 0x175   :  { %v3523_v47 = vpop.eup %2660 }
 0x176   :  { %489 = vst [vmem:[#allocation2 + $0x19] sm:$0xff] %v3523_v47  ;;  %v3582_v29 = vpop.permute.xlu1 %1550 }
 0x177   :  { %v3525_v25 = vld [vmem:[#allocation2] sm:$0xff]  ;;  %v3527_v53 = vpop.eup %2662 }
 0x178   :  { %502 = vrot.lane.b32.xlu0 %v3525_v25, %s2840_s1  ;;  %490 = vst [vmem:[#allocation2 + $0x21] sm:$0xff] %v3527_v53  ;;  %v3584_v48 = vpop.permute.xlu0 %1552 }
 0x179   :  { %v3535_v2 = vpop.eup %2664  ;;  %v3537_v0 = vld [vmem:[#allocation2 + $0x8] sm:$0xff] }
 0x17a   :  { %491 = vst [vmem:[#allocation2 + $0x29] sm:$0xff] %v3535_v2  ;;  %504 = vrot.lane.b32.xlu1 %v3537_v0, %s2840_s1  ;;  %v3590_v52 = vpop.permute.xlu1 %1554  ;;  %v3660_v5 = vld [vmem:[#allocation2 + $0x2] sm:$0xff] }
 0x17b   :  { %v3539_v18 = vpop.eup %2666  ;;  %v3544_v42 = vld [vmem:[#allocation2 + $0x10] sm:$0xff] }
 0x17c   :  { %492 = vst [vmem:[#allocation2 + $0x31] sm:$0xff] %v3539_v18  ;;  %506 = vrot.lane.b32.xlu0 %v3544_v42, %s2840_s1  ;;  %v3596_v9 = vpop.permute.xlu0 %1600  ;;  %v3666_v28 = vld [vmem:[#allocation2 + $0xa] sm:$0xff] }
 0x17d   :  { %v3551_v3 = vpop.eup %2668  ;;  %v3553_v33 = vld [vmem:[#allocation2 + $0x18] sm:$0xff] }
 0x17e   :  { %493 = vst [vmem:[#allocation2 + $0x39] sm:$0xff] %v3551_v3  ;;  %508 = vrot.lane.b32.xlu1 %v3553_v33, %s2840_s1  ;;  %v3602_v43 = vpop.permute.xlu1 %1602  ;;  %v3672_v15 = vld [vmem:[#allocation2 + $0x12] sm:$0xff] }
 0x17f   :  { %v3560_v51 = vld [vmem:[#allocation2 + $0x20] sm:$0xff] }
 0x180   :  { %510 = vrot.lane.b32.xlu0 %v3560_v51, %s2840_s1  ;;  %v3604_v54 = vpop.permute.xlu0 %1604  ;;  %v3676_v30 = vld [vmem:[#allocation2 + $0x1a] sm:$0xff] }
 0x181   :  { %v3564_v6 = vld [vmem:[#allocation2 + $0x28] sm:$0xff] }
 0x182   :  { %512 = vrot.lane.b32.xlu1 %v3564_v6, %s2840_s1  ;;  %v3610_v17 = vpop.permute.xlu1 %1606  ;;  %v3682_v60 = vld [vmem:[#allocation2 + $0x22] sm:$0xff] }
 0x183   :  { %v3570_v24 = vld [vmem:[#allocation2 + $0x30] sm:$0xff]  ;;  %6503 = vst [vmem:[#allocation33_spill] sm:$0xff] %v3682_v60 }
 0x184   :  { %6494 = vst [vmem:[#allocation25_spill] sm:$0xff] %v3570_v24  ;;  %514 = vrot.lane.b32.xlu0 %v3570_v24, %s2840_s1  ;;  %v3616_v22 = vpop.permute.xlu0 %1608  ;;  %v3688_v55 = vld [vmem:[#allocation2 + $0x2a] sm:$0xff] }
 0x185   :  { %v3576_v36 = vld [vmem:[#allocation2 + $0x38] sm:$0xff]  ;;  %6505 = vst [vmem:[#allocation35_spill] sm:$0xff] %v3688_v55 }
 0x186   :  { %6495 = vst [vmem:[#allocation28_spill] sm:$0xff] %v3576_v36  ;;  %516 = vrot.lane.b32.xlu1 %v3576_v36, %s2840_s1  ;;  %v3622_v56 = vpop.permute.xlu1 %1610  ;;  %v3692_v49 = vld [vmem:[#allocation2 + $0x32] sm:$0xff]  ;;  %v3698_v61 = vld [vmem:[#allocation2 + $0x3a] sm:$0xff] }
 0x187   :  { %6506 = vst [vmem:[#allocation36_spill] sm:$0xff] %v3692_v49  ;;  %6508 = vst [vmem:[#allocation38_spill] sm:$0xff] %v3698_v61 }
 0x188   :  { %562 = vrot.lane.b32.xlu0 %v3525_v25, %s2841_s21  ;;  %v3624_v13 = vpop.permute.xlu0 %1612 }
 0x18a   :  { %564 = vrot.lane.b32.xlu1 %v3537_v0, %s2841_s21  ;;  %v3630_v26 = vpop.permute.xlu1 %1614 }
 0x18b   :  { %6496 = vst [vmem:[#allocation10_spill] sm:$0xff] %v3630_v26  ;;  %v6542_v26 = vld [vmem:[#allocation15_spill] sm:$0xff] }
 0x18c   :  { %566 = vrot.lane.b32.xlu0 %v3544_v42, %s2841_s21  ;;  %v3636_v58 = vpop.permute.xlu0 %1650 }
 0x18e   :  { %568 = vrot.lane.b32.xlu1 %v3553_v33, %s2841_s21  ;;  %v3642_v44 = vpop.permute.xlu1 %1652 }
 0x190   :  { %570 = vrot.lane.b32.xlu0 %v3560_v51, %s2841_s21  ;;  %v3644_v41 = vpop.permute.xlu0 %1654 }
 0x191   :  { %6497 = vst [vmem:[#allocation22_spill] sm:$0xff] %v3644_v41  ;;  %v6547_v41 = vld [vmem:[#allocation17_spill] sm:$0xff] }
 0x192   :  { %572 = vrot.lane.b32.xlu1 %v3564_v6, %s2841_s21  ;;  %v3650_v59 = vpop.permute.xlu1 %1656 }
 0x193   :  { %6498 = vst [vmem:[#allocation11_spill] sm:$0xff] %v3650_v59  ;;  %v2772_v59 = vld [vmem:[#allocation3 + $0x30] sm:$0xff] }
 0x194   :  { %574 = vrot.lane.b32.xlu0 %v3570_v24, %s2841_s21  ;;  %v3656_v57 = vpop.permute.xlu0 %1658 }
 0x195   :  { %6499 = vst [vmem:[#allocation12_spill] sm:$0xff] %v3656_v57 }
 0x196   :  { %576 = vrot.lane.b32.xlu1 %v3576_v36, %s2841_s21  ;;  %v3664_v62 = vpop.permute.xlu1 %1660  ;;  %v2769_v36 = vld [vmem:[#allocation3 + $0x18] sm:$0xff] }
 0x197   :  { %6500 = vst [vmem:[#allocation30_spill] sm:$0xff] %v3664_v62  ;;  %v2771_v62 = vld [vmem:[#allocation3 + $0x28] sm:$0xff] }
 0x198   :  { %612 = vrot.lane.b32.xlu0 %v3514_v50, %s2840_s1  ;;  %v3668_v4 = vpop.permute.xlu0 %1662 }
 0x199   :  { %6501 = vst [vmem:[#allocation31_spill] sm:$0xff] %v3668_v4 }
 0x19a   :  { %614 = vrot.lane.b32.xlu1 %v3517_v21, %s2840_s1  ;;  %v3678_v23 = vpop.permute.xlu1 %1664 }
 0x19b   :  { %6502 = vst [vmem:[#allocation32_spill] sm:$0xff] %v3678_v23 }
 0x19c   :  { %616 = vrot.lane.b32.xlu0 %v3519_v35, %s2840_s1  ;;  %v3686_v16 = vpop.permute.xlu0 %1710 }
 0x19d   :  { %6504 = vst [vmem:[#allocation34_spill] sm:$0xff] %v3686_v16  ;;  %v2767_v16 = vld [vmem:[#allocation3 + $0x8] sm:$0xff] }
 0x19e   :  { %618 = vrot.lane.b32.xlu1 %v3523_v47, %s2840_s1  ;;  %v3696_v31 = vpop.permute.xlu1 %1712 }
 0x19f   :  { %6507 = vst [vmem:[#allocation37_spill] sm:$0xff] %v3696_v31 }
 0x1a0   :  { %620 = vrot.lane.b32.xlu0 %v3527_v53, %s2840_s1  ;;  %v3700_v37 = vpop.permute.xlu0 %1714 }
 0x1a1   :  { %6509 = vst [vmem:[#allocation39_spill] sm:$0xff] %v3700_v37 }
 0x1a2   :  { %622 = vrot.lane.b32.xlu1 %v3535_v2, %s2840_s1  ;;  %v3706_v38 = vpop.permute.xlu1 %1716 }
 0x1a3   :  { %6510 = vst [vmem:[#allocation40_spill] sm:$0xff] %v3706_v38 }
 0x1a4   :  { %624 = vrot.lane.b32.xlu0 %v3539_v18, %s2840_s1  ;;  %v3712_v63 = vpop.permute.xlu0 %1718 }
 0x1a5   :  { %6511 = vst [vmem:[#allocation41_spill] sm:$0xff] %v3712_v63  ;;  %v6525_v63 = vld [vmem:[#allocation27_spill] sm:$0xff] }
 0x1a6   :  { %626 = vrot.lane.b32.xlu1 %v3551_v3, %s2840_s1  ;;  %v3718_v1 = vpop.permute.xlu1 %1720 }
 0x1a7   :  { %6512 = vst [vmem:[#allocation42_spill] sm:$0xff] %v3718_v1 }
 0x1a8   :  { %672 = vrot.lane.b32.xlu0 %v3514_v50, %s2841_s21  ;;  %v3720_v19 = vpop.permute.xlu0 %1722 }
 0x1a9   :  { %6513 = vst [vmem:[#allocation43_spill] sm:$0xff] %v3720_v19  ;;  %v6522_v19 = vld [vmem:[#allocation24_spill] sm:$0xff] }
 0x1aa   :  { %674 = vrot.lane.b32.xlu1 %v3517_v21, %s2841_s21  ;;  %v3726_v10 = vpop.permute.xlu1 %1724 }
 0x1ab   :  { %6514 = vst [vmem:[#allocation44_spill] sm:$0xff] %v3726_v10  ;;  %v6521_v10 = vld [vmem:[#allocation23_spill] sm:$0xff] }
 0x1ac   :  { %676 = vrot.lane.b32.xlu0 %v3519_v35, %s2841_s21  ;;  %v3734_v20 = vpop.permute.xlu0 %1760 }
 0x1ad   :  { %6516 = vst [vmem:[#allocation46_spill] sm:$0xff] %v3734_v20  ;;  %v6524_v20 = vld [vmem:[#allocation26_spill] sm:$0xff] }
 0x1ae   :  { %678 = vrot.lane.b32.xlu1 %v3523_v47, %s2841_s21  ;;  %v3742_v11 = vpop.permute.xlu1 %1762 }
 0x1af   :  { %6519 = vst [vmem:[#allocation21_spill] sm:$0xff] %v3742_v11  ;;  %v6527_v11 = vld [vmem:[#allocation29_spill] sm:$0xff] }
 0x1b0   :  { %680 = vrot.lane.b32.xlu0 %v3527_v53, %s2841_s21  ;;  %v3744_v12 = vpop.permute.xlu0 %1764 }
 0x1b1   :  { %6520 = vst [vmem:[#allocation48_spill] sm:$0xff] %v3744_v12 }
 0x1b2   :  { %682 = vrot.lane.b32.xlu1 %v3535_v2, %s2841_s21  ;;  %v3750_v1 = vpop.permute.xlu1 %1766 }
 0x1b3   :  { %6523 = vst [vmem:[#allocation23_spill] sm:$0xff] %v3750_v1 }
 0x1b4   :  { %684 = vrot.lane.b32.xlu0 %v3539_v18, %s2841_s21  ;;  %v3756_v38 = vpop.permute.xlu0 %1768 }
 0x1b5   :  { %6526 = vst [vmem:[#allocation24_spill] sm:$0xff] %v3756_v38 }
 0x1b6   :  { %686 = vrot.lane.b32.xlu1 %v3551_v3, %s2841_s21  ;;  %v3762_v12 = vpop.permute.xlu1 %1770 }
 0x1b7   :  { %6528 = vst [vmem:[#allocation26_spill] sm:$0xff] %v3762_v12 }
 0x1b8   :  { %722 = vrot.lane.b32.xlu0 %v3660_v5, %s2840_s1 }
 0x1ba   :  { %724 = vrot.lane.b32.xlu1 %v3666_v28, %s2840_s1 }
 0x1bc   :  { %726 = vrot.lane.b32.xlu0 %v3672_v15, %s2840_s1 }
 0x1be   :  { %728 = vrot.lane.b32.xlu1 %v3676_v30, %s2840_s1 }
 0x1c0   :  { %730 = vrot.lane.b32.xlu0 %v3682_v60, %s2840_s1 }
 0x1c2   :  { %732 = vrot.lane.b32.xlu1 %v3688_v55, %s2840_s1 }
 0x1c4   :  { %734 = vrot.lane.b32.xlu0 %v3692_v49, %s2840_s1 }
 0x1c6   :  { %736 = vrot.lane.b32.xlu1 %v3698_v61, %s2840_s1 }
 0x1c8   :  { %782 = vrot.lane.b32.xlu0 %v3660_v5, %s2841_s21 }
 0x1ca   :  { %784 = vrot.lane.b32.xlu1 %v3666_v28, %s2841_s21 }
 0x1cc   :  { %786 = vrot.lane.b32.xlu0 %v3672_v15, %s2841_s21 }
 0x1ce   :  { %788 = vrot.lane.b32.xlu1 %v3676_v30, %s2841_s21 }
 0x1d0   :  { %790 = vrot.lane.b32.xlu0 %v3682_v60, %s2841_s21 }
 0x1d2   :  { %792 = vrot.lane.b32.xlu1 %v3688_v55, %s2841_s21 }
 0x1d4   :  { %794 = vrot.lane.b32.xlu0 %v3692_v49, %s2841_s21 }
 0x1d6   :  { %796 = vrot.lane.b32.xlu1 %v3698_v61, %s2841_s21  ;;  %v2768_v61 = vld [vmem:[#allocation3 + $0x10] sm:$0xff] }
 0x1d8   :  { %1772 = vrot.lane.b32.xlu0 %v3730_v45, %s2840_s1 }
 0x1da   :  { %1774 = vrot.lane.b32.xlu1 %v3736_v46, %s2840_s1 }
 0x1dc   :  { %1820 = vrot.lane.b32.xlu0 %v6518_v39, %s2841_s21 }
 0x1de   :  { %1822 = vrot.lane.b32.xlu1 %v6521_v10, %s2841_s21 }
 0x1e0   :  { %1824 = vrot.lane.b32.xlu0 %v6522_v19, %s2841_s21 }
 0x1e2   :  { %1826 = vrot.lane.b32.xlu1 %v6524_v20, %s2841_s21 }
 0x1e4   :  { %1828 = vrot.lane.b32.xlu0 %v6525_v63, %s2841_s21 }
 0x1e6   :  { %1830 = vrot.lane.b32.xlu1 %v6527_v11, %s2841_s21 }
 0x1e8   :  { %1832 = vrot.lane.b32.xlu0 %v3730_v45, %s2841_s21 }
 0x1ea   :  { %v3764_v23 = vpop.permute.xlu0 %502  ;;  %1834 = vrot.lane.b32.xlu1 %v3736_v46, %s2841_s21  ;;  %v1583_v46 = vstv %s2620_s3  ;;  %s2611_s3 = sld [smem:[#allocation4 + $0x1c]] }
 0x1eb   :  { %6529 = vst [vmem:[#allocation27_spill] sm:$0xff] %v3764_v23  ;;  %v1586_v49 = vmul.f32 %v2768_v61, %v1583_v46  ;;  %v3800_v55 = vmul.f32 %v2769_v36, %v1583_v46  ;;  %v3804_v57 = vmul.f32 %v2771_v62, %v1583_v46  ;;  %v6541_v36 = vld [vmem:[#allocation14_spill] sm:$0xff] }
 0x1ec   :  { %v3768_v1 = vpop.permute.xlu1 %504 }
 0x1ed   :  { %6530 = vst [vmem:[#allocation29_spill] sm:$0xff] %v3768_v1 }
 0x1ee   :  { %v3770_v37 = vpop.permute.xlu0 %506 }
 0x1ef   :  { %6531 = vst [vmem:[#allocation49_spill] sm:$0xff] %v3770_v37 }
 0x1f0   :  { %v3772_v38 = vpop.permute.xlu1 %508 }
 0x1f1   :  { %6532 = vst [vmem:[#allocation50_spill] sm:$0xff] %v3772_v38  ;;  %v1693_v38 = vstv %s2623_s4  ;;  %s2610_s4 = sld [smem:[#allocation4 + $0x1b]] }
 0x1f2   :  { %v3774_v31 = vpop.permute.xlu0 %510  ;;  %v3816_v24 = vmul.f32 %v1693_v38, %v6541_v36 }
 0x1f3   :  { %6533 = vst [vmem:[#allocation51_spill] sm:$0xff] %v3774_v31  ;;  %v3794_v31 = vstv %s2626_s5  ;;  %s2612_s5 = sld [smem:[#allocation4 + $0x1d]] }
 0x1f4   :  { %v3778_v45 = vpop.permute.xlu1 %512  ;;  %6537 = vst [vmem:[#allocation55_spill] sm:$0xff] %v3794_v31 }
 0x1f5   :  { %6534 = vst [vmem:[#allocation52_spill] sm:$0xff] %v3778_v45  ;;  %v2766_v45 = vld [vmem:[#allocation3] sm:$0xff] }
 0x1f6   :  { %v3782_v12 = vpop.permute.xlu0 %514  ;;  %v1584_v23 = vmul.f32 %v2766_v45, %v1583_v46  ;;  %v2773_v45 = vld [vmem:[#allocation3 + $0x38] sm:$0xff] }
 0x1f7   :  { %6535 = vst [vmem:[#allocation53_spill] sm:$0xff] %v3782_v12  ;;  %v3798_v12 = vmul.f32 %v2767_v16, %v1583_v46  ;;  %v3808_v60 = vmul.f32 %v2773_v45, %v1583_v46  ;;  %v6539_v16 = vld [vmem:[#allocation13_spill] sm:$0xff] }
 0x1f8   :  { %v3790_v37 = vpop.permute.xlu1 %516  ;;  %v3813_v61 = vmul.f32 %v1693_v38, %v6539_v16  ;;  %v3833_v16 = vmul.f32 %v1693_v38, %v6547_v41  ;;  %v3851_v41 = vmul.f32 %v3794_v31, %v6524_v20  ;;  %v6558_v20 = vld [vmem:[#allocation20_spill] sm:$0xff] }
 0x1f9   :  { %6536 = vst [vmem:[#allocation54_spill] sm:$0xff] %v3790_v37  ;;  %v2770_v37 = vld [vmem:[#allocation3 + $0x20] sm:$0xff] }
 0x1fa   :  { %v3796_v1 = vpop.permute.xlu0 %562  ;;  %v1588_v4 = vmul.f32 %v2770_v37, %v1583_v46  ;;  %6540 = vst [vmem:[#allocation13_spill] sm:$0xff] %v3813_v61  ;;  %v3819_v37 = vmul.f32 %v1693_v38, %v6542_v26  ;;  %6548 = vst [vmem:[#allocation17_spill] sm:$0xff] %v3833_v16  ;;  %v1565_v61 = vstv %s3776_s6  ;;  %v1556_v26 = vsel %vm3191_vm6, 0.0, %v3533_v14  ;;  %v6554_v14 = vld [vmem:[#allocation18_spill] sm:$0xff]  ;;  %s5298_s6 = sld [smem:[#allocation4 + $0x1e]] }
 0x1fb   :  { %6538 = vst [vmem:[#allocation56_spill] sm:$0xff] %v3796_v1  ;;  %v3806_v1 = vmul.f32 %v2772_v59, %v1583_v46  ;;  %v3827_v59 = vmul.f32 %v3794_v31, %v6518_v39  ;;  %v6545_v46 = vld [vmem:[#allocation16_spill] sm:$0xff]  ;;  %v3847_v39 = vmul.f32 %v3794_v31, %v6522_v19  ;;  %6552 = vst [vmem:[#allocation60_spill] sm:$0xff] %v3851_v41  ;;  %v1558_v19 = vsel %vm3191_vm6, 0.0, %v3556_v40 }
 0x1fc   :  { %v3823_v62 = vpop.permute.xlu1 %564  ;;  %v3830_v45 = vmul.f32 %v1693_v38, %v6545_v46  ;;  %v3855_v46 = vmul.f32 %v3794_v31, %v6525_v63  ;;  %v3870_v41 = vmul.f32 %v1693_v38, %v6558_v20  ;;  %v1566_v63 = vmul.f32 %v1565_v61, %v1556_v26 }
 0x1fd   :  { %6543 = vst [vmem:[#allocation14_spill] sm:$0xff] %v3823_v62  ;;  %6544 = vst [vmem:[#allocation15_spill] sm:$0xff] %v3827_v59  ;;  %v3843_v62 = vmul.f32 %v3794_v31, %v6521_v10  ;;  %v3858_v59 = vmul.f32 %v1693_v38, %v6554_v14  ;;  %v1557_v10 = vsel %vm3191_vm6, 0.0, %v3549_v27  ;;  %v1559_v14 = vsel %vm3191_vm6, 0.0, %v3566_v7 }
 0x1fe   :  { %6546 = vst [vmem:[#allocation16_spill] sm:$0xff] %v3830_v45  ;;  %v3839_v36 = vpop.permute.xlu0 %566  ;;  %6551 = vst [vmem:[#allocation59_spill] sm:$0xff] %v3847_v39  ;;  %v3882_v40 = vstv %s3784_s8  ;;  %v3887_v26 = vstv %s3786_s9  ;;  %v3891_v20 = vmul.f32 %v3794_v31, %v6527_v11  ;;  %v1567_v7 = vmul.f32 %v1565_v61, %v1557_v10  ;;  %s2616_s8 = sld [smem:[#allocation4 + $0x21]] }
 0x1ff   :  { %6549 = vst [vmem:[#allocation57_spill] sm:$0xff] %v3839_v36  ;;  %6550 = vst [vmem:[#allocation58_spill] sm:$0xff] %v3843_v62  ;;  %v6556_v36 = vld [vmem:[#allocation19_spill] sm:$0xff]  ;;  %v1562_v39 = vsel %vm3191_vm6, 0.0, %v3584_v48  ;;  %v1569_v62 = vmul.f32 %v1565_v61, %v1559_v14  ;;  %v3906_v45 = vstv %s3802_s12  ;;  %v3909_v11 = vstv %s3810_s13  ;;  %s2617_s9 = sld [smem:[#allocation4 + $0x22]] }
 0x200   :  { %6553 = vst [vmem:[#allocation61_spill] sm:$0xff] %v3855_v46  ;;  %6555 = vst [vmem:[#allocation18_spill] sm:$0xff] %v3858_v59  ;;  %v3861_v16 = vmul.f32 %v1693_v38, %v6556_v36  ;;  %v1560_v36 = vsel %vm3191_vm6, 0.0, %v3574_v34  ;;  %v3878_v27 = vpop.permute.xlu1 %568  ;;  %v655_v46 = vstv %s3780_s7  ;;  %v1561_v34 = vsel %vm3191_vm6, 0.0, %v3582_v29  ;;  %s2615_s7 = sld [smem:[#allocation4 + $0x20]] }
 0x201   :  { %6559 = vst [vmem:[#allocation20_spill] sm:$0xff] %v3870_v41  ;;  %6560 = vst [vmem:[#allocation62_spill] sm:$0xff] %v3878_v27  ;;  %v1568_v41 = vmul.f32 %v1565_v61, %v1558_v19  ;;  %v1570_v27 = vmul.f32 %v1565_v61, %v1560_v36  ;;  %v1592_v59 = vadd.f32 %v1584_v23, %v1566_v63  ;;  %v3912_v10 = vstv %s3821_s14  ;;  %s2641_s12 = sld [smem:[#allocation4 + $0x3a]] }
 0x202   :  { %6557 = vst [vmem:[#allocation19_spill] sm:$0xff] %v3861_v16  ;;  %v3884_v38 = vpop.permute.xlu0 %570  ;;  %6562 = vst [vmem:[#allocation64_spill] sm:$0xff] %v3891_v20  ;;  %v3900_v16 = vstv %s3788_s10  ;;  %v1571_v29 = vmul.f32 %v1565_v61, %v1561_v34  ;;  %v1572_v31 = vmul.f32 %v1565_v61, %v1562_v39  ;;  %v1563_v48 = vsel %vm3191_vm6, 0.0, %v3590_v52  ;;  %s2618_s10 = sld [smem:[#allocation4 + $0x23]] }
 0x203   :  { %6561 = vst [vmem:[#allocation63_spill] sm:$0xff] %v3884_v38  ;;  %v3903_v38 = vstv %s3792_s11  ;;  %6563 = vst [vmem:[#allocation65_spill] sm:$0xff] %v3909_v11  ;;  %v1616_v14 = vsel %vm3298_vm11, 0.0, %v3596_v9  ;;  %v1593_v63 = vadd.f32 %v3798_v12, %v1567_v7  ;;  %v1594_v36 = vadd.f32 %v1586_v49, %v1568_v41  ;;  %s2628_s11 = sld [smem:[#allocation4 + $0x24]] }
 0x204   :  { %v3914_v19 = vpop.permute.xlu1 %572  ;;  %v3928_v20 = vmul.f32 %v3514_v50, %v655_v46  ;;  %v3931_v39 = vmul.f32 %v3517_v21, %v655_v46  ;;  %v1595_v34 = vadd.f32 %v3800_v55, %v1569_v62  ;;  %v1596_v52 = vadd.f32 %v1588_v4, %v1570_v27  ;;  %s2638_s13 = sld [smem:[#allocation4 + $0x37]] }
 0x205   :  { %v1617_v9 = vsel %vm3298_vm11, 0.0, %v3602_v43  ;;  %v3938_v11 = vmul.f32 %v3519_v35, %v655_v46  ;;  %v1626_v12 = vmul.f32 %v3900_v16, %v1616_v14  ;;  %v1618_v50 = vsel %vm3298_vm11, 0.0, %v3604_v54  ;;  %s2644_s14 = sld [smem:[#allocation4 + $0x3d]] }
 0x206   :  { %v3924_v23 = vpop.permute.xlu0 %574  ;;  %v3945_v21 = vmul.f32 %v3523_v47, %v655_v46  ;;  %v3950_v4 = vadd.f32 %v3804_v57, %v1571_v29  ;;  %v3953_v43 = vadd.f32 %v3806_v1, %v1572_v31  ;;  %v3956_v35 = vmul.f32 %v3527_v53, %v655_v46 }
 0x207   :  { %6564 = vst [vmem:[#allocation66_spill] sm:$0xff] %v3924_v23  ;;  %v1573_v23 = vmul.f32 %v1565_v61, %v1563_v48  ;;  %v3960_v55 = vmul.f32 %v3882_v40, %v3525_v25  ;;  %v1627_v47 = vmul.f32 %v3900_v16, %v1617_v9  ;;  %v3966_v54 = vmul.f32 %v3535_v2, %v655_v46  ;;  %v6570_v48 = vld [vmem:[#allocation22_spill] sm:$0xff] }
 0x208   :  { %v3947_v49 = vpop.permute.xlu1 %576  ;;  %v3969_v57 = vmul.f32 %v3539_v18, %v655_v46  ;;  %v3973_v31 = vmul.f32 %v3882_v40, %v3537_v0  ;;  %v1628_v53 = vmul.f32 %v3900_v16, %v1618_v50  ;;  %v3978_v25 = vmul.f32 %v3882_v40, %v3544_v42 }
 0x209   :  { %v3982_v1 = vmul.f32 %v3887_v26, %v3660_v5  ;;  %v3986_v2 = vmul.f32 %v3887_v26, %v3666_v28  ;;  %v1599_v18 = vadd.f32 %v3808_v60, %v1573_v23  ;;  %v1634_v62 = vadd.f32 %v1626_v12, %v1592_v59 }
 0x20a   :  { %v3962_v61 = vpop.permute.xlu0 %612  ;;  %v3990_v0 = vmul.f32 %v3551_v3, %v655_v46  ;;  %v3994_v41 = vmul.f32 %v3882_v40, %v3553_v33  ;;  %v1619_v5 = vsel %vm3298_vm11, 0.0, %v3610_v17  ;;  %v1620_v28 = vsel %vm3298_vm11, 0.0, %v3616_v22 }
 0x20b   :  { %6565 = vst [vmem:[#allocation67_spill] sm:$0xff] %v3982_v1  ;;  %6566 = vst [vmem:[#allocation68_spill] sm:$0xff] %v3986_v2  ;;  %v4006_v60 = vmul.f32 %v3882_v40, %v3560_v51  ;;  %v4009_v3 = vstv %s3922_s15  ;;  %v1635_v33 = vadd.f32 %v1627_v47, %v1593_v63  ;;  %v1666_v46 = vsel %vm3191_vm6, 0.0, %v3636_v58  ;;  %v6572_v63 = vld [vmem:[#allocation25_spill] sm:$0xff]  ;;  %v6580_v2 = vld [vmem:[#allocation28_spill] sm:$0xff]  ;;  %s2637_s15 = sld [smem:[#allocation4 + $0x36]] }
 0x20c   :  { %6567 = vst [vmem:[#allocation69_spill] sm:$0xff] %v3990_v0  ;;  %v3996_v42 = vpop.permute.xlu1 %614  ;;  %v4018_v17 = vmul.f32 %v3887_v26, %v3672_v15  ;;  %v4022_v22 = vmul.f32 %v3887_v26, %v3676_v30  ;;  %v1636_v27 = vadd.f32 %v1628_v53, %v1594_v36  ;;  %v1621_v51 = vsel %vm3298_vm11, 0.0, %v3622_v56  ;;  %v6575_v53 = vld [vmem:[#allocation11_spill] sm:$0xff] }
 0x20d   :  { %v1667_v7 = vsel %vm3191_vm6, 0.0, %v3642_v44  ;;  %v4032_v58 = vmul.f32 %v3882_v40, %v3564_v6  ;;  %v1629_v15 = vmul.f32 %v3900_v16, %v1619_v5  ;;  %v1630_v29 = vmul.f32 %v3900_v16, %v1620_v28  ;;  %v6571_v44 = vld [vmem:[#allocation10_spill] sm:$0xff]  ;;  %v6576_v28 = vld [vmem:[#allocation12_spill] sm:$0xff] }
 0x20e   :  { %v4011_v59 = vpop.permute.xlu0 %616  ;;  %6568 = vst [vmem:[#allocation70_spill] sm:$0xff] %v4018_v17  ;;  %6569 = vst [vmem:[#allocation71_spill] sm:$0xff] %v4022_v22  ;;  %v1622_v30 = vsel %vm3298_vm11, 0.0, %v3624_v13  ;;  %v1668_v56 = vsel %vm3191_vm6, 0.0, %v6570_v48  ;;  %v1623_v6 = vsel %vm3298_vm11, 0.0, %v6571_v44  ;;  %v1676_v23 = vmul.f32 %v3903_v38, %v1666_v46  ;;  %v6573_v13 = vld [vmem:[#allocation33_spill] sm:$0xff] }
 0x20f   :  { %v4052_v36 = vmul.f32 %v3882_v40, %v6572_v63  ;;  %v4058_v12 = vmul.f32 %v3887_v26, %v6573_v13  ;;  %v1631_v50 = vmul.f32 %v3900_v16, %v1621_v51  ;;  %v1677_v47 = vmul.f32 %v3903_v38, %v1667_v7  ;;  %v6577_v63 = vld [vmem:[#allocation30_spill] sm:$0xff]  ;;  %v6579_v17 = vld [vmem:[#allocation35_spill] sm:$0xff] }
 0x210   :  { %v4044_v14 = vpop.permute.xlu1 %618  ;;  %v1669_v5 = vsel %vm3191_vm6, 0.0, %v6575_v53  ;;  %v1670_v46 = vsel %vm3191_vm6, 0.0, %v6576_v28  ;;  %v1632_v48 = vmul.f32 %v3900_v16, %v1622_v30  ;;  %v1678_v44 = vmul.f32 %v3903_v38, %v1668_v56 }
 0x211   :  { %6574 = vst [vmem:[#allocation22_spill] sm:$0xff] %v4058_v12  ;;  %v1671_v13 = vsel %vm3191_vm6, 0.0, %v6577_v63  ;;  %v6578_v12 = vld [vmem:[#allocation31_spill] sm:$0xff]  ;;  %v1637_v7 = vadd.f32 %v1629_v15, %v1595_v34  ;;  %v1638_v22 = vadd.f32 %v1630_v29, %v1596_v52  ;;  %v1633_v53 = vmul.f32 %v3900_v16, %v1623_v6  ;;  %v6581_v29 = vld [vmem:[#allocation36_spill] sm:$0xff] }
 0x212   :  { %v4054_v9 = vpop.permute.xlu0 %620  ;;  %v1672_v51 = vsel %vm3191_vm6, 0.0, %v6578_v12  ;;  %v4081_v28 = vmul.f32 %v3887_v26, %v6579_v17  ;;  %v1684_v30 = vadd.f32 %v1676_v23, %v1634_v62  ;;  %v1679_v56 = vmul.f32 %v3903_v38, %v1669_v5  ;;  %v6582_v12 = vld [vmem:[#allocation38_spill] sm:$0xff]  ;;  %v6586_v5 = vld [vmem:[#allocation37_spill] sm:$0xff] }
 0x213   :  { %v1680_v63 = vmul.f32 %v3903_v38, %v1670_v46  ;;  %v4087_v1 = vmul.f32 %v3882_v40, %v6580_v2  ;;  %v1685_v52 = vadd.f32 %v1677_v47, %v1635_v33  ;;  %v1681_v16 = vmul.f32 %v3903_v38, %v1671_v13  ;;  %v6585_v33 = vld [vmem:[#allocation34_spill] sm:$0xff] }
 0x214   :  { %v4077_v0 = vpop.permute.xlu1 %622  ;;  %v1682_v15 = vmul.f32 %v3903_v38, %v1672_v51  ;;  %v4095_v17 = vmul.f32 %v3887_v26, %v6581_v29  ;;  %v1639_v62 = vadd.f32 %v1631_v50, %v3950_v4  ;;  %v1640_v6 = vadd.f32 %v1632_v48, %v3953_v43  ;;  %v6589_v29 = vld [vmem:[#allocation32_spill] sm:$0xff] }
 0x215   :  { %v1686_v23 = vadd.f32 %v1678_v44, %v1636_v27  ;;  %v4101_v40 = vmul.f32 %v3887_v26, %v6582_v12  ;;  %v4103_v2 = vadd.f32 %v1633_v53, %v1599_v18  ;;  %v1726_v47 = vsel %vm3298_vm11, 0.0, %v6585_v33  ;;  %v6587_v26 = vld [vmem:[#allocation13_spill] sm:$0xff]  ;;  %v6588_v18 = vld [vmem:[#allocation39_spill] sm:$0xff] }
 0x216   :  { %v4089_v34 = vpop.permute.xlu0 %624  ;;  %v1727_v46 = vsel %vm3298_vm11, 0.0, %v6586_v5  ;;  %v4112_v13 = vstv %s4042_s16  ;;  %v1687_v43 = vadd.f32 %v1679_v56, %v1637_v7  ;;  %v1688_v27 = vadd.f32 %v1680_v63, %v1638_v22  ;;  %v6590_v56 = vld [vmem:[#allocation27_spill] sm:$0xff]  ;;  %s5713_s16 = sld [smem:[#allocation4 + $0x38]] }
 0x217   :  { %6583 = vst [vmem:[#allocation10_spill] sm:$0xff] %v4101_v40  ;;  %6584 = vst [vmem:[#allocation25_spill] sm:$0xff] %v4103_v2  ;;  %v1702_v50 = vadd.f32 %v6587_v26, %v1684_v30  ;;  %v1728_v48 = vsel %vm3298_vm11, 0.0, %v6588_v18  ;;  %v1689_v51 = vadd.f32 %v1681_v16, %v1639_v62  ;;  %v1690_v53 = vadd.f32 %v1682_v15, %v1640_v6  ;;  %v6591_v15 = vld [vmem:[#allocation29_spill] sm:$0xff] }
 0x218   :  { %v4114_v4 = vpop.permute.xlu1 %626  ;;  %v1673_v12 = vsel %vm3191_vm6, 0.0, %v6589_v29  ;;  %v1703_v33 = vadd.f32 %v3816_v24, %v1685_v52  ;;  %v1736_v22 = vmul.f32 %v3906_v45, %v1726_v47  ;;  %v1737_v7 = vmul.f32 %v3906_v45, %v1727_v46  ;;  %v6592_v6 = vld [vmem:[#allocation49_spill] sm:$0xff]  ;;  %v6593_v52 = vld [vmem:[#allocation50_spill] sm:$0xff] }
 0x219   :  { %v1704_v30 = vadd.f32 %v3819_v37, %v1686_v23  ;;  %v518_v63 = vsel %vm3191_vm6, 0.0, %v6590_v56  ;;  %v1738_v16 = vmul.f32 %v3906_v45, %v1728_v48  ;;  %v519_v62 = vsel %vm3191_vm6, 0.0, %v6591_v15  ;;  %v6595_v23 = vld [vmem:[#allocation16_spill] sm:$0xff]  ;;  %v6597_v26 = vld [vmem:[#allocation17_spill] sm:$0xff]  ;;  %v6599_v48 = vld [vmem:[#allocation51_spill] sm:$0xff] }
 0x21a   :  { %v4122_v44 = vpop.permute.xlu0 %672  ;;  %v520_v24 = vsel %vm3191_vm6, 0.0, %v6592_v6  ;;  %v521_v47 = vsel %vm3191_vm6, 0.0, %v6593_v52  ;;  %v4151_v37 = vmul.f32 %v3903_v38, %v1673_v12  ;;  %v4154_v46 = vadd.f32 %v6595_v23, %v1687_v43  ;;  %v6600_v15 = vld [vmem:[#allocation18_spill] sm:$0xff]  ;;  %v6602_v52 = vld [vmem:[#allocation19_spill] sm:$0xff]  ;;  %v6604_v12 = vld [vmem:[#allocation52_spill] sm:$0xff] }
 0x21b   :  { %v4157_v18 = vadd.f32 %v6597_v26, %v1688_v27  ;;  %v522_v29 = vsel %vm3191_vm6, 0.0, %v6599_v48  ;;  %v4165_v6 = vadd.f32 %v6600_v15, %v1689_v51  ;;  %v4168_v2 = vadd.f32 %v6602_v52, %v1690_v53 }
 0x21c   :  { %v4148_v5 = vpop.permute.xlu1 %674  ;;  %6594 = vst [vmem:[#allocation33_spill] sm:$0xff] %v4151_v37  ;;  %6596 = vst [vmem:[#allocation11_spill] sm:$0xff] %v4154_v46  ;;  %v528_v38 = vmul.f32 %v3912_v10, %v518_v63  ;;  %v523_v43 = vsel %vm3191_vm6, 0.0, %v6604_v12  ;;  %v4174_v27 = vadd.f32 %v1736_v22, %v1702_v50  ;;  %v529_v23 = vmul.f32 %v3912_v10, %v519_v62  ;;  %v6608_v50 = vld [vmem:[#allocation40_spill] sm:$0xff]  ;;  %v6614_v46 = vld [vmem:[#allocation57_spill] sm:$0xff] }
 0x21d   :  { %6598 = vst [vmem:[#allocation12_spill] sm:$0xff] %v4157_v18  ;;  %6601 = vst [vmem:[#allocation30_spill] sm:$0xff] %v4165_v6  ;;  %v530_v26 = vmul.f32 %v3912_v10, %v520_v24  ;;  %v531_v51 = vmul.f32 %v3912_v10, %v521_v47  ;;  %v4179_v48 = vadd.f32 %v1737_v7, %v1703_v33  ;;  %v4185_v15 = vstv %s4116_s0  ;;  %v6610_v33 = vld [vmem:[#allocation53_spill] sm:$0xff]  ;;  %v6612_v18 = vld [vmem:[#allocation14_spill] sm:$0xff]  ;;  %s5856_s0 = sld [smem:[#allocation4 + $0x3b]] }
 0x21e   :  { %v4162_v56 = vpop.permute.xlu0 %676  ;;  %6603 = vst [vmem:[#allocation31_spill] sm:$0xff] %v4168_v2  ;;  %6605 = vst [vmem:[#allocation35_spill] sm:$0xff] %v4174_v27  ;;  %v4181_v53 = vadd.f32 %v1738_v16, %v1704_v30  ;;  %v532_v63 = vmul.f32 %v3912_v10, %v522_v29  ;;  %v533_v47 = vmul.f32 %v3912_v10, %v523_v43  ;;  %v524_v7 = vsel %vm3191_vm6, 0.0, %v6610_v33  ;;  %v6611_v29 = vld [vmem:[#allocation56_spill] sm:$0xff] }
 0x21f   :  { %6606 = vst [vmem:[#allocation28_spill] sm:$0xff] %v4179_v48  ;;  %v554_v16 = vadd.f32 %v3960_v55, %v528_v38  ;;  %v578_v12 = vsel %vm3298_vm11, 0.0, %v6611_v29  ;;  %v4206_v2 = vstv %s4124_s17  ;;  %v4209_v22 = vstv %s4130_s18  ;;  %s5867_s17 = sld [smem:[#allocation4 + $0x26]] }
 0x220   :  { %6607 = vst [vmem:[#allocation36_spill] sm:$0xff] %v4181_v53  ;;  %v4187_v52 = vpop.permute.xlu1 %678  ;;  %v555_v24 = vadd.f32 %v3973_v31, %v529_v23  ;;  %v556_v43 = vadd.f32 %v3978_v25, %v530_v26  ;;  %v557_v6 = vadd.f32 %v3994_v41, %v531_v51  ;;  %v579_v33 = vsel %vm3298_vm11, 0.0, %v6612_v18  ;;  %v6613_v53 = vld [vmem:[#allocation54_spill] sm:$0xff]  ;;  %s5901_s18 = sld [smem:[#allocation4 + $0x27]] }
 0x221   :  { %v558_v55 = vadd.f32 %v4006_v60, %v532_v63  ;;  %v534_v38 = vmul.f32 %v3912_v10, %v524_v7  ;;  %v525_v29 = vsel %vm3191_vm6, 0.0, %v6613_v53  ;;  %v580_v31 = vsel %vm3298_vm11, 0.0, %v6614_v46  ;;  %v6615_v53 = vld [vmem:[#allocation62_spill] sm:$0xff]  ;;  %v6616_v63 = vld [vmem:[#allocation63_spill] sm:$0xff] }
 0x222   :  { %v4199_v30 = vpop.permute.xlu0 %680  ;;  %v559_v25 = vadd.f32 %v4032_v58, %v533_v47  ;;  %v588_v41 = vmul.f32 %v4009_v3, %v578_v12  ;;  %v628_v60 = vsel %vm3191_vm6, 0.0, %v3962_v61  ;;  %v629_v18 = vsel %vm3191_vm6, 0.0, %v3996_v42  ;;  %v6617_v12 = vld [vmem:[#allocation66_spill] sm:$0xff] }
 0x223   :  { %v589_v51 = vmul.f32 %v4009_v3, %v579_v33  ;;  %v581_v46 = vsel %vm3298_vm11, 0.0, %v6615_v53  ;;  %v582_v58 = vsel %vm3298_vm11, 0.0, %v6616_v63  ;;  %v630_v61 = vsel %vm3191_vm6, 0.0, %v4011_v59 }
 0x224   :  { %v4225_v23 = vpop.permute.xlu1 %682  ;;  %v535_v47 = vmul.f32 %v3912_v10, %v525_v29  ;;  %v590_v42 = vmul.f32 %v4009_v3, %v580_v31  ;;  %v583_v7 = vsel %vm3298_vm11, 0.0, %v3914_v19  ;;  %v584_v33 = vsel %vm3298_vm11, 0.0, %v6617_v12 }
 0x225   :  { %v585_v53 = vsel %vm3298_vm11, 0.0, %v3947_v49  ;;  %v638_v63 = vmul.f32 %v4112_v13, %v628_v60  ;;  %v639_v59 = vmul.f32 %v4112_v13, %v629_v18  ;;  %v631_v10 = vsel %vm3191_vm6, 0.0, %v4044_v14 }
 0x226   :  { %v4235_v26 = vpop.permute.xlu0 %684  ;;  %v560_v19 = vadd.f32 %v4052_v36, %v534_v38  ;;  %v591_v31 = vmul.f32 %v4009_v3, %v581_v46  ;;  %v592_v12 = vmul.f32 %v4009_v3, %v582_v58  ;;  %v640_v37 = vmul.f32 %v4112_v13, %v630_v61 }
 0x227   :  { %v596_v49 = vadd.f32 %v588_v41, %v554_v16  ;;  %v597_v27 = vadd.f32 %v589_v51, %v555_v24  ;;  %v593_v60 = vmul.f32 %v4009_v3, %v583_v7  ;;  %v594_v18 = vmul.f32 %v4009_v3, %v584_v33 }
 0x228   :  { %v4263_v29 = vpop.permute.xlu1 %686  ;;  %v598_v40 = vadd.f32 %v590_v42, %v556_v43  ;;  %v595_v14 = vmul.f32 %v4009_v3, %v585_v53  ;;  %v641_v62 = vmul.f32 %v4112_v13, %v631_v10  ;;  %v632_v36 = vsel %vm3191_vm6, 0.0, %v4054_v9 }
 0x229   :  { %v561_v38 = vadd.f32 %v4087_v1, %v535_v47  ;;  %v646_v46 = vadd.f32 %v638_v63, %v596_v49  ;;  %v647_v58 = vadd.f32 %v639_v59, %v597_v27  ;;  %v633_v24 = vsel %vm3191_vm6, 0.0, %v4077_v0 }
 0x22a   :  { %v723_v48 = vpop.permute.xlu0 %722  ;;  %v599_v41 = vadd.f32 %v591_v31, %v557_v6  ;;  %v600_v51 = vadd.f32 %v592_v12, %v558_v55  ;;  %v648_v43 = vadd.f32 %v640_v37, %v598_v40  ;;  %v634_v3 = vsel %vm3191_vm6, 0.0, %v4089_v34 }
 0x22b   :  { %v601_v42 = vadd.f32 %v593_v60, %v559_v25  ;;  %v602_v7 = vadd.f32 %v594_v18, %v560_v19  ;;  %v642_v9 = vmul.f32 %v4112_v13, %v632_v36  ;;  %v688_v1 = vsel %vm3298_vm11, 0.0, %v4122_v44 }
 0x22c   :  { %v725_v16 = vpop.permute.xlu1 %724  ;;  %v603_v27 = vadd.f32 %v595_v14, %v561_v38  ;;  %v649_v47 = vadd.f32 %v641_v62, %v599_v41  ;;  %v643_v0 = vmul.f32 %v4112_v13, %v633_v24  ;;  %v689_v40 = vsel %vm3298_vm11, 0.0, %v4148_v5 }
 0x22d   :  { %v644_v37 = vmul.f32 %v4112_v13, %v634_v3  ;;  %v664_v34 = vadd.f32 %v3928_v20, %v646_v46  ;;  %v665_v6 = vadd.f32 %v3931_v39, %v647_v58  ;;  %v738_v55 = vsel %vm3191_vm6, 0.0, %v723_v48 }
 0x22e   :  { %v727_v61 = vpop.permute.xlu0 %726  ;;  %v698_v44 = vmul.f32 %v4185_v15, %v688_v1  ;;  %v666_v62 = vadd.f32 %v3938_v11, %v648_v43  ;;  %v690_v33 = vsel %vm3298_vm11, 0.0, %v4162_v56  ;;  %v739_v5 = vsel %vm3191_vm6, 0.0, %v725_v16 }
 0x22f   :  { %v650_v63 = vadd.f32 %v642_v9, %v600_v51  ;;  %v635_v20 = vsel %vm3191_vm6, 0.0, %v4114_v4  ;;  %v699_v39 = vmul.f32 %v4185_v15, %v689_v40  ;;  %v691_v48 = vsel %vm3298_vm11, 0.0, %v4187_v52 }
 0x230   :  { %v729_v25 = vpop.permute.xlu1 %728  ;;  %v651_v11 = vadd.f32 %v643_v0, %v601_v42  ;;  %v667_v59 = vadd.f32 %v3945_v21, %v649_v47  ;;  %v748_v56 = vmul.f32 %v4206_v2, %v738_v55  ;;  %v740_v10 = vsel %vm3191_vm6, 0.0, %v727_v61 }
 0x231   :  { %v652_v19 = vadd.f32 %v644_v37, %v602_v7  ;;  %v700_v31 = vmul.f32 %v4185_v15, %v690_v33  ;;  %v692_v4 = vsel %vm3298_vm11, 0.0, %v4199_v30  ;;  %v749_v12 = vmul.f32 %v4206_v2, %v739_v5  ;;  %v6618_v37 = vld [vmem:[#allocation67_spill] sm:$0xff] }
 0x232   :  { %v731_v53 = vpop.permute.xlu0 %730  ;;  %v645_v52 = vmul.f32 %v4112_v13, %v635_v20  ;;  %v706_v60 = vadd.f32 %v698_v44, %v664_v34  ;;  %v701_v21 = vmul.f32 %v4185_v15, %v691_v48  ;;  %v693_v18 = vsel %vm3298_vm11, 0.0, %v4225_v23  ;;  %v6619_v44 = vld [vmem:[#allocation68_spill] sm:$0xff] }
 0x233   :  { %v707_v36 = vadd.f32 %v699_v39, %v665_v6  ;;  %v668_v38 = vadd.f32 %v3956_v35, %v650_v63  ;;  %v750_v46 = vmul.f32 %v4206_v2, %v740_v10  ;;  %v741_v30 = vsel %vm3191_vm6, 0.0, %v729_v25 }
 0x234   :  { %v733_v49 = vpop.permute.xlu1 %732  ;;  %v702_v58 = vmul.f32 %v4185_v15, %v692_v4  ;;  %v669_v13 = vadd.f32 %v3966_v54, %v651_v11  ;;  %v756_v24 = vadd.f32 %v748_v56, %v706_v60  ;;  %v742_v16 = vsel %vm3191_vm6, 0.0, %v731_v53  ;;  %v6620_v11 = vld [vmem:[#allocation70_spill] sm:$0xff]  ;;  %v6621_v4 = vld [vmem:[#allocation69_spill] sm:$0xff] }
 0x235   :  { %v708_v41 = vadd.f32 %v700_v31, %v666_v62  ;;  %v703_v23 = vmul.f32 %v4185_v15, %v693_v18  ;;  %v694_v35 = vsel %vm3298_vm11, 0.0, %v4235_v26  ;;  %v757_v51 = vadd.f32 %v749_v12, %v707_v36 }
 0x236   :  { %v735_v14 = vpop.permute.xlu0 %734  ;;  %v653_v3 = vadd.f32 %v645_v52, %v603_v27  ;;  %v709_v61 = vadd.f32 %v701_v21, %v667_v59  ;;  %v670_v42 = vadd.f32 %v3969_v57, %v652_v19  ;;  %v751_v7 = vmul.f32 %v4206_v2, %v741_v30 }
 0x237   :  { %v758_v9 = vadd.f32 %v750_v46, %v708_v41  ;;  %v752_v1 = vmul.f32 %v4206_v2, %v742_v16  ;;  %v743_v47 = vsel %vm3191_vm6, 0.0, %v733_v49  ;;  %v710_v40 = vadd.f32 %v702_v58, %v668_v38 }
 0x238   :  { %v737_v43 = vpop.permute.xlu1 %736  ;;  %v704_v26 = vmul.f32 %v4185_v15, %v694_v35  ;;  %v774_v27 = vadd.f32 %v6618_v37, %v756_v24  ;;  %v711_v57 = vadd.f32 %v703_v23, %v669_v13  ;;  %v695_v6 = vsel %vm3298_vm11, 0.0, %v4263_v29  ;;  %v6624_v23 = vld [vmem:[#allocation46_spill] sm:$0xff]  ;;  %v6627_v37 = vld [vmem:[#allocation65_spill] sm:$0xff] }
 0x239   :  { %v744_v55 = vsel %vm3191_vm6, 0.0, %v735_v14  ;;  %v775_v62 = vadd.f32 %v6619_v44, %v757_v51  ;;  %v759_v33 = vadd.f32 %v751_v7, %v709_v61  ;;  %v753_v5 = vmul.f32 %v4206_v2, %v743_v47  ;;  %v6622_v14 = vld [vmem:[#allocation71_spill] sm:$0xff]  ;;  %v6625_v51 = vld [vmem:[#allocation21_spill] sm:$0xff] }
 0x23a   :  { %v783_v54 = vpop.permute.xlu0 %782  ;;  %v760_v39 = vadd.f32 %v752_v1, %v710_v40  ;;  %v776_v59 = vadd.f32 %v6620_v11, %v758_v9  ;;  %v754_v56 = vmul.f32 %v4206_v2, %v744_v55  ;;  %v745_v10 = vsel %vm3191_vm6, 0.0, %v737_v43  ;;  %v6629_v55 = vld [vmem:[#allocation41_spill] sm:$0xff] }
 0x23b   :  { %v798_v0 = vsel %vm3298_vm11, 0.0, %v783_v54  ;;  %v712_v31 = vadd.f32 %v704_v26, %v670_v42  ;;  %v671_v12 = vadd.f32 %v6621_v4, %v653_v3  ;;  %v705_v49 = vmul.f32 %v4185_v15, %v695_v6  ;;  %v6623_v15 = vld [vmem:[#allocation22_spill] sm:$0xff]  ;;  %v6626_v42 = vld [vmem:[#allocation48_spill] sm:$0xff] }
 0x23c   :  { %v808_v34 = vmul.f32 %v4209_v22, %v798_v0  ;;  %v785_v25 = vpop.permute.xlu1 %784  ;;  %v761_v21 = vadd.f32 %v753_v5, %v711_v57  ;;  %v777_v36 = vadd.f32 %v6622_v14, %v759_v33  ;;  %v755_v30 = vmul.f32 %v4206_v2, %v745_v10  ;;  %v6634_v10 = vld [vmem:[#allocation43_spill] sm:$0xff] }
 0x23d   :  { %v799_v63 = vsel %vm3298_vm11, 0.0, %v785_v25  ;;  %v762_v24 = vadd.f32 %v754_v56, %v712_v31  ;;  %v778_v16 = vadd.f32 %v6623_v15, %v760_v39  ;;  %v1776_v35 = vsel %vm3191_vm6, 0.0, %v6624_v23  ;;  %v6635_v31 = vld [vmem:[#allocation35_spill] sm:$0xff] }
 0x23e   :  { %v816_v53 = vadd.f32 %v808_v34, %v774_v27  ;;  %v787_v20 = vpop.permute.xlu0 %786  ;;  %v809_v48 = vmul.f32 %v4209_v22, %v799_v63  ;;  %v1777_v2 = vsel %vm3191_vm6, 0.0, %v6625_v51  ;;  %v713_v43 = vadd.f32 %v705_v49, %v671_v12  ;;  %v6636_v12 = vld [vmem:[#allocation24_spill] sm:$0xff] }
 0x23f   :  { %v800_v29 = vsel %vm3298_vm11, 0.0, %v787_v20  ;;  %v1778_v7 = vsel %vm3191_vm6, 0.0, %v6626_v42  ;;  %v779_v9 = vadd.f32 %v4081_v28, %v761_v21  ;;  %v1786_v27 = vmul.f32 %v6627_v37, %v1776_v35  ;;  %v6637_v21 = vld [vmem:[#allocation28_spill] sm:$0xff]  ;;  %v6642_v35 = vld [vmem:[#allocation26_spill] sm:$0xff] }
 0x240   :  { %2670 = vtanh.f32 %v816_v53  ;;  %v810_v19 = vmul.f32 %v4209_v22, %v800_v29  ;;  %v817_v52 = vadd.f32 %v809_v48, %v775_v62  ;;  %v789_v60 = vpop.permute.xlu1 %788  ;;  %v763_v0 = vadd.f32 %v755_v30, %v713_v43  ;;  %v6631_v53 = vld [vmem:[#allocation42_spill] sm:$0xff]  ;;  %v6632_v48 = vld [vmem:[#allocation23_spill] sm:$0xff] }
 0x241   :  { %v801_v38 = vsel %vm3298_vm11, 0.0, %v789_v60  ;;  %v780_v34 = vadd.f32 %v4095_v17, %v762_v24  ;;  %v6628_v28 = vsel %vm3298_vm11, 0.0, %v6608_v50  ;;  %v6630_v25 = vsel %vm3298_vm11, 0.0, %v6629_v55  ;;  %v6641_v24 = vld [vmem:[#allocation36_spill] sm:$0xff] }
 0x242   :  { %v818_v18 = vadd.f32 %v810_v19, %v776_v59  ;;  %v791_v46 = vpop.permute.xlu0 %790  ;;  %2672 = vtanh.f32 %v817_v52  ;;  %v811_v58 = vmul.f32 %v4209_v22, %v801_v38  ;;  %v1739_v6 = vmul.f32 %v3906_v45, %v6628_v28  ;;  %v6633_v59 = vld [vmem:[#allocation10_spill] sm:$0xff]  ;;  %v6638_v38 = vld [vmem:[#allocation25_spill] sm:$0xff] }
 0x243   :  { %v802_v13 = vsel %vm3298_vm11, 0.0, %v791_v46  ;;  %v1740_v44 = vmul.f32 %v3906_v45, %v6630_v25  ;;  %v1787_v62 = vmul.f32 %v6627_v37, %v1777_v2  ;;  %v1731_v17 = vsel %vm3298_vm11, 0.0, %v6631_v53  ;;  %v6639_v46 = vld [vmem:[#allocation33_spill] sm:$0xff]  ;;  %v6648_v53 = vld [vmem:[#allocation59_spill] sm:$0xff] }
 0x244   :  { %2674 = vtanh.f32 %v818_v18  ;;  %v812_v41 = vmul.f32 %v4209_v22, %v802_v13  ;;  %v819_v3 = vadd.f32 %v811_v58, %v777_v36  ;;  %v793_v61 = vpop.permute.xlu1 %792  ;;  %v1788_v63 = vmul.f32 %v6627_v37, %v1778_v7  ;;  %v6640_v58 = vld [vmem:[#allocation11_spill] sm:$0xff] }
 0x245   :  { %v803_v1 = vsel %vm3298_vm11, 0.0, %v793_v61  ;;  %v1779_v11 = vsel %vm3191_vm6, 0.0, %v6632_v48  ;;  %v781_v29 = vadd.f32 %v6633_v59, %v763_v0  ;;  %v1732_v19 = vsel %vm3298_vm11, 0.0, %v6634_v10  ;;  %v6644_v7 = vld [vmem:[#allocation15_spill] sm:$0xff] }
 0x246   :  { %v820_v54 = vadd.f32 %v812_v41, %v778_v16  ;;  %v795_v47 = vpop.permute.xlu0 %794  ;;  %2676 = vtanh.f32 %v819_v3  ;;  %v813_v40 = vmul.f32 %v4209_v22, %v803_v1  ;;  %v1794_v4 = vadd.f32 %v1786_v27, %v6635_v31  ;;  %v6643_v3 = vld [vmem:[#allocation12_spill] sm:$0xff]  ;;  %v6649_v59 = vld [vmem:[#allocation31_spill] sm:$0xff] }
 0x247   :  { %v804_v26 = vsel %vm3298_vm11, 0.0, %v795_v47  ;;  %v1780_v49 = vsel %vm3191_vm6, 0.0, %v6636_v12  ;;  %v1741_v60 = vmul.f32 %v3906_v45, %v1731_v17  ;;  %v1795_v18 = vadd.f32 %v1787_v62, %v6637_v21  ;;  %v6645_v47 = vld [vmem:[#allocation30_spill] sm:$0xff] }
 0x248   :  { %2678 = vtanh.f32 %v820_v54  ;;  %v814_v57 = vmul.f32 %v4209_v22, %v804_v26  ;;  %v821_v33 = vadd.f32 %v813_v40, %v779_v9  ;;  %v797_v5 = vpop.permute.xlu1 %796  ;;  %v1691_v30 = vadd.f32 %v6639_v46, %v6638_v38  ;;  %v6646_v40 = vld [vmem:[#allocation44_spill] sm:$0xff] }
 0x249   :  { %v805_v50 = vsel %vm3298_vm11, 0.0, %v797_v5  ;;  %v1747_v13 = vadd.f32 %v1739_v6, %v6640_v58  ;;  %v1796_v15 = vadd.f32 %v1788_v63, %v6641_v24  ;;  %v1789_v16 = vmul.f32 %v6627_v37, %v1779_v11  ;;  %v6652_v58 = vld [vmem:[#allocation61_spill] sm:$0xff] }
 0x24a   :  { %v822_v20 = vadd.f32 %v814_v57, %v780_v34  ;;  %v1773_v39 = vpop.permute.xlu0 %1772  ;;  %2680 = vtanh.f32 %v821_v33  ;;  %v815_v56 = vmul.f32 %v4209_v22, %v805_v50  ;;  %v4428_v22 = vstv %s4380_s19  ;;  %v6647_v34 = vld [vmem:[#allocation58_spill] sm:$0xff]  ;;  %s5905_s19 = sld [smem:[#allocation4 + $0x28]] }
 0x24b   :  { %v1790_v23 = vmul.f32 %v6627_v37, %v1780_v49  ;;  %v1781_v51 = vsel %vm3191_vm6, 0.0, %v6642_v35  ;;  %v1748_v61 = vadd.f32 %v1740_v44, %v6643_v3  ;;  %v1742_v42 = vmul.f32 %v3906_v45, %v1732_v19  ;;  %v6653_v35 = vld [vmem:[#allocation64_spill] sm:$0xff]  ;;  %v6654_v3 = vld [vmem:[#allocation45_spill] sm:$0xff] }
 0x24c   :  { %2682 = vtanh.f32 %v822_v20  ;;  %v823_v14 = vadd.f32 %v815_v56, %v781_v29  ;;  %v1775_v36 = vpop.permute.xlu1 %1774  ;;  %v1812_v54 = vadd.f32 %v6644_v7, %v1794_v4  ;;  %v1749_v0 = vadd.f32 %v1741_v60, %v6645_v47  ;;  %v6650_v56 = vld [vmem:[#allocation20_spill] sm:$0xff] }
 0x24d   :  { %v4423_v52 = vpop.eup %2670  ;;  %v1733_v26 = vsel %vm3298_vm11, 0.0, %v6646_v40  ;;  %v1782_v27 = vsel %vm3191_vm6, 0.0, %v1773_v39  ;;  %v1813_v57 = vadd.f32 %v6647_v34, %v1795_v18  ;;  %v1797_v6 = vadd.f32 %v1789_v16, %v1747_v13  ;;  %v6651_v60 = vld [vmem:[#allocation60_spill] sm:$0xff] }
 0x24e   :  { %832 = vst [vmem:[#allocation2 + $0x1] sm:$0xff] %v4423_v52  ;;  %v1821_v41 = vpop.permute.xlu0 %1820  ;;  %2684 = vtanh.f32 %v823_v14  ;;  %v1791_v55 = vmul.f32 %v6627_v37, %v1781_v51  ;;  %v1798_v33 = vadd.f32 %v1790_v23, %v1748_v61  ;;  %v1814_v17 = vadd.f32 %v6648_v53, %v1796_v15  ;;  %v6655_v61 = vld [vmem:[#allocation55_spill] sm:$0xff] }
 0x24f   :  { %v1836_v2 = vsel %vm3298_vm11, 0.0, %v1821_v41  ;;  %v4442_v43 = vpop.eup %2672  ;;  %v1792_v50 = vmul.f32 %v6627_v37, %v1782_v27  ;;  %v1783_v39 = vsel %vm3191_vm6, 0.0, %v1775_v36  ;;  %v1750_v29 = vadd.f32 %v1742_v42, %v6649_v59  ;;  %v6656_v27 = vld [vmem:[#allocation47_spill] sm:$0xff] }
 0x250   :  { %v1846_v9 = vmul.f32 %v4428_v22, %v1836_v2  ;;  %833 = vst [vmem:[#allocation2 + $0x9] sm:$0xff] %v4442_v43  ;;  %v1823_v28 = vpop.permute.xlu1 %1822  ;;  %v1709_v10 = vadd.f32 %v6650_v56, %v1691_v30  ;;  %v1743_v19 = vmul.f32 %v3906_v45, %v1733_v26  ;;  %v1799_v12 = vadd.f32 %v1791_v55, %v1749_v0 }
 0x251   :  { %v4448_v1 = vpop.eup %2674  ;;  %v1837_v44 = vsel %vm3298_vm11, 0.0, %v1823_v28  ;;  %v1815_v21 = vadd.f32 %v6651_v60, %v1797_v6  ;;  %v1793_v36 = vmul.f32 %v6627_v37, %v1783_v39  ;;  %v1800_v30 = vadd.f32 %v1792_v50, %v1750_v29 }
 0x252   :  { %834 = vst [vmem:[#allocation2 + $0x11] sm:$0xff] %v4448_v1  ;;  %v1854_v25 = vadd.f32 %v1846_v9, %v1812_v54  ;;  %v1825_v62 = vpop.permute.xlu0 %1824  ;;  %v1847_v5 = vmul.f32 %v4428_v22, %v1837_v44  ;;  %v1816_v13 = vadd.f32 %v6652_v58, %v1798_v33  ;;  %v1751_v16 = vadd.f32 %v1743_v19, %v1709_v10 }
 0x253   :  { %v1838_v63 = vsel %vm3298_vm11, 0.0, %v1825_v62  ;;  %v4466_v20 = vpop.eup %2676  ;;  %v1817_v51 = vadd.f32 %v6653_v35, %v1799_v12  ;;  %v1810_v42 = vmul.f32 %v6655_v61, %v6654_v3  ;;  %v1811_v34 = vmul.f32 %v6655_v61, %v6656_v27 }
 0x254   :  { %2686 = vtanh.f32 %v1854_v25  ;;  %v1848_v48 = vmul.f32 %v4428_v22, %v1838_v63  ;;  %835 = vst [vmem:[#allocation2 + $0x19] sm:$0xff] %v4466_v20  ;;  %v1855_v31 = vadd.f32 %v1847_v5, %v1813_v57  ;;  %v1827_v4 = vpop.permute.xlu1 %1826  ;;  %v1801_v54 = vadd.f32 %v1793_v36, %v1751_v16 }
 0x255   :  { %v4472_v11 = vpop.eup %2678  ;;  %v1839_v18 = vsel %vm3298_vm11, 0.0, %v1827_v4  ;;  %v1818_v40 = vadd.f32 %v1810_v42, %v1800_v30  ;;  %v4559_v12 = vld [vmem:[#allocation2] sm:$0xff] }
 0x256   :  { %836 = vst [vmem:[#allocation2 + $0x21] sm:$0xff] %v4472_v11  ;;  %v1856_v49 = vadd.f32 %v1848_v48, %v1814_v17  ;;  %v1829_v14 = vpop.permute.xlu0 %1828  ;;  %2688 = vtanh.f32 %v1855_v31  ;;  %v1849_v38 = vmul.f32 %v4428_v22, %v1839_v18  ;;  %v1819_v25 = vadd.f32 %v1811_v34, %v1801_v54 }
 0x257   :  { %v1840_v45 = vsel %vm3298_vm11, 0.0, %v1829_v14  ;;  %v4486_v46 = vpop.eup %2680 }
 0x258   :  { %2690 = vtanh.f32 %v1856_v49  ;;  %v1850_v24 = vmul.f32 %v4428_v22, %v1840_v45  ;;  %837 = vst [vmem:[#allocation2 + $0x29] sm:$0xff] %v4486_v46  ;;  %v1857_v37 = vadd.f32 %v1849_v38, %v1815_v21  ;;  %v1831_v41 = vpop.permute.xlu1 %1830  ;;  %v4563_v49 = vld [vmem:[#allocation2 + $0x8] sm:$0xff] }
 0x259   :  { %v4490_v15 = vpop.eup %2682  ;;  %v1841_v2 = vsel %vm3298_vm11, 0.0, %v1831_v41  ;;  %v4567_v60 = vld [vmem:[#allocation2 + $0x10] sm:$0xff]  ;;  %v4639_v45 = vld [vmem:[#allocation2 + $0x2] sm:$0xff] }
 0x25a   :  { %838 = vst [vmem:[#allocation2 + $0x31] sm:$0xff] %v4490_v15  ;;  %v1858_v23 = vadd.f32 %v1850_v24, %v1816_v13  ;;  %v1833_v7 = vpop.permute.xlu0 %1832  ;;  %2692 = vtanh.f32 %v1857_v37  ;;  %v1851_v9 = vmul.f32 %v4428_v22, %v1841_v2  ;;  %v4643_v30 = vld [vmem:[#allocation2 + $0xa] sm:$0xff] }
 0x25b   :  { %v1842_v47 = vsel %vm3298_vm11, 0.0, %v1833_v7  ;;  %v4502_v0 = vpop.eup %2684  ;;  %v4571_v21 = vld [vmem:[#allocation2 + $0x18] sm:$0xff] }
 0x25c   :  { %2694 = vtanh.f32 %v1858_v23  ;;  %v1852_v26 = vmul.f32 %v4428_v22, %v1842_v47  ;;  %839 = vst [vmem:[#allocation2 + $0x39] sm:$0xff] %v4502_v0  ;;  %v1859_v57 = vadd.f32 %v1851_v9, %v1817_v51  ;;  %v1835_v28 = vpop.permute.xlu1 %1834  ;;  %v4647_v58 = vld [vmem:[#allocation2 + $0x12] sm:$0xff] }
 0x25d   :  { %v1843_v55 = vsel %vm3298_vm11, 0.0, %v1835_v28  ;;  %v4575_v18 = vld [vmem:[#allocation2 + $0x20] sm:$0xff] }
 0x25e   :  { %v1860_v6 = vadd.f32 %v1852_v26, %v1818_v40  ;;  %2696 = vtanh.f32 %v1859_v57  ;;  %v1853_v44 = vmul.f32 %v4428_v22, %v1843_v55  ;;  %v4651_v13 = vld [vmem:[#allocation2 + $0x1a] sm:$0xff] }
 0x25f   :  { %v4579_v14 = vld [vmem:[#allocation2 + $0x28] sm:$0xff] }
 0x260   :  { %2698 = vtanh.f32 %v1860_v6  ;;  %v1861_v33 = vadd.f32 %v1853_v44, %v1819_v25  ;;  %v4655_v24 = vld [vmem:[#allocation2 + $0x22] sm:$0xff] }
 0x261   :  { %v4511_v62 = vpop.eup %2686  ;;  %v4583_v36 = vld [vmem:[#allocation2 + $0x30] sm:$0xff] }
 0x262   :  { %1870 = vst [vmem:[#allocation3 + $0x1] sm:$0xff] %v4511_v62  ;;  %2700 = vtanh.f32 %v1861_v33  ;;  %v4661_v37 = vld [vmem:[#allocation2 + $0x2a] sm:$0xff] }
 0x263   :  { %v4514_v5 = vpop.eup %2688  ;;  %v4587_v38 = vld [vmem:[#allocation2 + $0x38] sm:$0xff] }
 0x264   :  { %1871 = vst [vmem:[#allocation3 + $0x9] sm:$0xff] %v4514_v5  ;;  %v4665_v41 = vld [vmem:[#allocation2 + $0x32] sm:$0xff]  ;;  %v4673_v51 = vld [vmem:[#allocation2 + $0x3a] sm:$0xff] }
 0x265   :  { %v4516_v53 = vpop.eup %2690  ;;  %6658 = vst [vmem:[#allocation34_spill] sm:$0xff] %v4665_v41  ;;  %6661 = vst [vmem:[#allocation39_spill] sm:$0xff] %v4673_v51 }
 0x266   :  { %1872 = vst [vmem:[#allocation3 + $0x11] sm:$0xff] %v4516_v53 }
 0x267   :  { %v4520_v17 = vpop.eup %2692 }
 0x268   :  { %1873 = vst [vmem:[#allocation3 + $0x19] sm:$0xff] %v4520_v17 }
 0x269   :  { %v4522_v63 = vpop.eup %2694  ;;  %v2208_v22 = vld [vmem:[#allocation3] sm:$0xff] }
 0x26a   :  { %1874 = vst [vmem:[#allocation3 + $0x21] sm:$0xff] %v4522_v63  ;;  %2216 = vrot.lane.b32.xlu0 %v2208_v22, %s2840_s1 }
 0x26b   :  { %v4527_v50 = vpop.eup %2696  ;;  %v2209_v39 = vld [vmem:[#allocation3 + $0x8] sm:$0xff] }
 0x26c   :  { %1875 = vst [vmem:[#allocation3 + $0x29] sm:$0xff] %v4527_v50  ;;  %2218 = vrot.lane.b32.xlu1 %v2209_v39, %s2840_s1 }
 0x26d   :  { %v4529_v48 = vpop.eup %2698  ;;  %v2210_v59 = vld [vmem:[#allocation3 + $0x10] sm:$0xff] }
 0x26e   :  { %1876 = vst [vmem:[#allocation3 + $0x31] sm:$0xff] %v4529_v48  ;;  %2220 = vrot.lane.b32.xlu0 %v2210_v59, %s2840_s1 }
 0x26f   :  { %v4535_v29 = vpop.eup %2700  ;;  %v2211_v56 = vld [vmem:[#allocation3 + $0x18] sm:$0xff] }
 0x270   :  { %1877 = vst [vmem:[#allocation3 + $0x39] sm:$0xff] %v4535_v29  ;;  %2222 = vrot.lane.b32.xlu1 %v2211_v56, %s2840_s1 }
 0x271   :  { %v2212_v10 = vld [vmem:[#allocation3 + $0x20] sm:$0xff] }
 0x272   :  { %2224 = vrot.lane.b32.xlu0 %v2212_v10, %s2840_s1 }
 0x273   :  { %v2213_v19 = vld [vmem:[#allocation3 + $0x28] sm:$0xff] }
 0x274   :  { %2226 = vrot.lane.b32.xlu1 %v2213_v19, %s2840_s1 }
 0x275   :  { %v2214_v31 = vld [vmem:[#allocation3 + $0x30] sm:$0xff] }
 0x276   :  { %2228 = vrot.lane.b32.xlu0 %v2214_v31, %s2840_s1 }
 0x277   :  { %v2215_v4 = vld [vmem:[#allocation3 + $0x38] sm:$0xff] }
 0x278   :  { %2230 = vrot.lane.b32.xlu1 %v2215_v4, %s2840_s1 }
 0x27a   :  { %2276 = vrot.lane.b32.xlu0 %v2208_v22, %s2841_s21  ;;  %v2430_v22 = vld [vmem:[#allocation3 + $0x12] sm:$0xff] }
 0x27c   :  { %2278 = vrot.lane.b32.xlu1 %v2209_v39, %s2841_s21 }
 0x27e   :  { %2280 = vrot.lane.b32.xlu0 %v2210_v59, %s2841_s21  ;;  %v2432_v59 = vld [vmem:[#allocation3 + $0x22] sm:$0xff] }
 0x280   :  { %2282 = vrot.lane.b32.xlu1 %v2211_v56, %s2841_s21 }
 0x282   :  { %2284 = vrot.lane.b32.xlu0 %v2212_v10, %s2841_s21  ;;  %v2433_v10 = vld [vmem:[#allocation3 + $0x2a] sm:$0xff] }
 0x284   :  { %2286 = vrot.lane.b32.xlu1 %v2213_v19, %s2841_s21  ;;  %v2434_v19 = vld [vmem:[#allocation3 + $0x32] sm:$0xff] }
 0x286   :  { %2288 = vrot.lane.b32.xlu0 %v2214_v31, %s2841_s21 }
 0x288   :  { %2290 = vrot.lane.b32.xlu1 %v2215_v4, %s2841_s21 }
 0x28a   :  { %2326 = vrot.lane.b32.xlu0 %v4511_v62, %s2840_s1 }
 0x28c   :  { %2328 = vrot.lane.b32.xlu1 %v4514_v5, %s2840_s1 }
 0x28e   :  { %2330 = vrot.lane.b32.xlu0 %v4516_v53, %s2840_s1 }
 0x290   :  { %2332 = vrot.lane.b32.xlu1 %v4520_v17, %s2840_s1 }
 0x292   :  { %848 = vrot.lane.b32.xlu0 %v4559_v12, %s2840_s1 }
 0x294   :  { %850 = vrot.lane.b32.xlu1 %v4563_v49, %s2840_s1 }
 0x296   :  { %852 = vrot.lane.b32.xlu0 %v4567_v60, %s2840_s1 }
 0x298   :  { %854 = vrot.lane.b32.xlu1 %v4571_v21, %s2840_s1 }
 0x29a   :  { %856 = vrot.lane.b32.xlu0 %v4575_v18, %s2840_s1 }
 0x29c   :  { %858 = vrot.lane.b32.xlu1 %v4579_v14, %s2840_s1 }
 0x29e   :  { %860 = vrot.lane.b32.xlu0 %v4583_v36, %s2840_s1 }
 0x2a0   :  { %862 = vrot.lane.b32.xlu1 %v4587_v38, %s2840_s1 }
 0x2a2   :  { %908 = vrot.lane.b32.xlu0 %v4559_v12, %s2841_s21 }
 0x2a4   :  { %910 = vrot.lane.b32.xlu1 %v4563_v49, %s2841_s21 }
 0x2a6   :  { %912 = vrot.lane.b32.xlu0 %v4567_v60, %s2841_s21 }
 0x2a8   :  { %914 = vrot.lane.b32.xlu1 %v4571_v21, %s2841_s21 }
 0x2aa   :  { %916 = vrot.lane.b32.xlu0 %v4575_v18, %s2841_s21 }
 0x2ac   :  { %918 = vrot.lane.b32.xlu1 %v4579_v14, %s2841_s21 }
 0x2ae   :  { %920 = vrot.lane.b32.xlu0 %v4583_v36, %s2841_s21 }
 0x2b0   :  { %922 = vrot.lane.b32.xlu1 %v4587_v38, %s2841_s21 }
 0x2b2   :  { %958 = vrot.lane.b32.xlu0 %v4423_v52, %s2840_s1 }
 0x2b4   :  { %960 = vrot.lane.b32.xlu1 %v4442_v43, %s2840_s1 }
 0x2b6   :  { %962 = vrot.lane.b32.xlu0 %v4448_v1, %s2840_s1 }
 0x2b8   :  { %964 = vrot.lane.b32.xlu1 %v4466_v20, %s2840_s1 }
 0x2ba   :  { %966 = vrot.lane.b32.xlu0 %v4472_v11, %s2840_s1 }
 0x2bc   :  { %968 = vrot.lane.b32.xlu1 %v4486_v46, %s2840_s1 }
 0x2be   :  { %970 = vrot.lane.b32.xlu0 %v4490_v15, %s2840_s1 }
 0x2c0   :  { %972 = vrot.lane.b32.xlu1 %v4502_v0, %s2840_s1 }
 0x2c2   :  { %1018 = vrot.lane.b32.xlu0 %v4423_v52, %s2841_s21 }
 0x2c4   :  { %1020 = vrot.lane.b32.xlu1 %v4442_v43, %s2841_s21 }
 0x2c6   :  { %1022 = vrot.lane.b32.xlu0 %v4448_v1, %s2841_s21 }
 0x2c8   :  { %1024 = vrot.lane.b32.xlu1 %v4466_v20, %s2841_s21 }
 0x2ca   :  { %1026 = vrot.lane.b32.xlu0 %v4472_v11, %s2841_s21 }
 0x2cc   :  { %1028 = vrot.lane.b32.xlu1 %v4486_v46, %s2841_s21 }
 0x2ce   :  { %1030 = vrot.lane.b32.xlu0 %v4490_v15, %s2841_s21 }
 0x2d0   :  { %1032 = vrot.lane.b32.xlu1 %v4502_v0, %s2841_s21 }
 0x2d2   :  { %1068 = vrot.lane.b32.xlu0 %v4639_v45, %s2840_s1 }
 0x2d4   :  { %1070 = vrot.lane.b32.xlu1 %v4643_v30, %s2840_s1 }
 0x2d6   :  { %1072 = vrot.lane.b32.xlu0 %v4647_v58, %s2840_s1 }
 0x2d8   :  { %1074 = vrot.lane.b32.xlu1 %v4651_v13, %s2840_s1 }
 0x2da   :  { %1076 = vrot.lane.b32.xlu0 %v4655_v24, %s2840_s1 }
 0x2dc   :  { %v4659_v16 = vpop.permute.xlu0 %2216  ;;  %1078 = vrot.lane.b32.xlu1 %v4661_v37, %s2840_s1 }
 0x2dd   :  { %6657 = vst [vmem:[#allocation38_spill] sm:$0xff] %v4659_v16 }
 0x2de   :  { %1080 = vrot.lane.b32.xlu0 %v4665_v41, %s2840_s1  ;;  %v4669_v23 = vpop.permute.xlu1 %2218 }
 0x2df   :  { %6659 = vst [vmem:[#allocation37_spill] sm:$0xff] %v4669_v23 }
 0x2e0   :  { %v4671_v35 = vpop.permute.xlu0 %2220  ;;  %1082 = vrot.lane.b32.xlu1 %v4673_v51, %s2840_s1 }
 0x2e1   :  { %6660 = vst [vmem:[#allocation13_spill] sm:$0xff] %v4671_v35 }
 0x2e2   :  { %1128 = vrot.lane.b32.xlu0 %v4639_v45, %s2841_s21  ;;  %v4679_v2 = vpop.permute.xlu1 %2222 }
 0x2e3   :  { %6662 = vst [vmem:[#allocation32_spill] sm:$0xff] %v4679_v2 }
 0x2e4   :  { %v4681_v3 = vpop.permute.xlu0 %2224  ;;  %1130 = vrot.lane.b32.xlu1 %v4643_v30, %s2841_s21 }
 0x2e5   :  { %6663 = vst [vmem:[#allocation27_spill] sm:$0xff] %v4681_v3 }
 0x2e6   :  { %1132 = vrot.lane.b32.xlu0 %v4647_v58, %s2841_s21  ;;  %v4687_v61 = vpop.permute.xlu1 %2226 }
 0x2e7   :  { %6664 = vst [vmem:[#allocation29_spill] sm:$0xff] %v4687_v61 }
 0x2e8   :  { %v4689_v42 = vpop.permute.xlu0 %2228  ;;  %1134 = vrot.lane.b32.xlu1 %v4651_v13, %s2841_s21 }
 0x2e9   :  { %6665 = vst [vmem:[#allocation49_spill] sm:$0xff] %v4689_v42 }
 0x2ea   :  { %1136 = vrot.lane.b32.xlu0 %v4655_v24, %s2841_s21  ;;  %v4695_v7 = vpop.permute.xlu1 %2230 }
 0x2eb   :  { %6666 = vst [vmem:[#allocation50_spill] sm:$0xff] %v4695_v7 }
 0x2ec   :  { %v4697_v54 = vpop.permute.xlu0 %2276  ;;  %1138 = vrot.lane.b32.xlu1 %v4661_v37, %s2841_s21 }
 0x2ed   :  { %6667 = vst [vmem:[#allocation16_spill] sm:$0xff] %v4697_v54 }
 0x2ee   :  { %1140 = vrot.lane.b32.xlu0 %v4665_v41, %s2841_s21  ;;  %v4703_v9 = vpop.permute.xlu1 %2278  ;;  %v933_v41 = vstv %s4811_s25  ;;  %s6198_s25 = sld [smem:[#allocation4 + $0x2b]] }
 0x2ef   :  { %6668 = vst [vmem:[#allocation17_spill] sm:$0xff] %v4703_v9 }
 0x2f0   :  { %v4705_v47 = vpop.permute.xlu0 %2280  ;;  %1142 = vrot.lane.b32.xlu1 %v4673_v51, %s2841_s21 }
 0x2f1   :  { %6669 = vst [vmem:[#allocation51_spill] sm:$0xff] %v4705_v47 }
 0x2f2   :  { %2334 = vrot.lane.b32.xlu0 %v4522_v63, %s2840_s1  ;;  %v4711_v40 = vpop.permute.xlu1 %2282 }
 0x2f3   :  { %6670 = vst [vmem:[#allocation18_spill] sm:$0xff] %v4711_v40 }
 0x2f4   :  { %v4713_v26 = vpop.permute.xlu0 %2284  ;;  %2336 = vrot.lane.b32.xlu1 %v4527_v50, %s2840_s1 }
 0x2f5   :  { %6671 = vst [vmem:[#allocation19_spill] sm:$0xff] %v4713_v26  ;;  %v891_v26 = vstv %s2602_s22  ;;  %s6043_s22 = sld [smem:[#allocation4 + $0x3e]] }
 0x2f6   :  { %2338 = vrot.lane.b32.xlu0 %v4529_v48, %s2840_s1  ;;  %v4719_v27 = vpop.permute.xlu1 %2286  ;;  %v893_v3 = vmul.f32 %v891_v26, %v4563_v49  ;;  %v897_v35 = vmul.f32 %v891_v26, %v4579_v14 }
 0x2f7   :  { %6672 = vst [vmem:[#allocation52_spill] sm:$0xff] %v4719_v27 }
 0x2f8   :  { %v4721_v34 = vpop.permute.xlu0 %2288  ;;  %2340 = vrot.lane.b32.xlu1 %v4535_v29, %s2840_s1 }
 0x2f9   :  { %6673 = vst [vmem:[#allocation40_spill] sm:$0xff] %v4721_v34 }
 0x2fa   :  { %2386 = vrot.lane.b32.xlu0 %v4511_v62, %s2841_s21  ;;  %v4727_v57 = vpop.permute.xlu1 %2290 }
 0x2fb   :  { %6674 = vst [vmem:[#allocation53_spill] sm:$0xff] %v4727_v57 }
 0x2fc   :  { %v4729_v28 = vpop.permute.xlu0 %2326  ;;  %2388 = vrot.lane.b32.xlu1 %v4514_v5, %s2841_s21  ;;  %v2428_v5 = vld [vmem:[#allocation3 + $0x2] sm:$0xff] }
 0x2fd   :  { %6675 = vst [vmem:[#allocation56_spill] sm:$0xff] %v4729_v28 }
 0x2fe   :  { %2390 = vrot.lane.b32.xlu0 %v4516_v53, %s2841_s21  ;;  %v4735_v6 = vpop.permute.xlu1 %2328 }
 0x2ff   :  { %6676 = vst [vmem:[#allocation14_spill] sm:$0xff] %v4735_v6 }
 0x300   :  { %v4737_v55 = vpop.permute.xlu0 %2330  ;;  %2392 = vrot.lane.b32.xlu1 %v4520_v17, %s2841_s21 }
 0x301   :  { %6677 = vst [vmem:[#allocation54_spill] sm:$0xff] %v4737_v55 }
 0x302   :  { %2394 = vrot.lane.b32.xlu0 %v4522_v63, %s2841_s21  ;;  %v4743_v25 = vpop.permute.xlu1 %2332  ;;  %v2429_v63 = vld [vmem:[#allocation3 + $0xa] sm:$0xff] }
 0x303   :  { %6678 = vst [vmem:[#allocation57_spill] sm:$0xff] %v4743_v25  ;;  %v2435_v25 = vld [vmem:[#allocation3 + $0x3a] sm:$0xff] }
 0x304   :  { %v4745_v44 = vpop.permute.xlu0 %848  ;;  %2396 = vrot.lane.b32.xlu1 %v4527_v50, %s2841_s21 }
 0x305   :  { %v864_v2 = vsel %vm3191_vm6, 0.0, %v4745_v44 }
 0x306   :  { %2398 = vrot.lane.b32.xlu0 %v4529_v48, %s2841_s21  ;;  %v4751_v62 = vpop.permute.xlu1 %850  ;;  %v2431_v48 = vld [vmem:[#allocation3 + $0x1a] sm:$0xff] }
 0x307   :  { %v865_v49 = vsel %vm3191_vm6, 0.0, %v4751_v62 }
 0x308   :  { %v4753_v33 = vpop.permute.xlu0 %852  ;;  %2400 = vrot.lane.b32.xlu1 %v4535_v29, %s2841_s21 }
 0x30a   :  { %2436 = vrot.lane.b32.xlu0 %v2428_v5, %s2840_s1  ;;  %v4758_v53 = vpop.permute.xlu1 %854 }
 0x30c   :  { %v4760_v17 = vpop.permute.xlu0 %856  ;;  %2438 = vrot.lane.b32.xlu1 %v2429_v63, %s2840_s1 }
 0x30d   :  { %v868_v44 = vsel %vm3191_vm6, 0.0, %v4760_v17 }
 0x30e   :  { %2440 = vrot.lane.b32.xlu0 %v2430_v22, %s2840_s1  ;;  %v4764_v50 = vpop.permute.xlu1 %858 }
 0x310   :  { %v4766_v39 = vpop.permute.xlu0 %860  ;;  %2442 = vrot.lane.b32.xlu1 %v2431_v48, %s2840_s1 }
 0x312   :  { %2444 = vrot.lane.b32.xlu0 %v2432_v59, %s2840_s1  ;;  %v4770_v29 = vpop.permute.xlu1 %862 }
 0x314   :  { %v4772_v56 = vpop.permute.xlu0 %908  ;;  %2446 = vrot.lane.b32.xlu1 %v2433_v10, %s2840_s1 }
 0x316   :  { %2448 = vrot.lane.b32.xlu0 %v2434_v19, %s2840_s1  ;;  %v4776_v31 = vpop.permute.xlu1 %910 }
 0x318   :  { %v4778_v4 = vpop.permute.xlu0 %912  ;;  %2450 = vrot.lane.b32.xlu1 %v2435_v25, %s2840_s1 }
 0x31a   :  { %2496 = vrot.lane.b32.xlu0 %v2428_v5, %s2841_s21  ;;  %v4782_v55 = vpop.permute.xlu1 %914 }
 0x31c   :  { %v4784_v6 = vpop.permute.xlu0 %916  ;;  %2498 = vrot.lane.b32.xlu1 %v2429_v63, %s2841_s21 }
 0x31e   :  { %2500 = vrot.lane.b32.xlu0 %v2430_v22, %s2841_s21  ;;  %v4788_v28 = vpop.permute.xlu1 %918 }
 0x320   :  { %v4790_v19 = vpop.permute.xlu0 %920  ;;  %2502 = vrot.lane.b32.xlu1 %v2431_v48, %s2841_s21 }
 0x322   :  { %2504 = vrot.lane.b32.xlu0 %v2432_v59, %s2841_s21  ;;  %v4794_v57 = vpop.permute.xlu1 %922  ;;  %v1001_v59 = vstv %s2605_s20  ;;  %s5912_s20 = sld [smem:[#allocation4 + $0x3c]] }
 0x323   :  { %v4818_v40 = vmul.f32 %v4423_v52, %v1001_v59  ;;  %v4821_v47 = vmul.f32 %v4442_v43, %v1001_v59  ;;  %v4824_v9 = vmul.f32 %v4448_v1, %v1001_v59  ;;  %v4831_v7 = vmul.f32 %v4466_v20, %v1001_v59 }
 0x324   :  { %v4796_v25 = vpop.permute.xlu0 %958  ;;  %2506 = vrot.lane.b32.xlu1 %v2433_v10, %s2841_s21  ;;  %v4815_v10 = vstv %s2608_s23  ;;  %v4834_v42 = vmul.f32 %v4472_v11, %v1001_v59  ;;  %v4837_v61 = vmul.f32 %v4486_v46, %v1001_v59  ;;  %v892_v52 = vmul.f32 %v891_v26, %v4559_v12  ;;  %s6167_s23 = sld [smem:[#allocation4 + $0x29]] }
 0x325   :  { %6679 = vst [vmem:[#allocation62_spill] sm:$0xff] %v4815_v10  ;;  %v4845_v1 = vmul.f32 %v4490_v15, %v1001_v59  ;;  %v894_v20 = vmul.f32 %v891_v26, %v4567_v60  ;;  %v4851_v11 = vmul.f32 %v4815_v10, %v4639_v45  ;;  %v4856_v46 = vmul.f32 %v4502_v0, %v1001_v59 }
 0x326   :  { %v4799_v5 = vpop.permute.xlu1 %960  ;;  %v873_v12 = vstv %s2601_s24  ;;  %v4863_v15 = vmul.f32 %v4815_v10, %v4643_v30  ;;  %v866_v60 = vsel %vm3191_vm6, 0.0, %v4753_v33  ;;  %v895_v0 = vmul.f32 %v891_v26, %v4571_v21  ;;  %s6182_s24 = sld [smem:[#allocation4 + $0x2a]] }
 0x327   :  { %6680 = vst [vmem:[#allocation63_spill] sm:$0xff] %v4856_v46  ;;  %v867_v45 = vsel %vm3191_vm6, 0.0, %v4758_v53  ;;  %v896_v30 = vmul.f32 %v891_v26, %v4575_v18  ;;  %v4885_v33 = vmul.f32 %v4815_v10, %v4647_v58  ;;  %v4889_v21 = vmul.f32 %v4815_v10, %v4651_v13 }
 0x328   :  { %v4801_v63 = vpop.permute.xlu0 %962  ;;  %6681 = vst [vmem:[#allocation66_spill] sm:$0xff] %v4863_v15  ;;  %v874_v53 = vmul.f32 %v873_v12, %v864_v2  ;;  %v869_v18 = vsel %vm3191_vm6, 0.0, %v4764_v50  ;;  %v4897_v17 = vmul.f32 %v4815_v10, %v4655_v24  ;;  %v875_v23 = vmul.f32 %v873_v12, %v865_v49 }
 0x329   :  { %6682 = vst [vmem:[#allocation67_spill] sm:$0xff] %v4885_v33  ;;  %6683 = vst [vmem:[#allocation68_spill] sm:$0xff] %v4889_v21  ;;  %v876_v58 = vmul.f32 %v873_v12, %v866_v60  ;;  %v877_v16 = vmul.f32 %v873_v12, %v867_v45  ;;  %v898_v13 = vmul.f32 %v891_v26, %v4583_v36  ;;  %v870_v24 = vsel %vm3191_vm6, 0.0, %v4766_v39 }
 0x32a   :  { %v4803_v22 = vpop.permute.xlu1 %964  ;;  %6684 = vst [vmem:[#allocation70_spill] sm:$0xff] %v4897_v17  ;;  %v878_v51 = vmul.f32 %v873_v12, %v868_v44  ;;  %v899_v2 = vmul.f32 %v891_v26, %v4587_v38  ;;  %v4906_v50 = vmul.f32 %v4815_v10, %v4661_v37  ;;  %v879_v21 = vmul.f32 %v873_v12, %v869_v18 }
 0x32b   :  { %v4912_v49 = vstv %s4813_s26  ;;  %v4915_v60 = vstv %s4828_s27  ;;  %v900_v45 = vadd.f32 %v892_v52, %v874_v53  ;;  %v924_v38 = vsel %vm3298_vm11, 0.0, %v4772_v56  ;;  %s6230_s26 = sld [smem:[#allocation4 + $0x2c]] }
 0x32c   :  { %v4805_v34 = vpop.permute.xlu0 %966  ;;  %6685 = vst [vmem:[#allocation69_spill] sm:$0xff] %v4906_v50  ;;  %v4923_v26 = vstv %s4842_s28  ;;  %v4926_v37 = vstv %s4853_s29  ;;  %v901_v44 = vadd.f32 %v893_v3, %v875_v23  ;;  %v902_v18 = vadd.f32 %v894_v20, %v876_v58 }
 0x32d   :  { %v903_v10 = vadd.f32 %v895_v0, %v877_v16  ;;  %v925_v39 = vsel %vm3298_vm11, 0.0, %v4776_v31  ;;  %v904_v50 = vadd.f32 %v896_v30, %v878_v51  ;;  %v880_v17 = vmul.f32 %v873_v12, %v870_v24 }
 0x32e   :  { %v4807_v48 = vpop.permute.xlu1 %968  ;;  %v871_v52 = vsel %vm3191_vm6, 0.0, %v4770_v29  ;;  %v926_v56 = vsel %vm3298_vm11, 0.0, %v4778_v4  ;;  %v905_v46 = vadd.f32 %v897_v35, %v879_v21  ;;  %v934_v23 = vmul.f32 %v933_v41, %v924_v38 }
 0x32f   :  { %v974_v16 = vsel %vm3191_vm6, 0.0, %v4796_v25  ;;  %v975_v51 = vsel %vm3191_vm6, 0.0, %v4799_v5  ;;  %v935_v31 = vmul.f32 %v933_v41, %v925_v39  ;;  %v927_v29 = vsel %vm3298_vm11, 0.0, %v4782_v55 }
 0x330   :  { %v4809_v27 = vpop.permute.xlu0 %970  ;;  %v928_v35 = vsel %vm3298_vm11, 0.0, %v4784_v6  ;;  %v976_v4 = vsel %vm3191_vm6, 0.0, %v4801_v63  ;;  %v881_v25 = vmul.f32 %v873_v12, %v871_v52  ;;  %v936_v20 = vmul.f32 %v933_v41, %v926_v56 }
 0x331   :  { %v929_v5 = vsel %vm3298_vm11, 0.0, %v4788_v28  ;;  %v930_v0 = vsel %vm3298_vm11, 0.0, %v4790_v19  ;;  %v931_v55 = vsel %vm3298_vm11, 0.0, %v4794_v57  ;;  %v984_v6 = vmul.f32 %v4912_v49, %v974_v16 }
 0x332   :  { %v4826_v54 = vpop.permute.xlu1 %972  ;;  %v985_v30 = vmul.f32 %v4912_v49, %v975_v51  ;;  %v977_v63 = vsel %vm3191_vm6, 0.0, %v4803_v22  ;;  %v906_v21 = vadd.f32 %v898_v13, %v880_v17  ;;  %v937_v28 = vmul.f32 %v933_v41, %v927_v29 }
 0x333   :  { %v938_v58 = vmul.f32 %v933_v41, %v928_v35  ;;  %v986_v24 = vmul.f32 %v4912_v49, %v976_v4  ;;  %v942_v38 = vadd.f32 %v934_v23, %v900_v45  ;;  %v943_v39 = vadd.f32 %v935_v31, %v901_v44 }
 0x334   :  { %v4840_v43 = vpop.permute.xlu0 %1018  ;;  %v939_v52 = vmul.f32 %v933_v41, %v929_v5  ;;  %v940_v57 = vmul.f32 %v933_v41, %v930_v0  ;;  %v944_v56 = vadd.f32 %v936_v20, %v902_v18  ;;  %v941_v16 = vmul.f32 %v933_v41, %v931_v55 }
 0x335   :  { %v987_v51 = vmul.f32 %v4912_v49, %v977_v63  ;;  %v978_v22 = vsel %vm3191_vm6, 0.0, %v4805_v34  ;;  %v907_v33 = vadd.f32 %v899_v2, %v881_v25  ;;  %v992_v15 = vadd.f32 %v984_v6, %v942_v38 }
 0x336   :  { %v4875_v59 = vpop.permute.xlu1 %1020  ;;  %v993_v17 = vadd.f32 %v985_v30, %v943_v39  ;;  %v979_v13 = vsel %vm3191_vm6, 0.0, %v4807_v48  ;;  %v945_v45 = vadd.f32 %v937_v28, %v903_v10  ;;  %v946_v44 = vadd.f32 %v938_v58, %v904_v50 }
 0x337   :  { %v994_v23 = vadd.f32 %v986_v24, %v944_v56  ;;  %v980_v41 = vsel %vm3191_vm6, 0.0, %v4809_v27  ;;  %v947_v31 = vadd.f32 %v939_v52, %v905_v46  ;;  %v948_v35 = vadd.f32 %v940_v57, %v906_v21 }
 0x338   :  { %v4881_v62 = vpop.permute.xlu0 %1022  ;;  %v988_v34 = vmul.f32 %v4912_v49, %v978_v22  ;;  %v1034_v2 = vsel %vm3298_vm11, 0.0, %v4840_v43  ;;  %v949_v4 = vadd.f32 %v941_v16, %v907_v33  ;;  %v995_v25 = vadd.f32 %v987_v51, %v945_v45 }
 0x339   :  { %v989_v48 = vmul.f32 %v4912_v49, %v979_v13  ;;  %v1035_v10 = vsel %vm3298_vm11, 0.0, %v4875_v59  ;;  %v990_v50 = vmul.f32 %v4912_v49, %v980_v41  ;;  %v1010_v27 = vadd.f32 %v4818_v40, %v992_v15 }
 0x33a   :  { %v4902_v14 = vpop.permute.xlu1 %1024  ;;  %v1011_v46 = vadd.f32 %v4821_v47, %v993_v17  ;;  %v1044_v43 = vmul.f32 %v4915_v60, %v1034_v2  ;;  %v1012_v33 = vadd.f32 %v4824_v9, %v994_v23  ;;  %v1036_v0 = vsel %vm3298_vm11, 0.0, %v4881_v62 }
 0x33b   :  { %v996_v6 = vadd.f32 %v988_v34, %v946_v44  ;;  %v981_v47 = vsel %vm3191_vm6, 0.0, %v4826_v54  ;;  %v1045_v40 = vmul.f32 %v4915_v60, %v1035_v10  ;;  %v1037_v15 = vsel %vm3298_vm11, 0.0, %v4902_v14 }
 0x33c   :  { %v4917_v36 = vpop.permute.xlu0 %1026  ;;  %v997_v9 = vadd.f32 %v989_v48, %v947_v31  ;;  %v1013_v30 = vadd.f32 %v4831_v7, %v995_v25  ;;  %v998_v21 = vadd.f32 %v990_v50, %v948_v35  ;;  %v1046_v28 = vmul.f32 %v4915_v60, %v1036_v0 }
 0x33d   :  { %v1038_v54 = vsel %vm3298_vm11, 0.0, %v4917_v36  ;;  %v991_v14 = vmul.f32 %v4912_v49, %v981_v47  ;;  %v1047_v7 = vmul.f32 %v4915_v60, %v1037_v15  ;;  %v1053_v52 = vadd.f32 %v1045_v40, %v1011_v46 }
 0x33e   :  { %v4937_v53 = vpop.permute.xlu1 %1028  ;;  %v1014_v57 = vadd.f32 %v4834_v42, %v996_v6  ;;  %v1048_v16 = vmul.f32 %v4915_v60, %v1038_v54  ;;  %v1015_v49 = vadd.f32 %v4837_v61, %v997_v9  ;;  %v1054_v17 = vadd.f32 %v1046_v28, %v1012_v33 }
 0x33f   :  { %v1039_v38 = vsel %vm3298_vm11, 0.0, %v4937_v53  ;;  %v999_v45 = vadd.f32 %v991_v14, %v949_v4  ;;  %v1055_v44 = vadd.f32 %v1047_v7, %v1013_v30  ;;  %v1016_v23 = vadd.f32 %v4845_v1, %v998_v21  ;;  %v6688_v30 = vld [vmem:[#allocation63_spill] sm:$0xff] }
 0x340   :  { %v4945_v3 = vpop.permute.xlu0 %1030  ;;  %v1049_v53 = vmul.f32 %v4915_v60, %v1039_v38  ;;  %v1056_v2 = vadd.f32 %v1048_v16, %v1014_v57 }
 0x341   :  { %v1040_v42 = vsel %vm3298_vm11, 0.0, %v4945_v3 }
 0x342   :  { %v4970_v12 = vpop.permute.xlu1 %1032  ;;  %v1050_v3 = vmul.f32 %v4915_v60, %v1040_v42  ;;  %v1057_v1 = vadd.f32 %v1049_v53, %v1015_v49  ;;  %v6692_v42 = vld [vmem:[#allocation34_spill] sm:$0xff] }
 0x343   :  { %v1041_v48 = vsel %vm3298_vm11, 0.0, %v4970_v12 }
 0x344   :  { %v1069_v19 = vpop.permute.xlu0 %1068  ;;  %v1058_v9 = vadd.f32 %v1050_v3, %v1016_v23 }
 0x345   :  { %v1084_v20 = vsel %vm3191_vm6, 0.0, %v1069_v19  ;;  %v1052_v19 = vadd.f32 %v1044_v43, %v1010_v27  ;;  %v6686_v27 = vld [vmem:[#allocation66_spill] sm:$0xff] }
 0x346   :  { %v1071_v29 = vpop.permute.xlu1 %1070  ;;  %v1094_v62 = vmul.f32 %v4923_v26, %v1084_v20 }
 0x347   :  { %v1085_v59 = vsel %vm3191_vm6, 0.0, %v1071_v29 }
 0x348   :  { %v1073_v18 = vpop.permute.xlu0 %1072  ;;  %v1095_v58 = vmul.f32 %v4923_v26, %v1085_v59  ;;  %v1102_v51 = vadd.f32 %v1094_v62, %v1052_v19  ;;  %v1017_v62 = vadd.f32 %v6688_v30, %v999_v45 }
 0x349   :  { %v1086_v63 = vsel %vm3191_vm6, 0.0, %v1073_v18 }
 0x34a   :  { %v1075_v5 = vpop.permute.xlu1 %1074  ;;  %v1096_v56 = vmul.f32 %v4923_v26, %v1086_v63  ;;  %v1103_v13 = vadd.f32 %v1095_v58, %v1053_v52  ;;  %v1120_v4 = vadd.f32 %v4851_v11, %v1102_v51  ;;  %v1051_v63 = vmul.f32 %v4915_v60, %v1041_v48  ;;  %v6690_v60 = vld [vmem:[#allocation70_spill] sm:$0xff] }
 0x34b   :  { %v1087_v36 = vsel %vm3191_vm6, 0.0, %v1075_v5 }
 0x34c   :  { %v1077_v55 = vpop.permute.xlu0 %1076  ;;  %v1097_v41 = vmul.f32 %v4923_v26, %v1087_v36  ;;  %v1104_v18 = vadd.f32 %v1096_v56, %v1054_v17  ;;  %v1121_v46 = vadd.f32 %v6686_v27, %v1103_v13  ;;  %v1059_v16 = vadd.f32 %v1051_v63, %v1017_v62  ;;  %v6691_v17 = vld [vmem:[#allocation69_spill] sm:$0xff]  ;;  %v6693_v13 = vld [vmem:[#allocation62_spill] sm:$0xff] }
 0x34d   :  { %v1088_v22 = vsel %vm3191_vm6, 0.0, %v1077_v55  ;;  %v6687_v55 = vld [vmem:[#allocation67_spill] sm:$0xff] }
 0x34e   :  { %v1079_v24 = vpop.permute.xlu1 %1078  ;;  %v1098_v31 = vmul.f32 %v4923_v26, %v1088_v22  ;;  %v1105_v20 = vadd.f32 %v1097_v41, %v1055_v44  ;;  %v1122_v6 = vadd.f32 %v6687_v55, %v1104_v18 }
 0x34f   :  { %v1089_v35 = vsel %vm3191_vm6, 0.0, %v1079_v24  ;;  %v6689_v24 = vld [vmem:[#allocation68_spill] sm:$0xff] }
 0x350   :  { %v1081_v39 = vpop.permute.xlu0 %1080  ;;  %v1099_v5 = vmul.f32 %v4923_v26, %v1089_v35  ;;  %v1106_v0 = vadd.f32 %v1098_v31, %v1056_v2  ;;  %v1123_v14 = vadd.f32 %v6689_v24, %v1105_v20  ;;  %v6694_v35 = vld [vmem:[#allocation39_spill] sm:$0xff] }
 0x351   :  { %v1090_v10 = vsel %vm3191_vm6, 0.0, %v1081_v39 }
 0x352   :  { %v1083_v29 = vpop.permute.xlu1 %1082  ;;  %v1100_v47 = vmul.f32 %v4923_v26, %v1090_v10  ;;  %v1107_v54 = vadd.f32 %v1099_v5, %v1057_v1  ;;  %v1124_v56 = vadd.f32 %v6690_v60, %v1106_v0 }
 0x353   :  { %v1091_v40 = vsel %vm3191_vm6, 0.0, %v1083_v29  ;;  %v1118_v29 = vmul.f32 %v6693_v13, %v6692_v42 }
 0x354   :  { %v1129_v61 = vpop.permute.xlu0 %1128  ;;  %v1101_v38 = vmul.f32 %v4923_v26, %v1091_v40  ;;  %v1108_v57 = vadd.f32 %v1100_v47, %v1058_v9  ;;  %v1125_v53 = vadd.f32 %v6691_v17, %v1107_v54 }
 0x355   :  { %v1144_v34 = vsel %vm3298_vm11, 0.0, %v1129_v61 }
 0x356   :  { %v1154_v25 = vmul.f32 %v4926_v37, %v1144_v34  ;;  %v1131_v50 = vpop.permute.xlu1 %1130  ;;  %v1109_v44 = vadd.f32 %v1101_v38, %v1059_v16  ;;  %v1126_v61 = vadd.f32 %v1118_v29, %v1108_v57  ;;  %v1119_v34 = vmul.f32 %v6693_v13, %v6694_v35 }
 0x357   :  { %v1145_v11 = vsel %vm3298_vm11, 0.0, %v1131_v50 }
 0x358   :  { %v1162_v43 = vadd.f32 %v1154_v25, %v1120_v4  ;;  %v1133_v33 = vpop.permute.xlu0 %1132  ;;  %v1155_v59 = vmul.f32 %v4926_v37, %v1145_v11  ;;  %v1127_v25 = vadd.f32 %v1119_v34, %v1109_v44 }
 0x359   :  { %v1146_v12 = vsel %vm3298_vm11, 0.0, %v1133_v33 }
 0x35a   :  { %2702 = vtanh.f32 %v1162_v43  ;;  %v1156_v15 = vmul.f32 %v4926_v37, %v1146_v12  ;;  %v1163_v21 = vadd.f32 %v1155_v59, %v1121_v46  ;;  %v1135_v28 = vpop.permute.xlu1 %1134 }
 0x35b   :  { %v1147_v19 = vsel %vm3298_vm11, 0.0, %v1135_v28 }
 0x35c   :  { %v1164_v58 = vadd.f32 %v1156_v15, %v1122_v6  ;;  %v1137_v7 = vpop.permute.xlu0 %1136  ;;  %2704 = vtanh.f32 %v1163_v21  ;;  %v1157_v39 = vmul.f32 %v4926_v37, %v1147_v19 }
 0x35d   :  { %v1148_v52 = vsel %vm3298_vm11, 0.0, %v1137_v7 }
 0x35e   :  { %2706 = vtanh.f32 %v1164_v58  ;;  %v1158_v36 = vmul.f32 %v4926_v37, %v1148_v52  ;;  %v1165_v49 = vadd.f32 %v1157_v39, %v1123_v14  ;;  %v1139_v51 = vpop.permute.xlu1 %1138 }
 0x35f   :  { %v1149_v26 = vsel %vm3298_vm11, 0.0, %v1139_v51 }
 0x360   :  { %v1166_v22 = vadd.f32 %v1158_v36, %v1124_v56  ;;  %v1141_v45 = vpop.permute.xlu0 %1140  ;;  %2708 = vtanh.f32 %v1165_v49  ;;  %v1159_v23 = vmul.f32 %v4926_v37, %v1149_v26 }
 0x361   :  { %v1150_v41 = vsel %vm3298_vm11, 0.0, %v1141_v45 }
 0x362   :  { %2710 = vtanh.f32 %v1166_v22  ;;  %v1160_v18 = vmul.f32 %v4926_v37, %v1150_v41  ;;  %v1167_v31 = vadd.f32 %v1159_v23, %v1125_v53  ;;  %v1143_v2 = vpop.permute.xlu1 %1142 }
 0x363   :  { %v1151_v4 = vsel %vm3298_vm11, 0.0, %v1143_v2 }
 0x364   :  { %v1168_v3 = vadd.f32 %v1160_v18, %v1126_v61  ;;  %2712 = vtanh.f32 %v1167_v31  ;;  %v1161_v1 = vmul.f32 %v4926_v37, %v1151_v4  ;;  %v5166_v40 = vpop.permute.xlu0 %2334 }
 0x366   :  { %2714 = vtanh.f32 %v1168_v3  ;;  %v1169_v10 = vadd.f32 %v1161_v1, %v1127_v25  ;;  %v5172_v15 = vpop.permute.xlu1 %2336 }
 0x367   :  { %v5088_v48 = vpop.eup %2702 }
 0x368   :  { %1178 = vst [vmem:[#allocation2 + $0x1] sm:$0xff] %v5088_v48  ;;  %2716 = vtanh.f32 %v1169_v10  ;;  %v5176_v9 = vpop.permute.xlu0 %2338  ;;  %v5296_v10 = vstv %s2614_s30 }
 0x369   :  { %v5091_v50 = vpop.eup %2704 }
 0x36a   :  { %1179 = vst [vmem:[#allocation2 + $0x9] sm:$0xff] %v5091_v50  ;;  %v5180_v30 = vpop.permute.xlu1 %2340 }
 0x36b   :  { %v5093_v27 = vpop.eup %2706 }
 0x36c   :  { %1180 = vst [vmem:[#allocation2 + $0x11] sm:$0xff] %v5093_v27  ;;  %v5186_v62 = vpop.permute.xlu0 %2386 }
 0x36d   :  { %v5097_v46 = vpop.eup %2708 }
 0x36e   :  { %1181 = vst [vmem:[#allocation2 + $0x19] sm:$0xff] %v5097_v46  ;;  %v5192_v63 = vpop.permute.xlu1 %2388 }
 0x36f   :  { %v5099_v20 = vpop.eup %2710  ;;  %v5102_v37 = vld [vmem:[#allocation2] sm:$0xff] }
 0x370   :  { %1182 = vst [vmem:[#allocation2 + $0x21] sm:$0xff] %v5099_v20  ;;  %1194 = vrot.lane.b32.xlu0 %v5102_v37, %s2840_s1  ;;  %v5196_v21 = vpop.permute.xlu0 %2390 }
 0x371   :  { %v5107_v5 = vpop.eup %2712  ;;  %v5109_v43 = vld [vmem:[#allocation2 + $0x8] sm:$0xff]  ;;  %6695 = vst [vmem:[#allocation71_spill] sm:$0xff] %v5196_v21 }
 0x372   :  { %1183 = vst [vmem:[#allocation2 + $0x29] sm:$0xff] %v5107_v5  ;;  %1196 = vrot.lane.b32.xlu1 %v5109_v43, %s2840_s1  ;;  %v5200_v28 = vpop.permute.xlu1 %2392  ;;  %v5210_v58 = vld [vmem:[#allocation2 + $0x2] sm:$0xff] }
 0x373   :  { %v5111_v11 = vpop.eup %2714  ;;  %v5116_v33 = vld [vmem:[#allocation2 + $0x10] sm:$0xff]  ;;  %6696 = vst [vmem:[#allocation22_spill] sm:$0xff] %v5200_v28 }
 0x374   :  { %1184 = vst [vmem:[#allocation2 + $0x31] sm:$0xff] %v5111_v11  ;;  %1198 = vrot.lane.b32.xlu0 %v5116_v33, %s2840_s1  ;;  %v5206_v54 = vpop.permute.xlu0 %2394  ;;  %v5216_v14 = vld [vmem:[#allocation2 + $0xa] sm:$0xff] }
 0x375   :  { %v5121_v0 = vpop.eup %2716  ;;  %v5123_v59 = vld [vmem:[#allocation2 + $0x18] sm:$0xff]  ;;  %6697 = vst [vmem:[#allocation46_spill] sm:$0xff] %v5206_v54 }
 0x376   :  { %1185 = vst [vmem:[#allocation2 + $0x39] sm:$0xff] %v5121_v0  ;;  %1200 = vrot.lane.b32.xlu1 %v5123_v59, %s2840_s1  ;;  %v5214_v24 = vpop.permute.xlu1 %2396  ;;  %v5220_v19 = vld [vmem:[#allocation2 + $0x12] sm:$0xff] }
 0x377   :  { %v5128_v55 = vld [vmem:[#allocation2 + $0x20] sm:$0xff]  ;;  %6698 = vst [vmem:[#allocation21_spill] sm:$0xff] %v5214_v24 }
 0x378   :  { %1202 = vrot.lane.b32.xlu0 %v5128_v55, %s2840_s1  ;;  %v5222_v7 = vpop.permute.xlu0 %2398  ;;  %v5226_v38 = vld [vmem:[#allocation2 + $0x1a] sm:$0xff] }
 0x379   :  { %v5132_v6 = vld [vmem:[#allocation2 + $0x28] sm:$0xff]  ;;  %6699 = vst [vmem:[#allocation48_spill] sm:$0xff] %v5222_v7  ;;  %v5322_v7 = vstv %s2612_s5 }
 0x37a   :  { %1204 = vrot.lane.b32.xlu1 %v5132_v6, %s2840_s1  ;;  %v5228_v39 = vpop.permute.xlu1 %2400  ;;  %v5232_v52 = vld [vmem:[#allocation2 + $0x22] sm:$0xff] }
 0x37b   :  { %v5136_v12 = vld [vmem:[#allocation2 + $0x30] sm:$0xff]  ;;  %6700 = vst [vmem:[#allocation65_spill] sm:$0xff] %v5228_v39  ;;  %v5302_v39 = vstv %s2610_s4 }
 0x37c   :  { %1206 = vrot.lane.b32.xlu0 %v5136_v12, %s2840_s1  ;;  %v5236_v57 = vpop.permute.xlu0 %2436  ;;  %v5238_v60 = vld [vmem:[#allocation2 + $0x2a] sm:$0xff] }
 0x37d   :  { %v5140_v47 = vld [vmem:[#allocation2 + $0x38] sm:$0xff]  ;;  %6701 = vst [vmem:[#allocation41_spill] sm:$0xff] %v5236_v57 }
 0x37e   :  { %1208 = vrot.lane.b32.xlu1 %v5140_v47, %s2840_s1  ;;  %v5242_v56 = vld [vmem:[#allocation2 + $0x32] sm:$0xff]  ;;  %v5246_v36 = vpop.permute.xlu1 %2438  ;;  %v5248_v16 = vld [vmem:[#allocation2 + $0x3a] sm:$0xff] }
 0x37f   :  { %6702 = vst [vmem:[#allocation42_spill] sm:$0xff] %v5246_v36 }
 0x380   :  { %1254 = vrot.lane.b32.xlu0 %v5102_v37, %s2841_s21  ;;  %v5252_v49 = vpop.permute.xlu0 %2440 }
 0x381   :  { %6703 = vst [vmem:[#allocation23_spill] sm:$0xff] %v5252_v49 }
 0x382   :  { %1256 = vrot.lane.b32.xlu1 %v5109_v43, %s2841_s21  ;;  %v5256_v51 = vpop.permute.xlu1 %2442 }
 0x383   :  { %6704 = vst [vmem:[#allocation10_spill] sm:$0xff] %v5256_v51 }
 0x384   :  { %1258 = vrot.lane.b32.xlu0 %v5116_v33, %s2841_s21  ;;  %v5262_v22 = vpop.permute.xlu0 %2444 }
 0x385   :  { %6705 = vst [vmem:[#allocation43_spill] sm:$0xff] %v5262_v22 }
 0x386   :  { %1260 = vrot.lane.b32.xlu1 %v5123_v59, %s2841_s21  ;;  %v5268_v17 = vpop.permute.xlu1 %2446 }
 0x387   :  { %6706 = vst [vmem:[#allocation35_spill] sm:$0xff] %v5268_v17 }
 0x388   :  { %1262 = vrot.lane.b32.xlu0 %v5128_v55, %s2841_s21  ;;  %v5272_v53 = vpop.permute.xlu0 %2448 }
 0x389   :  { %6707 = vst [vmem:[#allocation24_spill] sm:$0xff] %v5272_v53 }
 0x38a   :  { %1264 = vrot.lane.b32.xlu1 %v5132_v6, %s2841_s21  ;;  %v5276_v26 = vpop.permute.xlu1 %2450 }
 0x38b   :  { %6708 = vst [vmem:[#allocation28_spill] sm:$0xff] %v5276_v26  ;;  %v5300_v26 = vstv %s2611_s3 }
 0x38c   :  { %1266 = vrot.lane.b32.xlu0 %v5136_v12, %s2841_s21  ;;  %v5280_v42 = vpop.permute.xlu0 %2496  ;;  %v1239_v24 = vmul.f32 %v5300_v26, %v5109_v43  ;;  %v1240_v51 = vmul.f32 %v5300_v26, %v5116_v33  ;;  %v1241_v43 = vmul.f32 %v5300_v26, %v5123_v59 }
 0x38d   :  { %6709 = vst [vmem:[#allocation25_spill] sm:$0xff] %v5280_v42  ;;  %v5318_v42 = vmul.f32 %v5093_v27, %v5296_v10 }
 0x38e   :  { %1268 = vrot.lane.b32.xlu1 %v5140_v47, %s2841_s21  ;;  %v5282_v13 = vpop.permute.xlu1 %2498 }
 0x38f   :  { %6710 = vst [vmem:[#allocation33_spill] sm:$0xff] %v5282_v13  ;;  %v5314_v13 = vmul.f32 %v5091_v50, %v5296_v10 }
 0x390   :  { %1304 = vrot.lane.b32.xlu0 %v5088_v48, %s2840_s1  ;;  %v5284_v29 = vpop.permute.xlu0 %2500 }
 0x391   :  { %6711 = vst [vmem:[#allocation11_spill] sm:$0xff] %v5284_v29 }
 0x392   :  { %1306 = vrot.lane.b32.xlu1 %v5091_v50, %s2840_s1  ;;  %v5286_v45 = vpop.permute.xlu1 %2502 }
 0x393   :  { %6712 = vst [vmem:[#allocation36_spill] sm:$0xff] %v5286_v45  ;;  %v1348_v45 = vmul.f32 %v5088_v48, %v5296_v10 }
 0x394   :  { %1308 = vrot.lane.b32.xlu0 %v5093_v27, %s2840_s1  ;;  %v5288_v44 = vpop.permute.xlu0 %2504 }
 0x395   :  { %6713 = vst [vmem:[#allocation26_spill] sm:$0xff] %v5288_v44 }
 0x396   :  { %1310 = vrot.lane.b32.xlu1 %v5097_v46, %s2840_s1  ;;  %v5290_v23 = vpop.permute.xlu1 %2506 }
 0x397   :  { %6714 = vst [vmem:[#allocation12_spill] sm:$0xff] %v5290_v23 }
 0x398   :  { %1312 = vrot.lane.b32.xlu0 %v5099_v20, %s2840_s1 }
 0x39a   :  { %1314 = vrot.lane.b32.xlu1 %v5107_v5, %s2840_s1 }
 0x39c   :  { %1316 = vrot.lane.b32.xlu0 %v5111_v11, %s2840_s1 }
 0x39e   :  { %1318 = vrot.lane.b32.xlu1 %v5121_v0, %s2840_s1 }
 0x3a0   :  { %1364 = vrot.lane.b32.xlu0 %v5088_v48, %s2841_s21 }
 0x3a2   :  { %1366 = vrot.lane.b32.xlu1 %v5091_v50, %s2841_s21 }
 0x3a4   :  { %1368 = vrot.lane.b32.xlu0 %v5093_v27, %s2841_s21 }
 0x3a6   :  { %1370 = vrot.lane.b32.xlu1 %v5097_v46, %s2841_s21 }
 0x3a8   :  { %1372 = vrot.lane.b32.xlu0 %v5099_v20, %s2841_s21 }
 0x3aa   :  { %1374 = vrot.lane.b32.xlu1 %v5107_v5, %s2841_s21 }
 0x3ac   :  { %1376 = vrot.lane.b32.xlu0 %v5111_v11, %s2841_s21 }
 0x3ae   :  { %1378 = vrot.lane.b32.xlu1 %v5121_v0, %s2841_s21 }
 0x3b0   :  { %1414 = vrot.lane.b32.xlu0 %v5210_v58, %s2840_s1 }
 0x3b2   :  { %1416 = vrot.lane.b32.xlu1 %v5216_v14, %s2840_s1 }
 0x3b4   :  { %1418 = vrot.lane.b32.xlu0 %v5220_v19, %s2840_s1 }
 0x3b6   :  { %1420 = vrot.lane.b32.xlu1 %v5226_v38, %s2840_s1 }
 0x3b8   :  { %1422 = vrot.lane.b32.xlu0 %v5232_v52, %s2840_s1 }
 0x3ba   :  { %1424 = vrot.lane.b32.xlu1 %v5238_v60, %s2840_s1 }
 0x3bc   :  { %1426 = vrot.lane.b32.xlu0 %v5242_v56, %s2840_s1 }
 0x3be   :  { %1428 = vrot.lane.b32.xlu1 %v5248_v16, %s2840_s1 }
 0x3c0   :  { %1474 = vrot.lane.b32.xlu0 %v5210_v58, %s2841_s21 }
 0x3c2   :  { %1476 = vrot.lane.b32.xlu1 %v5216_v14, %s2841_s21 }
 0x3c4   :  { %1478 = vrot.lane.b32.xlu0 %v5220_v19, %s2841_s21 }
 0x3c6   :  { %1480 = vrot.lane.b32.xlu1 %v5226_v38, %s2841_s21 }
 0x3c8   :  { %1482 = vrot.lane.b32.xlu0 %v5232_v52, %s2841_s21 }
 0x3ca   :  { %1484 = vrot.lane.b32.xlu1 %v5238_v60, %s2841_s21 }
 0x3cc   :  { %1486 = vrot.lane.b32.xlu0 %v5242_v56, %s2841_s21 }
 0x3ce   :  { %1488 = vrot.lane.b32.xlu1 %v5248_v16, %s2841_s21 }
 0x3e2   :  { %v1195_v41 = vpop.permute.xlu0 %1194 }
 0x3e3   :  { %v1210_v44 = vsel %vm3191_vm6, 0.0, %v1195_v41  ;;  %v1238_v41 = vmul.f32 %v5300_v26, %v5102_v37 }
 0x3e4   :  { %v1197_v61 = vpop.permute.xlu1 %1196  ;;  %v1220_v50 = vmul.f32 %v5302_v39, %v1210_v44 }
 0x3e5   :  { %v1211_v17 = vsel %vm3191_vm6, 0.0, %v1197_v61 }
 0x3e6   :  { %v1199_v18 = vpop.permute.xlu0 %1198  ;;  %v1246_v54 = vadd.f32 %v1238_v41, %v1220_v50 }
 0x3e7   :  { %v1212_v29 = vsel %vm3191_vm6, 0.0, %v1199_v18  ;;  %v5328_v18 = vmul.f32 %v5097_v46, %v5296_v10 }
 0x3e8   :  { %v1201_v31 = vpop.permute.xlu1 %1200  ;;  %v1222_v46 = vmul.f32 %v5302_v39, %v1212_v29 }
 0x3e9   :  { %v1213_v27 = vsel %vm3191_vm6, 0.0, %v1201_v31  ;;  %v1242_v31 = vmul.f32 %v5300_v26, %v5128_v55  ;;  %v1244_v55 = vmul.f32 %v5300_v26, %v5136_v12 }
 0x3ea   :  { %v1203_v35 = vpop.permute.xlu0 %1202 }
 0x3eb   :  { %v1214_v37 = vsel %vm3191_vm6, 0.0, %v1203_v35  ;;  %v1243_v35 = vmul.f32 %v5300_v26, %v5132_v6 }
 0x3ec   :  { %v1205_v34 = vpop.permute.xlu1 %1204  ;;  %v1224_v33 = vmul.f32 %v5302_v39, %v1214_v37 }
 0x3ed   :  { %v1215_v59 = vsel %vm3191_vm6, 0.0, %v1205_v34 }
 0x3ee   :  { %v5292_v2 = vpop.permute.xlu0 %1206  ;;  %v1250_v21 = vadd.f32 %v1242_v31, %v1224_v33 }
 0x3f0   :  { %v5294_v3 = vpop.permute.xlu1 %1208 }
 0x3f2   :  { %v1255_v4 = vpop.permute.xlu0 %1254 }
 0x3f3   :  { %v1270_v48 = vsel %vm3298_vm11, 0.0, %v1255_v4  ;;  %v1221_v4 = vmul.f32 %v5302_v39, %v1211_v17  ;;  %v1223_v17 = vmul.f32 %v5302_v39, %v1213_v27  ;;  %v1248_v27 = vadd.f32 %v1240_v51, %v1222_v46 }
 0x3f4   :  { %v1257_v25 = vpop.permute.xlu1 %1256  ;;  %v1280_v49 = vmul.f32 %v5322_v7, %v1270_v48 }
 0x3f5   :  { %v1271_v44 = vsel %vm3298_vm11, 0.0, %v1257_v25  ;;  %v5355_v25 = vstv %s5298_s6  ;;  %v1247_v57 = vadd.f32 %v1239_v24, %v1221_v4  ;;  %v1249_v12 = vadd.f32 %v1241_v43, %v1223_v17 }
 0x3f6   :  { %v1259_v1 = vpop.permute.xlu0 %1258  ;;  %v1281_v6 = vmul.f32 %v5322_v7, %v1271_v44  ;;  %v1288_v28 = vadd.f32 %v1280_v49, %v1246_v54  ;;  %v1225_v44 = vmul.f32 %v5302_v39, %v1215_v59  ;;  %v1216_v24 = vsel %vm3191_vm6, 0.0, %v5292_v2 }
 0x3f7   :  { %v1272_v29 = vsel %vm3298_vm11, 0.0, %v1259_v1  ;;  %v1226_v2 = vmul.f32 %v5302_v39, %v1216_v24  ;;  %v1217_v59 = vsel %vm3191_vm6, 0.0, %v5294_v3 }
 0x3f8   :  { %v1261_v23 = vpop.permute.xlu1 %1260  ;;  %v1282_v41 = vmul.f32 %v5322_v7, %v1272_v29  ;;  %v1251_v29 = vadd.f32 %v1243_v35, %v1225_v44 }
 0x3f9   :  { %v1273_v37 = vsel %vm3298_vm11, 0.0, %v1261_v23  ;;  %v1289_v23 = vadd.f32 %v1281_v6, %v1247_v57 }
 0x3fa   :  { %v1263_v53 = vpop.permute.xlu0 %1262  ;;  %v1283_v4 = vmul.f32 %v5322_v7, %v1273_v37  ;;  %v1290_v57 = vadd.f32 %v1282_v41, %v1248_v27 }
 0x3fb   :  { %v1274_v34 = vsel %vm3298_vm11, 0.0, %v1263_v53 }
 0x3fc   :  { %v1265_v61 = vpop.permute.xlu1 %1264  ;;  %v1284_v53 = vmul.f32 %v5322_v7, %v1274_v34  ;;  %v1291_v37 = vadd.f32 %v1283_v4, %v1249_v12 }
 0x3fd   :  { %v1275_v43 = vsel %vm3298_vm11, 0.0, %v1265_v61 }
 0x3fe   :  { %v1267_v22 = vpop.permute.xlu0 %1266 }
 0x3ff   :  { %v1276_v61 = vsel %vm3298_vm11, 0.0, %v1267_v22 }
 0x400   :  { %v1269_v36 = vpop.permute.xlu1 %1268  ;;  %v1286_v22 = vmul.f32 %v5322_v7, %v1276_v61 }
 0x401   :  { %v1277_v12 = vsel %vm3298_vm11, 0.0, %v1269_v36 }
 0x402   :  { %v1305_v48 = vpop.permute.xlu0 %1304 }
 0x403   :  { %v1320_v1 = vsel %vm3191_vm6, 0.0, %v1305_v48 }
 0x404   :  { %v1330_v50 = vmul.f32 %v5355_v25, %v1320_v1  ;;  %v1307_v51 = vpop.permute.xlu1 %1306  ;;  %v1285_v1 = vmul.f32 %v5322_v7, %v1275_v43 }
 0x405   :  { %v1321_v49 = vsel %vm3191_vm6, 0.0, %v1307_v51  ;;  %v1227_v51 = vmul.f32 %v5302_v39, %v1217_v59 }
 0x406   :  { %v1338_v54 = vadd.f32 %v1330_v50, %v1288_v28  ;;  %v1309_v46 = vpop.permute.xlu0 %1308  ;;  %v1331_v31 = vmul.f32 %v5355_v25, %v1321_v49  ;;  %v1293_v49 = vadd.f32 %v1285_v1, %v1251_v29 }
 0x407   :  { %v1322_v17 = vsel %vm3191_vm6, 0.0, %v1309_v46 }
 0x408   :  { %v1332_v33 = vmul.f32 %v5355_v25, %v1322_v17  ;;  %v5385_v28 = vadd.f32 %v1348_v45, %v1338_v54  ;;  %v1339_v6 = vadd.f32 %v1331_v31, %v1289_v23  ;;  %v1311_v48 = vpop.permute.xlu1 %1310  ;;  %v1292_v45 = vadd.f32 %v1284_v53, %v1250_v21 }
 0x409   :  { %v1323_v27 = vsel %vm3191_vm6, 0.0, %v1311_v48  ;;  %v1245_v21 = vmul.f32 %v5300_v26, %v5140_v47  ;;  %v1252_v54 = vadd.f32 %v1244_v55, %v1226_v2 }
 0x40a   :  { %v1340_v34 = vadd.f32 %v1332_v33, %v1290_v57  ;;  %v1313_v41 = vpop.permute.xlu0 %1312  ;;  %v1333_v35 = vmul.f32 %v5355_v25, %v1323_v27  ;;  %v5399_v3 = vadd.f32 %v5314_v13, %v1339_v6  ;;  %v1352_v13 = vmul.f32 %v5099_v20, %v5296_v10 }
 0x40b   :  { %v1324_v50 = vsel %vm3191_vm6, 0.0, %v1313_v41  ;;  %v1294_v26 = vadd.f32 %v1286_v22, %v1252_v54  ;;  %v1253_v31 = vadd.f32 %v1245_v21, %v1227_v51  ;;  %v1353_v57 = vmul.f32 %v5107_v5, %v5296_v10 }
 0x40c   :  { %v1334_v44 = vmul.f32 %v5355_v25, %v1324_v50  ;;  %v5406_v24 = vadd.f32 %v5318_v42, %v1340_v34  ;;  %v1341_v23 = vadd.f32 %v1333_v35, %v1291_v37  ;;  %v1315_v4 = vpop.permute.xlu1 %1314  ;;  %v1287_v42 = vmul.f32 %v5322_v7, %v1277_v12 }
 0x40d   :  { %v1325_v36 = vsel %vm3191_vm6, 0.0, %v1315_v4  ;;  %v1355_v5 = vmul.f32 %v5121_v0, %v5296_v10  ;;  %v5448_v21 = vstv %s2616_s8 }
 0x40e   :  { %v1342_v46 = vadd.f32 %v1334_v44, %v1292_v45  ;;  %v1317_v53 = vpop.permute.xlu0 %1316  ;;  %v1335_v43 = vmul.f32 %v5355_v25, %v1325_v36  ;;  %v5420_v39 = vadd.f32 %v5328_v18, %v1341_v23  ;;  %v1354_v18 = vmul.f32 %v5111_v11, %v5296_v10 }
 0x40f   :  { %v1326_v47 = vsel %vm3191_vm6, 0.0, %v1317_v53  ;;  %v1295_v59 = vadd.f32 %v1287_v42, %v1253_v31  ;;  %v5442_v44 = vstv %s2615_s7 }
 0x410   :  { %v1336_v20 = vmul.f32 %v5355_v25, %v1326_v47  ;;  %v5423_v55 = vadd.f32 %v1352_v13, %v1342_v46  ;;  %v1343_v17 = vadd.f32 %v1335_v43, %v1293_v49  ;;  %v1319_v2 = vpop.permute.xlu1 %1318  ;;  %v5457_v46 = vstv %s2617_s9 }
 0x411   :  { %v1327_v33 = vsel %vm3191_vm6, 0.0, %v1319_v2 }
 0x412   :  { %v1344_v7 = vadd.f32 %v1336_v20, %v1294_v26  ;;  %v1365_v29 = vpop.permute.xlu0 %1364  ;;  %v1337_v61 = vmul.f32 %v5355_v25, %v1327_v33  ;;  %v5432_v6 = vadd.f32 %v1353_v57, %v1343_v17  ;;  %v1458_v17 = vmul.f32 %v5457_v46, %v5210_v58 }
 0x413   :  { %v1380_v0 = vsel %vm3298_vm11, 0.0, %v1365_v29  ;;  %v1459_v29 = vmul.f32 %v5457_v46, %v5216_v14  ;;  %v1460_v58 = vmul.f32 %v5457_v46, %v5220_v19 }
 0x414   :  { %v5434_v48 = vadd.f32 %v1354_v18, %v1344_v7  ;;  %v1345_v37 = vadd.f32 %v1337_v61, %v1295_v59  ;;  %v1367_v1 = vpop.permute.xlu1 %1366  ;;  %v1390_v4 = vmul.f32 %v5442_v44, %v1380_v0 }
 0x415   :  { %v1381_v10 = vsel %vm3298_vm11, 0.0, %v1367_v1 }
 0x416   :  { %v1369_v34 = vpop.permute.xlu0 %1368  ;;  %v5438_v27 = vadd.f32 %v1355_v5, %v1345_v37  ;;  %v1391_v36 = vmul.f32 %v5442_v44, %v1381_v10  ;;  %v1398_v2 = vadd.f32 %v1390_v4, %v5385_v28  ;;  %v5486_v5 = vstv %s2618_s10 }
 0x417   :  { %v1382_v13 = vsel %vm3298_vm11, 0.0, %v1369_v34 }
 0x418   :  { %v1371_v41 = vpop.permute.xlu1 %1370  ;;  %v1392_v47 = vmul.f32 %v5442_v44, %v1382_v13  ;;  %v1399_v18 = vadd.f32 %v1391_v36, %v5399_v3 }
 0x419   :  { %v1383_v53 = vsel %vm3298_vm11, 0.0, %v1371_v41 }
 0x41a   :  { %v1373_v45 = vpop.permute.xlu0 %1372  ;;  %v1393_v57 = vmul.f32 %v5442_v44, %v1383_v53  ;;  %v1400_v14 = vadd.f32 %v1392_v47, %v5406_v24 }
 0x41b   :  { %v1384_v26 = vsel %vm3298_vm11, 0.0, %v1373_v45 }
 0x41c   :  { %v1375_v35 = vpop.permute.xlu1 %1374  ;;  %v1394_v28 = vmul.f32 %v5442_v44, %v1384_v26 }
 0x41d   :  { %v1385_v7 = vsel %vm3298_vm11, 0.0, %v1375_v35  ;;  %v1401_v35 = vadd.f32 %v1393_v57, %v5420_v39 }
 0x41e   :  { %v1377_v50 = vpop.permute.xlu0 %1376  ;;  %v1395_v3 = vmul.f32 %v5442_v44, %v1385_v7  ;;  %v1402_v39 = vadd.f32 %v1394_v28, %v5423_v55 }
 0x41f   :  { %v1386_v34 = vsel %vm3298_vm11, 0.0, %v1377_v50 }
 0x420   :  { %v5440_v11 = vpop.permute.xlu1 %1378 }
 0x422   :  { %v1415_v25 = vpop.permute.xlu0 %1414 }
 0x423   :  { %v1430_v51 = vsel %vm3191_vm6, 0.0, %v1415_v25 }
 0x424   :  { %v1417_v22 = vpop.permute.xlu1 %1416  ;;  %v1440_v42 = vmul.f32 %v5448_v21, %v1430_v51  ;;  %v1396_v51 = vmul.f32 %v5442_v44, %v1386_v34 }
 0x425   :  { %v1431_v54 = vsel %vm3191_vm6, 0.0, %v1417_v22  ;;  %v1461_v22 = vmul.f32 %v5457_v46, %v5226_v38  ;;  %v1403_v38 = vadd.f32 %v1395_v3, %v5432_v6 }
 0x426   :  { %v1419_v12 = vpop.permute.xlu0 %1418  ;;  %v1441_v20 = vmul.f32 %v5448_v21, %v1431_v54  ;;  %v1448_v37 = vadd.f32 %v1440_v42, %v1398_v2  ;;  %v1404_v2 = vadd.f32 %v1396_v51, %v5434_v48 }
 0x427   :  { %v1432_v43 = vsel %vm3191_vm6, 0.0, %v1419_v12  ;;  %v1462_v12 = vmul.f32 %v5457_v46, %v5232_v52  ;;  %v1387_v52 = vsel %vm3298_vm11, 0.0, %v5440_v11 }
 0x428   :  { %v1421_v23 = vpop.permute.xlu1 %1420  ;;  %v1442_v59 = vmul.f32 %v5448_v21, %v1432_v43  ;;  %v1449_v41 = vadd.f32 %v1441_v20, %v1399_v18  ;;  %v1397_v57 = vmul.f32 %v5442_v44, %v1387_v52 }
 0x429   :  { %v1433_v61 = vsel %vm3191_vm6, 0.0, %v1421_v23  ;;  %v1466_v23 = vadd.f32 %v1458_v17, %v1448_v37 }
 0x42a   :  { %v1423_v49 = vpop.permute.xlu0 %1422  ;;  %v1443_v19 = vmul.f32 %v5448_v21, %v1433_v61  ;;  %v1450_v0 = vadd.f32 %v1442_v59, %v1400_v14  ;;  %v1405_v3 = vadd.f32 %v1397_v57, %v5438_v27 }
 0x42b   :  { %v1434_v1 = vsel %vm3191_vm6, 0.0, %v1423_v49  ;;  %v1467_v49 = vadd.f32 %v1459_v29, %v1449_v41  ;;  %v1463_v29 = vmul.f32 %v5457_v46, %v5238_v60 }
 0x42c   :  { %v1425_v31 = vpop.permute.xlu1 %1424  ;;  %v1444_v24 = vmul.f32 %v5448_v21, %v1434_v1  ;;  %v1451_v36 = vadd.f32 %v1443_v19, %v1401_v35  ;;  %v1468_v26 = vadd.f32 %v1460_v58, %v1450_v0  ;;  %v1464_v19 = vmul.f32 %v5457_v46, %v5242_v56 }
 0x42d   :  { %v1435_v10 = vsel %vm3191_vm6, 0.0, %v1425_v31 }
 0x42e   :  { %v1427_v33 = vpop.permute.xlu0 %1426  ;;  %v1445_v53 = vmul.f32 %v5448_v21, %v1435_v10  ;;  %v1452_v47 = vadd.f32 %v1444_v24, %v1402_v39  ;;  %v1469_v61 = vadd.f32 %v1461_v22, %v1451_v36 }
 0x42f   :  { %v1436_v13 = vsel %vm3191_vm6, 0.0, %v1427_v33 }
 0x430   :  { %v1429_v45 = vpop.permute.xlu1 %1428  ;;  %v1446_v20 = vmul.f32 %v5448_v21, %v1436_v13  ;;  %v1453_v18 = vadd.f32 %v1445_v53, %v1403_v38  ;;  %v1470_v14 = vadd.f32 %v1462_v12, %v1452_v47 }
 0x431   :  { %v1437_v31 = vsel %vm3191_vm6, 0.0, %v1429_v45 }
 0x432   :  { %v1475_v25 = vpop.permute.xlu0 %1474  ;;  %v1447_v37 = vmul.f32 %v5448_v21, %v1437_v31  ;;  %v1454_v44 = vadd.f32 %v1446_v20, %v1404_v2  ;;  %v1471_v35 = vadd.f32 %v1463_v29, %v1453_v18  ;;  %v5699_v18 = vld [vmem:[#allocation3 + $0x32] sm:$0xff] }
 0x433   :  { %v1490_v50 = vsel %vm3298_vm11, 0.0, %v1475_v25  ;;  %6723 = vst [vmem:[#allocation61_spill] sm:$0xff] %v5699_v18 }
 0x434   :  { %v1500_v4 = vmul.f32 %v5486_v5, %v1490_v50  ;;  %v1477_v54 = vpop.permute.xlu1 %1476  ;;  %v1455_v22 = vadd.f32 %v1447_v37, %v1405_v3  ;;  %v1472_v27 = vadd.f32 %v1464_v19, %v1454_v44  ;;  %v1465_v50 = vmul.f32 %v5457_v46, %v5248_v16  ;;  %v2778_v19 = vld [vmem:[#allocation3 + $0x11] sm:$0xff] }
 0x435   :  { %v1491_v42 = vsel %vm3298_vm11, 0.0, %v1477_v54 }
 0x436   :  { %v1508_v55 = vadd.f32 %v1500_v4, %v1466_v23  ;;  %v1479_v43 = vpop.permute.xlu0 %1478  ;;  %v1501_v6 = vmul.f32 %v5486_v5, %v1491_v42  ;;  %v1473_v23 = vadd.f32 %v1465_v50, %v1455_v22 }
 0x437   :  { %v1492_v11 = vsel %vm3298_vm11, 0.0, %v1479_v43 }
 0x438   :  { %2718 = vtanh.f32 %v1508_v55  ;;  %v1502_v17 = vmul.f32 %v5486_v5, %v1492_v11  ;;  %v1509_v7 = vadd.f32 %v1501_v6, %v1467_v49  ;;  %v1481_v33 = vpop.permute.xlu1 %1480 }
 0x439   :  { %v1493_v58 = vsel %vm3298_vm11, 0.0, %v1481_v33 }
 0x43a   :  { %v1510_v59 = vadd.f32 %v1502_v17, %v1468_v26  ;;  %v1483_v28 = vpop.permute.xlu0 %1482  ;;  %2720 = vtanh.f32 %v1509_v7  ;;  %v1503_v1 = vmul.f32 %v5486_v5, %v1493_v58 }
 0x43b   :  { %v1494_v48 = vsel %vm3298_vm11, 0.0, %v1483_v28  ;;  %v2369_v28 = vstv %s2641_s12 }
 0x43c   :  { %2722 = vtanh.f32 %v1510_v59  ;;  %v1504_v60 = vmul.f32 %v5486_v5, %v1494_v48  ;;  %v1511_v34 = vadd.f32 %v1503_v1, %v1469_v61  ;;  %v1485_v41 = vpop.permute.xlu1 %1484  ;;  %v5703_v59 = vld [vmem:[#allocation3 + $0x3a] sm:$0xff]  ;;  %v5707_v61 = vstv %s2628_s11 }
 0x43d   :  { %v1495_v21 = vsel %vm3298_vm11, 0.0, %v1485_v41  ;;  %6724 = vst [vmem:[#allocation64_spill] sm:$0xff] %v5703_v59  ;;  %v5724_v41 = vstv %s2644_s14 }
 0x43e   :  { %v1512_v45 = vadd.f32 %v1504_v60, %v1470_v14  ;;  %v1487_v25 = vpop.permute.xlu0 %1486  ;;  %2724 = vtanh.f32 %v1511_v34  ;;  %v1505_v0 = vmul.f32 %v5486_v5, %v1495_v21  ;;  %v5718_v14 = vstv %s2638_s13  ;;  %v2776_v60 = vld [vmem:[#allocation3 + $0x1] sm:$0xff]  ;;  %6725 = vst [vmem:[#allocation45_spill] sm:$0xff] %v5724_v41 }
 0x43f   :  { %v1496_v12 = vsel %vm3298_vm11, 0.0, %v1487_v25  ;;  %v5720_v3 = vmul.f32 %v2776_v60, %v2369_v28  ;;  %v5722_v34 = vstv %s2637_s15  ;;  %v5728_v25 = vmul.f32 %v2778_v19, %v2369_v28  ;;  %v2785_v19 = vld [vmem:[#allocation3 + $0x10] sm:$0xff] }
 0x440   :  { %2726 = vtanh.f32 %v1512_v45  ;;  %v1506_v24 = vmul.f32 %v5486_v5, %v1496_v12  ;;  %v1513_v10 = vadd.f32 %v1505_v0, %v1471_v35  ;;  %v1489_v39 = vpop.permute.xlu1 %1488  ;;  %v2777_v35 = vld [vmem:[#allocation3 + $0x9] sm:$0xff] }
 0x441   :  { %v1497_v56 = vsel %vm3298_vm11, 0.0, %v1489_v39  ;;  %v5726_v21 = vmul.f32 %v2777_v35, %v2369_v28 }
 0x442   :  { %v1514_v51 = vadd.f32 %v1506_v24, %v1472_v27  ;;  %2728 = vtanh.f32 %v1513_v10  ;;  %v1507_v4 = vmul.f32 %v5486_v5, %v1497_v56  ;;  %v2779_v27 = vld [vmem:[#allocation3 + $0x19] sm:$0xff] }
 0x443   :  { %v5734_v24 = vmul.f32 %v2779_v27, %v2369_v28 }
 0x444   :  { %2730 = vtanh.f32 %v1514_v51  ;;  %v1515_v52 = vadd.f32 %v1507_v4, %v1473_v23  ;;  %v2780_v51 = vld [vmem:[#allocation3] sm:$0xff] }
 0x445   :  { %v5547_v38 = vpop.eup %2718  ;;  %v5742_v56 = vmul.f32 %v2780_v51, %v5718_v14  ;;  %v2781_v23 = vld [vmem:[#allocation3 + $0x21] sm:$0xff] }
 0x446   :  { %1524 = vst [vmem:[#allocation2 + $0x1] sm:$0xff] %v5547_v38  ;;  %2732 = vtanh.f32 %v1515_v52  ;;  %v5744_v4 = vmul.f32 %v2781_v23, %v2369_v28  ;;  %v2787_v23 = vld [vmem:[#allocation3 + $0xa] sm:$0xff] }
 0x447   :  { %v5550_v13 = vpop.eup %2720 }
 0x448   :  { %1525 = vst [vmem:[#allocation2 + $0x9] sm:$0xff] %v5550_v13  ;;  %6726 = vst [vmem:[#allocation55_spill] sm:$0xff] %v5744_v4 }
 0x449   :  { %v5552_v54 = vpop.eup %2722 }
 0x44a   :  { %1526 = vst [vmem:[#allocation2 + $0x11] sm:$0xff] %v5552_v54 }
 0x44b   :  { %v5556_v16 = vpop.eup %2724 }
 0x44c   :  { %1527 = vst [vmem:[#allocation2 + $0x19] sm:$0xff] %v5556_v16 }
 0x44d   :  { %v5558_v46 = vpop.eup %2726  ;;  %v5561_v5 = vld [vmem:[#allocation2] sm:$0xff] }
 0x44e   :  { %1528 = vst [vmem:[#allocation2 + $0x21] sm:$0xff] %v5558_v46  ;;  %1886 = vrot.lane.b32.xlu0 %v5561_v5, %s2840_s1 }
 0x44f   :  { %v5566_v49 = vpop.eup %2728  ;;  %v5568_v36 = vld [vmem:[#allocation2 + $0x8] sm:$0xff] }
 0x450   :  { %1529 = vst [vmem:[#allocation2 + $0x29] sm:$0xff] %v5566_v49  ;;  %1888 = vrot.lane.b32.xlu1 %v5568_v36, %s2840_s1  ;;  %v5651_v20 = vld [vmem:[#allocation2 + $0x2] sm:$0xff] }
 0x451   :  { %v5570_v53 = vpop.eup %2730  ;;  %v5575_v55 = vld [vmem:[#allocation2 + $0x10] sm:$0xff]  ;;  %6715 = vst [vmem:[#allocation15_spill] sm:$0xff] %v5651_v20 }
 0x452   :  { %1530 = vst [vmem:[#allocation2 + $0x31] sm:$0xff] %v5570_v53  ;;  %1890 = vrot.lane.b32.xlu0 %v5575_v55, %s2840_s1  ;;  %v5655_v31 = vld [vmem:[#allocation2 + $0xa] sm:$0xff] }
 0x453   :  { %v5580_v42 = vpop.eup %2732  ;;  %v5582_v43 = vld [vmem:[#allocation2 + $0x18] sm:$0xff]  ;;  %6716 = vst [vmem:[#allocation30_spill] sm:$0xff] %v5655_v31 }
 0x454   :  { %1531 = vst [vmem:[#allocation2 + $0x39] sm:$0xff] %v5580_v42  ;;  %1892 = vrot.lane.b32.xlu1 %v5582_v43, %s2840_s1  ;;  %v5659_v17 = vld [vmem:[#allocation2 + $0x12] sm:$0xff] }
 0x455   :  { %v5587_v47 = vld [vmem:[#allocation2 + $0x20] sm:$0xff]  ;;  %6717 = vst [vmem:[#allocation44_spill] sm:$0xff] %v5659_v17 }
 0x456   :  { %1894 = vrot.lane.b32.xlu0 %v5587_v47, %s2840_s1  ;;  %v5663_v2 = vld [vmem:[#allocation2 + $0x1a] sm:$0xff] }
 0x457   :  { %v5591_v6 = vld [vmem:[#allocation2 + $0x28] sm:$0xff]  ;;  %6718 = vst [vmem:[#allocation58_spill] sm:$0xff] %v5663_v2 }
 0x458   :  { %1896 = vrot.lane.b32.xlu1 %v5591_v6, %s2840_s1  ;;  %v5667_v57 = vld [vmem:[#allocation2 + $0x22] sm:$0xff] }
 0x459   :  { %v5595_v26 = vld [vmem:[#allocation2 + $0x30] sm:$0xff]  ;;  %6719 = vst [vmem:[#allocation59_spill] sm:$0xff] %v5667_v57 }
 0x45a   :  { %1898 = vrot.lane.b32.xlu0 %v5595_v26, %s2840_s1  ;;  %v5671_v7 = vld [vmem:[#allocation2 + $0x2a] sm:$0xff] }
 0x45b   :  { %v5599_v11 = vld [vmem:[#allocation2 + $0x38] sm:$0xff]  ;;  %6720 = vst [vmem:[#allocation31_spill] sm:$0xff] %v5671_v7 }
 0x45c   :  { %1900 = vrot.lane.b32.xlu1 %v5599_v11, %s2840_s1  ;;  %v5675_v33 = vld [vmem:[#allocation2 + $0x32] sm:$0xff]  ;;  %v5679_v29 = vld [vmem:[#allocation2 + $0x3a] sm:$0xff] }
 0x45d   :  { %6721 = vst [vmem:[#allocation20_spill] sm:$0xff] %v5675_v33  ;;  %6722 = vst [vmem:[#allocation60_spill] sm:$0xff] %v5679_v29 }
 0x45e   :  { %1946 = vrot.lane.b32.xlu0 %v5561_v5, %s2841_s21 }
 0x460   :  { %1948 = vrot.lane.b32.xlu1 %v5568_v36, %s2841_s21 }
 0x462   :  { %1950 = vrot.lane.b32.xlu0 %v5575_v55, %s2841_s21 }
 0x464   :  { %1952 = vrot.lane.b32.xlu1 %v5582_v43, %s2841_s21 }
 0x466   :  { %1954 = vrot.lane.b32.xlu0 %v5587_v47, %s2841_s21 }
 0x468   :  { %1956 = vrot.lane.b32.xlu1 %v5591_v6, %s2841_s21 }
 0x46a   :  { %1958 = vrot.lane.b32.xlu0 %v5595_v26, %s2841_s21 }
 0x46c   :  { %1960 = vrot.lane.b32.xlu1 %v5599_v11, %s2841_s21 }
 0x46e   :  { %1996 = vrot.lane.b32.xlu0 %v5547_v38, %s2840_s1 }
 0x470   :  { %1998 = vrot.lane.b32.xlu1 %v5550_v13, %s2840_s1 }
 0x472   :  { %2000 = vrot.lane.b32.xlu0 %v5552_v54, %s2840_s1 }
 0x474   :  { %2002 = vrot.lane.b32.xlu1 %v5556_v16, %s2840_s1 }
 0x476   :  { %2004 = vrot.lane.b32.xlu0 %v5558_v46, %s2840_s1 }
 0x478   :  { %2006 = vrot.lane.b32.xlu1 %v5566_v49, %s2840_s1 }
 0x47a   :  { %2008 = vrot.lane.b32.xlu0 %v5570_v53, %s2840_s1 }
 0x47c   :  { %2010 = vrot.lane.b32.xlu1 %v5580_v42, %s2840_s1 }
 0x47e   :  { %2056 = vrot.lane.b32.xlu0 %v5547_v38, %s2841_s21 }
 0x480   :  { %2058 = vrot.lane.b32.xlu1 %v5550_v13, %s2841_s21 }
 0x482   :  { %2060 = vrot.lane.b32.xlu0 %v5552_v54, %s2841_s21 }
 0x484   :  { %2062 = vrot.lane.b32.xlu1 %v5556_v16, %s2841_s21 }
 0x486   :  { %2064 = vrot.lane.b32.xlu0 %v5558_v46, %s2841_s21 }
 0x488   :  { %2066 = vrot.lane.b32.xlu1 %v5566_v49, %s2841_s21 }
 0x48a   :  { %2068 = vrot.lane.b32.xlu0 %v5570_v53, %s2841_s21 }
 0x48c   :  { %2070 = vrot.lane.b32.xlu1 %v5580_v42, %s2841_s21 }
 0x48e   :  { %2106 = vrot.lane.b32.xlu0 %v5651_v20, %s2840_s1 }
 0x490   :  { %2108 = vrot.lane.b32.xlu1 %v5655_v31, %s2840_s1 }
 0x492   :  { %2110 = vrot.lane.b32.xlu0 %v5659_v17, %s2840_s1 }
 0x494   :  { %2112 = vrot.lane.b32.xlu1 %v5663_v2, %s2840_s1 }
 0x496   :  { %2114 = vrot.lane.b32.xlu0 %v5667_v57, %s2840_s1 }
 0x498   :  { %2116 = vrot.lane.b32.xlu1 %v5671_v7, %s2840_s1 }
 0x49a   :  { %2118 = vrot.lane.b32.xlu0 %v5675_v33, %s2840_s1 }
 0x49c   :  { %2120 = vrot.lane.b32.xlu1 %v5679_v29, %s2840_s1  ;;  %s2629_s1 = sld [smem:[#allocation4 + $0x25]] }
 0x49e   :  { %2166 = vrot.lane.b32.xlu0 %v5651_v20, %s2841_s21  ;;  %v6739_v20 = vld [vmem:[#allocation27_spill] sm:$0xff] }
 0x4a0   :  { %2168 = vrot.lane.b32.xlu1 %v5655_v31, %s2841_s21 }
 0x4a2   :  { %2170 = vrot.lane.b32.xlu0 %v5659_v17, %s2841_s21  ;;  %v5709_v58 = vstv %s2629_s1  ;;  %v6738_v17 = vld [vmem:[#allocation32_spill] sm:$0xff] }
 0x4a3   :  { %v1930_v44 = vmul.f32 %v5709_v58, %v5561_v5  ;;  %v1931_v50 = vmul.f32 %v5709_v58, %v5568_v36  ;;  %v1932_v52 = vmul.f32 %v5709_v58, %v5575_v55  ;;  %v2783_v36 = vld [vmem:[#allocation3 + $0x29] sm:$0xff]  ;;  %v5760_v55 = vmul.f32 %v2785_v19, %v5718_v14 }
 0x4a4   :  { %2172 = vrot.lane.b32.xlu1 %v5663_v2, %s2841_s21 }
 0x4a6   :  { %2174 = vrot.lane.b32.xlu0 %v5667_v57, %s2841_s21 }
 0x4a8   :  { %2176 = vrot.lane.b32.xlu1 %v5671_v7, %s2841_s21  ;;  %v6735_v7 = vld [vmem:[#allocation37_spill] sm:$0xff] }
 0x4aa   :  { %2178 = vrot.lane.b32.xlu0 %v5675_v33, %s2841_s21  ;;  %v6733_v33 = vld [vmem:[#allocation38_spill] sm:$0xff] }
 0x4ac   :  { %2180 = vrot.lane.b32.xlu1 %v5679_v29, %s2841_s21 }
 0x4ae   :  { %2508 = vrot.lane.b32.xlu0 %v5699_v18, %s2841_s21 }
 0x4b0   :  { %2510 = vrot.lane.b32.xlu1 %v5703_v59, %s2841_s21  ;;  %s5790_s21 = sld [smem:[#allocation4 + $0x39]] }
 0x4c0   :  { %v1887_v37 = vpop.permute.xlu0 %1886 }
 0x4c1   :  { %v1902_v1 = vsel %vm3191_vm6, 0.0, %v1887_v37  ;;  %v2782_v37 = vld [vmem:[#allocation3 + $0x8] sm:$0xff] }
 0x4c2   :  { %v1912_v48 = vmul.f32 %v5707_v61, %v1902_v1  ;;  %v1889_v45 = vpop.permute.xlu1 %1888  ;;  %v5750_v1 = vmul.f32 %v2782_v37, %v5718_v14  ;;  %v5769_v37 = vmul.f32 %v2787_v23, %v5724_v41 }
 0x4c3   :  { %v1903_v0 = vsel %vm3191_vm6, 0.0, %v1889_v45 }
 0x4c4   :  { %v5730_v22 = vadd.f32 %v1930_v44, %v1912_v48  ;;  %v1891_v12 = vpop.permute.xlu0 %1890  ;;  %v1913_v10 = vmul.f32 %v5707_v61, %v1903_v0  ;;  %v5752_v48 = vmul.f32 %v2783_v36, %v2369_v28  ;;  %v2784_v44 = vld [vmem:[#allocation3 + $0x2] sm:$0xff]  ;;  %v2786_v0 = vld [vmem:[#allocation3 + $0x31] sm:$0xff]  ;;  %6730 = vst [vmem:[#allocation63_spill] sm:$0xff] %v5769_v37 }
 0x4c5   :  { %v1904_v39 = vsel %vm3191_vm6, 0.0, %v1891_v12  ;;  %v5755_v60 = vmul.f32 %v2784_v44, %v5724_v41  ;;  %v5762_v12 = vmul.f32 %v2786_v0, %v2369_v28  ;;  %v2788_v44 = vld [vmem:[#allocation3 + $0x18] sm:$0xff]  ;;  %v2789_v0 = vld [vmem:[#allocation3 + $0x20] sm:$0xff] }
 0x4c6   :  { %v1914_v5 = vmul.f32 %v5707_v61, %v1904_v39  ;;  %6727 = vst [vmem:[#allocation47_spill] sm:$0xff] %v5752_v48  ;;  %v5757_v45 = vadd.f32 %v1931_v50, %v1913_v10  ;;  %v1893_v35 = vpop.permute.xlu1 %1892  ;;  %v1933_v10 = vmul.f32 %v5709_v58, %v5582_v43  ;;  %v5786_v23 = vmul.f32 %v2789_v0, %v5718_v14  ;;  %v2790_v43 = vld [vmem:[#allocation3 + $0x39] sm:$0xff] }
 0x4c7   :  { %6728 = vst [vmem:[#allocation66_spill] sm:$0xff] %v5755_v60  ;;  %6729 = vst [vmem:[#allocation67_spill] sm:$0xff] %v5762_v12  ;;  %v1905_v39 = vsel %vm3191_vm6, 0.0, %v1893_v35  ;;  %v1934_v35 = vmul.f32 %v5709_v58, %v5587_v47  ;;  %v2232_v47 = vsel %vm3191_vm6, 0.0, %v6733_v33  ;;  %v2796_v37 = vld [vmem:[#allocation3 + $0x38] sm:$0xff]  ;;  %v5860_v60 = vstv %s5790_s21 }
 0x4c8   :  { %v5764_v27 = vadd.f32 %v1932_v52, %v1914_v5  ;;  %v1895_v51 = vpop.permute.xlu0 %1894  ;;  %v1915_v50 = vmul.f32 %v5707_v61, %v1905_v39  ;;  %v5777_v52 = vmul.f32 %v2788_v44, %v5718_v14  ;;  %v5780_v5 = vstv %s5713_s16 }
 0x4c9   :  { %v1906_v36 = vsel %vm3191_vm6, 0.0, %v1895_v51  ;;  %v5788_v39 = vmul.f32 %v2790_v43, %v2369_v28  ;;  %v2791_v51 = vld [vmem:[#allocation3 + $0x12] sm:$0xff]  ;;  %v2242_v2 = vmul.f32 %v5722_v34, %v2232_v47 }
 0x4ca   :  { %v1916_v19 = vmul.f32 %v5707_v61, %v1906_v36  ;;  %v5793_v44 = vmul.f32 %v2791_v51, %v5724_v41  ;;  %v5795_v29 = vadd.f32 %v1933_v10, %v1915_v50  ;;  %v1897_v59 = vpop.permute.xlu1 %1896  ;;  %v2792_v36 = vld [vmem:[#allocation3 + $0x1a] sm:$0xff]  ;;  %v2233_v10 = vsel %vm3191_vm6, 0.0, %v6735_v7 }
 0x4cb   :  { %6731 = vst [vmem:[#allocation68_spill] sm:$0xff] %v5788_v39  ;;  %v5801_v0 = vmul.f32 %v2792_v36, %v5724_v41  ;;  %v1907_v28 = vsel %vm3191_vm6, 0.0, %v1897_v59  ;;  %v1935_v50 = vmul.f32 %v5709_v58, %v5591_v6  ;;  %v2793_v36 = vld [vmem:[#allocation3 + $0x28] sm:$0xff]  ;;  %v1936_v59 = vmul.f32 %v5709_v58, %v5595_v26  ;;  %v6737_v6 = vld [vmem:[#allocation13_spill] sm:$0xff] }
 0x4cc   :  { %6732 = vst [vmem:[#allocation70_spill] sm:$0xff] %v5793_v44  ;;  %v5803_v18 = vadd.f32 %v1934_v35, %v1916_v19  ;;  %v1899_v43 = vpop.permute.xlu0 %1898  ;;  %v1917_v51 = vmul.f32 %v5707_v61, %v1907_v28  ;;  %v2265_v35 = vmul.f32 %v2793_v36, %v5718_v14  ;;  %v2794_v19 = vld [vmem:[#allocation3 + $0x22] sm:$0xff]  ;;  %v2234_v28 = vsel %vm3191_vm6, 0.0, %v6737_v6 }
 0x4cd   :  { %6734 = vst [vmem:[#allocation69_spill] sm:$0xff] %v5801_v0  ;;  %v1908_v33 = vsel %vm3191_vm6, 0.0, %v1899_v43  ;;  %v5817_v57 = vmul.f32 %v2794_v19, %v5724_v41  ;;  %v2235_v43 = vsel %vm3191_vm6, 0.0, %v6738_v17  ;;  %v2243_v19 = vmul.f32 %v5722_v34, %v2233_v10  ;;  %v6742_v44 = vld [vmem:[#allocation50_spill] sm:$0xff] }
 0x4ce   :  { %v1918_v7 = vmul.f32 %v5707_v61, %v1908_v33  ;;  %v5829_v36 = vadd.f32 %v1935_v50, %v1917_v51  ;;  %v1901_v31 = vpop.permute.xlu1 %1900  ;;  %v2236_v26 = vsel %vm3191_vm6, 0.0, %v6739_v20  ;;  %v6741_v50 = vld [vmem:[#allocation49_spill] sm:$0xff]  ;;  %v1937_v51 = vmul.f32 %v5709_v58, %v5599_v11  ;;  %v2797_v11 = vld [vmem:[#allocation3 + $0x2a] sm:$0xff] }
 0x4cf   :  { %6736 = vst [vmem:[#allocation34_spill] sm:$0xff] %v5817_v57  ;;  %v1909_v47 = vsel %vm3191_vm6, 0.0, %v1901_v31  ;;  %v6740_v57 = vld [vmem:[#allocation29_spill] sm:$0xff]  ;;  %v2238_v10 = vsel %vm3191_vm6, 0.0, %v6741_v50  ;;  %v2244_v31 = vmul.f32 %v5722_v34, %v2234_v28  ;;  %v2245_v0 = vmul.f32 %v5722_v34, %v2235_v43  ;;  %v6747_v39 = vld [vmem:[#allocation18_spill] sm:$0xff] }
 0x4d0   :  { %v5835_v33 = vadd.f32 %v1936_v59, %v1918_v7  ;;  %v5839_v6 = vpop.permute.xlu0 %1946  ;;  %v2237_v17 = vsel %vm3191_vm6, 0.0, %v6740_v57  ;;  %v1919_v20 = vmul.f32 %v5707_v61, %v1909_v47  ;;  %v2795_v59 = vld [vmem:[#allocation3 + $0x30] sm:$0xff]  ;;  %v2239_v57 = vsel %vm3191_vm6, 0.0, %v6742_v44 }
 0x4d1   :  { %v2266_v7 = vmul.f32 %v2795_v59, %v5718_v14  ;;  %v2267_v50 = vmul.f32 %v2796_v37, %v5718_v14  ;;  %v5863_v61 = vmul.f32 %v2797_v11, %v5724_v41  ;;  %v2246_v43 = vmul.f32 %v5722_v34, %v2236_v26  ;;  %v6744_v59 = vld [vmem:[#allocation16_spill] sm:$0xff]  ;;  %v6745_v41 = vld [vmem:[#allocation17_spill] sm:$0xff] }
 0x4d2   :  { %v5865_v58 = vadd.f32 %v1937_v51, %v1919_v20  ;;  %v1949_v28 = vpop.permute.xlu1 %1948  ;;  %v2247_v44 = vmul.f32 %v5722_v34, %v2237_v17  ;;  %v2248_v47 = vmul.f32 %v5722_v34, %v2238_v10  ;;  %v2292_v14 = vsel %vm3298_vm11, 0.0, %v6744_v59 }
 0x4d3   :  { %6743 = vst [vmem:[#allocation62_spill] sm:$0xff] %v5863_v61  ;;  %v2268_v11 = vadd.f32 %v5742_v56, %v2242_v2  ;;  %v2269_v51 = vadd.f32 %v5750_v1, %v2243_v19  ;;  %v2249_v20 = vmul.f32 %v5722_v34, %v2239_v57  ;;  %v2293_v26 = vsel %vm3298_vm11, 0.0, %v6745_v41  ;;  %v6746_v61 = vld [vmem:[#allocation51_spill] sm:$0xff]  ;;  %v6749_v19 = vld [vmem:[#allocation52_spill] sm:$0xff] }
 0x4d4   :  { %v5875_v37 = vpop.permute.xlu0 %1950  ;;  %v2270_v17 = vadd.f32 %v5760_v55, %v2244_v31  ;;  %v2271_v10 = vadd.f32 %v5777_v52, %v2245_v0  ;;  %v2294_v59 = vsel %vm3298_vm11, 0.0, %v6746_v61  ;;  %v2295_v2 = vsel %vm3298_vm11, 0.0, %v6747_v39  ;;  %v6748_v1 = vld [vmem:[#allocation19_spill] sm:$0xff]  ;;  %v6750_v55 = vld [vmem:[#allocation40_spill] sm:$0xff] }
 0x4d5   :  { %v2302_v56 = vmul.f32 %v5780_v5, %v2292_v14  ;;  %v2296_v34 = vsel %vm3298_vm11, 0.0, %v6748_v1  ;;  %v2297_v41 = vsel %vm3298_vm11, 0.0, %v6749_v19  ;;  %v2298_v52 = vsel %vm3298_vm11, 0.0, %v6750_v55  ;;  %v6751_v55 = vld [vmem:[#allocation53_spill] sm:$0xff] }
 0x4d6   :  { %v1953_v0 = vpop.permute.xlu1 %1952  ;;  %v2272_v31 = vadd.f32 %v5786_v23, %v2246_v43  ;;  %v2273_v39 = vadd.f32 %v2265_v35, %v2247_v44  ;;  %v2274_v57 = vadd.f32 %v2266_v7, %v2248_v47  ;;  %v2303_v61 = vmul.f32 %v5780_v5, %v2293_v26  ;;  %v6752_v43 = vld [vmem:[#allocation56_spill] sm:$0xff] }
 0x4d7   :  { %v2275_v1 = vadd.f32 %v2267_v50, %v2249_v20  ;;  %v2304_v19 = vmul.f32 %v5780_v5, %v2294_v59  ;;  %v2305_v12 = vmul.f32 %v5780_v5, %v2295_v2  ;;  %v2299_v48 = vsel %vm3298_vm11, 0.0, %v6751_v55  ;;  %v6754_v55 = vld [vmem:[#allocation54_spill] sm:$0xff] }
 0x4d8   :  { %v1955_v14 = vpop.permute.xlu0 %1954  ;;  %v2306_v23 = vmul.f32 %v5780_v5, %v2296_v34  ;;  %v2307_v35 = vmul.f32 %v5780_v5, %v2297_v41  ;;  %v2308_v7 = vmul.f32 %v5780_v5, %v2298_v52  ;;  %v2342_v50 = vsel %vm3191_vm6, 0.0, %v6752_v43  ;;  %v6753_v41 = vld [vmem:[#allocation14_spill] sm:$0xff] }
 0x4d9   :  { %v2310_v44 = vadd.f32 %v2302_v56, %v2268_v11  ;;  %v5921_v47 = vstv %s5856_s0  ;;  %v5924_v20 = vstv %s5867_s17  ;;  %v1962_v26 = vsel %vm3298_vm11, 0.0, %v5839_v6 }
 0x4da   :  { %v1957_v59 = vpop.permute.xlu1 %1956  ;;  %v2311_v2 = vadd.f32 %v2303_v61, %v2269_v51  ;;  %v2309_v34 = vmul.f32 %v5780_v5, %v2299_v48  ;;  %v2343_v52 = vsel %vm3191_vm6, 0.0, %v6753_v41  ;;  %v2344_v11 = vsel %vm3191_vm6, 0.0, %v6754_v55 }
 0x4db   :  { %v2312_v43 = vadd.f32 %v2304_v19, %v2270_v17  ;;  %v5936_v4 = vadd.f32 %v2305_v12, %v2271_v10  ;;  %v2352_v6 = vmul.f32 %v5860_v60, %v2342_v50  ;;  %v1963_v51 = vsel %vm3298_vm11, 0.0, %v1949_v28 }
 0x4dc   :  { %v1959_v56 = vpop.permute.xlu0 %1958  ;;  %v5941_v48 = vadd.f32 %v2306_v23, %v2272_v31  ;;  %v5943_v5 = vadd.f32 %v2307_v35, %v2273_v39  ;;  %v5945_v61 = vadd.f32 %v2308_v7, %v2274_v57  ;;  %v1972_v41 = vmul.f32 %v5924_v20, %v1962_v26  ;;  %v6755_v39 = vld [vmem:[#allocation57_spill] sm:$0xff] }
 0x4dd   :  { %v2353_v55 = vmul.f32 %v5860_v60, %v2343_v52  ;;  %v2354_v17 = vmul.f32 %v5860_v60, %v2344_v11  ;;  %v1964_v12 = vsel %vm3298_vm11, 0.0, %v5875_v37  ;;  %v5956_v28 = vstv %s5901_s18 }
 0x4de   :  { %v5953_v10 = vpop.permute.xlu1 %1960  ;;  %v5958_v31 = vadd.f32 %v2309_v34, %v2275_v1  ;;  %v2345_v57 = vsel %vm3191_vm6, 0.0, %v6755_v39  ;;  %v5964_v19 = vstv %s5905_s19  ;;  %v1973_v23 = vmul.f32 %v5924_v20, %v1963_v51 }
 0x4df   :  { %v5967_v7 = vadd.f32 %v2352_v6, %v2310_v44  ;;  %v5970_v50 = vstv %s5912_s20  ;;  %v1965_v37 = vsel %vm3298_vm11, 0.0, %v1953_v0  ;;  %v1980_v26 = vadd.f32 %v1972_v41, %v5730_v22 }
 0x4e0   :  { %v1997_v35 = vpop.permute.xlu0 %1996  ;;  %v1974_v34 = vmul.f32 %v5924_v20, %v1964_v12  ;;  %v1966_v52 = vsel %vm3298_vm11, 0.0, %v1955_v14  ;;  %v5981_v51 = vadd.f32 %v2353_v55, %v2311_v2  ;;  %v5983_v44 = vadd.f32 %v2354_v17, %v2312_v43 }
 0x4e1   :  { %v2012_v1 = vsel %vm3191_vm6, 0.0, %v1997_v35  ;;  %v5986_v6 = vmul.f32 %v5860_v60, %v2345_v57  ;;  %v2040_v0 = vmul.f32 %v5547_v38, %v5964_v19  ;;  %v1981_v22 = vadd.f32 %v1973_v23, %v5757_v45 }
 0x4e2   :  { %v2022_v11 = vmul.f32 %v5956_v28, %v2012_v1  ;;  %v1999_v39 = vpop.permute.xlu1 %1998  ;;  %v1975_v41 = vmul.f32 %v5924_v20, %v1965_v37  ;;  %v1976_v2 = vmul.f32 %v5924_v20, %v1966_v52  ;;  %v1967_v43 = vsel %vm3298_vm11, 0.0, %v1957_v59 }
 0x4e3   :  { %v2013_v14 = vsel %vm3191_vm6, 0.0, %v1999_v39  ;;  %v2346_v45 = vsel %vm3191_vm6, 0.0, %v5166_v40  ;;  %v1982_v17 = vadd.f32 %v1974_v34, %v5764_v27  ;;  %v2041_v37 = vmul.f32 %v5550_v13, %v5964_v19 }
 0x4e4   :  { %v2030_v12 = vadd.f32 %v2022_v11, %v1980_v26  ;;  %v2001_v35 = vpop.permute.xlu0 %2000  ;;  %v2023_v55 = vmul.f32 %v5956_v28, %v2013_v14  ;;  %v2042_v59 = vmul.f32 %v5552_v54, %v5964_v19  ;;  %v1968_v1 = vsel %vm3298_vm11, 0.0, %v1959_v56 }
 0x4e5   :  { %v2014_v38 = vsel %vm3191_vm6, 0.0, %v2001_v35  ;;  %v1983_v11 = vadd.f32 %v1975_v41, %v5795_v29  ;;  %v1977_v40 = vmul.f32 %v5924_v20, %v1967_v43  ;;  %v1984_v39 = vadd.f32 %v1976_v2, %v5803_v18 }
 0x4e6   :  { %v2024_v57 = vmul.f32 %v5956_v28, %v2014_v38  ;;  %v6005_v23 = vadd.f32 %v2040_v0, %v2030_v12  ;;  %v2031_v26 = vadd.f32 %v2023_v55, %v1981_v22  ;;  %v2003_v52 = vpop.permute.xlu1 %2002  ;;  %v1978_v56 = vmul.f32 %v5924_v20, %v1968_v1 }
 0x4e7   :  { %v2015_v34 = vsel %vm3191_vm6, 0.0, %v2003_v52  ;;  %v1969_v29 = vsel %vm3298_vm11, 0.0, %v5953_v10  ;;  %v2347_v18 = vsel %vm3191_vm6, 0.0, %v5172_v15  ;;  %v2348_v14 = vsel %vm3191_vm6, 0.0, %v5176_v9 }
 0x4e8   :  { %v2032_v27 = vadd.f32 %v2024_v57, %v1982_v17  ;;  %v2005_v0 = vpop.permute.xlu0 %2004  ;;  %v2025_v13 = vmul.f32 %v5956_v28, %v2015_v34  ;;  %v6021_v12 = vadd.f32 %v2041_v37, %v2031_v26  ;;  %v2043_v35 = vmul.f32 %v5556_v16, %v5964_v19 }
 0x4e9   :  { %v2016_v54 = vsel %vm3191_vm6, 0.0, %v2005_v0  ;;  %v2044_v10 = vmul.f32 %v5558_v46, %v5964_v19  ;;  %v1985_v55 = vadd.f32 %v1977_v40, %v5829_v36  ;;  %v1979_v15 = vmul.f32 %v5924_v20, %v1969_v29 }
 0x4ea   :  { %v2026_v22 = vmul.f32 %v5956_v28, %v2016_v54  ;;  %v6028_v41 = vadd.f32 %v2042_v59, %v2032_v27  ;;  %v2033_v2 = vadd.f32 %v2025_v13, %v1983_v11  ;;  %v2007_v43 = vpop.permute.xlu1 %2006  ;;  %v2356_v46 = vmul.f32 %v5860_v60, %v2346_v45 }
 0x4eb   :  { %v2017_v17 = vsel %vm3191_vm6, 0.0, %v2007_v43  ;;  %v1986_v36 = vadd.f32 %v1978_v56, %v5835_v33  ;;  %v2357_v26 = vmul.f32 %v5860_v60, %v2347_v18  ;;  %v2358_v52 = vmul.f32 %v5860_v60, %v2348_v14  ;;  %v6757_v18 = vld [vmem:[#allocation22_spill] sm:$0xff]  ;;  %v6758_v14 = vld [vmem:[#allocation55_spill] sm:$0xff] }
 0x4ec   :  { %v2034_v38 = vadd.f32 %v2026_v22, %v1984_v39  ;;  %v2009_v57 = vpop.permute.xlu0 %2008  ;;  %v2027_v9 = vmul.f32 %v5956_v28, %v2017_v17  ;;  %v6049_v37 = vadd.f32 %v2043_v35, %v2033_v2  ;;  %v2045_v20 = vmul.f32 %v5566_v49, %v5964_v19  ;;  %v6760_v43 = vld [vmem:[#allocation46_spill] sm:$0xff] }
 0x4ed   :  { %v2018_v16 = vsel %vm3191_vm6, 0.0, %v2009_v57  ;;  %v2349_v27 = vsel %vm3191_vm6, 0.0, %v5180_v30  ;;  %v2046_v33 = vmul.f32 %v5570_v53, %v5964_v19  ;;  %v2363_v39 = vadd.f32 %v5986_v6, %v5936_v4 }
 0x4ee   :  { %v2028_v59 = vmul.f32 %v5956_v28, %v2018_v16  ;;  %v6054_v1 = vadd.f32 %v2044_v10, %v2034_v38  ;;  %v2035_v11 = vadd.f32 %v2027_v9, %v1985_v55  ;;  %v2011_v40 = vpop.permute.xlu1 %2010  ;;  %v1987_v49 = vadd.f32 %v1979_v15, %v5865_v58  ;;  %v6761_v55 = vld [vmem:[#allocation42_spill] sm:$0xff]  ;;  %v6762_v15 = vld [vmem:[#allocation47_spill] sm:$0xff] }
 0x4ef   :  { %v2019_v34 = vsel %vm3191_vm6, 0.0, %v2011_v40  ;;  %v2364_v30 = vadd.f32 %v2356_v46, %v5941_v48  ;;  %v2378_v53 = vadd.f32 %v5720_v3, %v5967_v7  ;;  %v2379_v56 = vadd.f32 %v5726_v21, %v5981_v51  ;;  %v6763_v16 = vld [vmem:[#allocation67_spill] sm:$0xff] }
 0x4f0   :  { %v2036_v45 = vadd.f32 %v2028_v59, %v1986_v36  ;;  %v6067_v0 = vpop.permute.xlu0 %2056  ;;  %v2029_v13 = vmul.f32 %v5956_v28, %v2019_v34  ;;  %v6073_v54 = vadd.f32 %v2045_v20, %v2035_v11  ;;  %v2359_v22 = vmul.f32 %v5860_v60, %v2349_v27  ;;  %v6764_v36 = vld [vmem:[#allocation23_spill] sm:$0xff]  ;;  %v6765_v20 = vld [vmem:[#allocation10_spill] sm:$0xff]  ;;  %v6767_v34 = vld [vmem:[#allocation21_spill] sm:$0xff] }
 0x4f1   :  { %v2402_v4 = vsel %vm3298_vm11, 0.0, %v5186_v62  ;;  %v2047_v58 = vmul.f32 %v5580_v42, %v5964_v19  ;;  %v2365_v6 = vadd.f32 %v2357_v26, %v5943_v5  ;;  %v2366_v3 = vadd.f32 %v2358_v52, %v5945_v61  ;;  %v6756_v62 = vld [vmem:[#allocation71_spill] sm:$0xff] }
 0x4f2   :  { %v6080_v29 = vadd.f32 %v2046_v33, %v2036_v45  ;;  %v2037_v28 = vadd.f32 %v2029_v13, %v1987_v49  ;;  %v6088_v48 = vpop.permute.xlu1 %2058  ;;  %v2403_v21 = vsel %vm3298_vm11, 0.0, %v5192_v63  ;;  %v2380_v60 = vadd.f32 %v5728_v25, %v5983_v44  ;;  %v6759_v44 = vld [vmem:[#allocation41_spill] sm:$0xff]  ;;  %v6766_v40 = vld [vmem:[#allocation43_spill] sm:$0xff] }
 0x4f3   :  { %v2404_v42 = vsel %vm3298_vm11, 0.0, %v6756_v62  ;;  %v2381_v19 = vadd.f32 %v5734_v24, %v2363_v39  ;;  %v6104_v51 = vstv %s6043_s22  ;;  %v2412_v61 = vmul.f32 %v5921_v47, %v2402_v4  ;;  %v6769_v4 = vld [vmem:[#allocation68_spill] sm:$0xff]  ;;  %v6770_v62 = vld [vmem:[#allocation25_spill] sm:$0xff] }
 0x4f4   :  { %v6097_v7 = vpop.permute.xlu0 %2060  ;;  %v6106_v5 = vadd.f32 %v2047_v58, %v2037_v28  ;;  %v2405_v63 = vsel %vm3298_vm11, 0.0, %v6757_v18  ;;  %v2382_v25 = vadd.f32 %v6758_v14, %v2364_v30  ;;  %v2452_v35 = vsel %vm3191_vm6, 0.0, %v6759_v44  ;;  %v6768_v30 = vld [vmem:[#allocation48_spill] sm:$0xff]  ;;  %v6771_v14 = vld [vmem:[#allocation33_spill] sm:$0xff] }
 0x4f5   :  { %v2367_v2 = vadd.f32 %v2359_v22, %v5958_v31  ;;  %v2413_v24 = vmul.f32 %v5921_v47, %v2403_v21  ;;  %v2406_v10 = vsel %vm3298_vm11, 0.0, %v6760_v43  ;;  %v2453_v38 = vsel %vm3191_vm6, 0.0, %v6761_v55  ;;  %v6773_v55 = vld [vmem:[#allocation35_spill] sm:$0xff] }
 0x4f6   :  { %v6124_v17 = vpop.permute.xlu1 %2062  ;;  %v2414_v57 = vmul.f32 %v5921_v47, %v2404_v42  ;;  %v2383_v9 = vadd.f32 %v6762_v15, %v2365_v6  ;;  %v2384_v46 = vadd.f32 %v6763_v16, %v2366_v3  ;;  %v2454_v31 = vsel %vm3191_vm6, 0.0, %v6764_v36 }
 0x4f7   :  { %v2415_v26 = vmul.f32 %v5921_v47, %v2405_v63  ;;  %v2462_v52 = vmul.f32 %v5970_v50, %v2452_v35  ;;  %v2455_v11 = vsel %vm3191_vm6, 0.0, %v6765_v20  ;;  %v2456_v27 = vsel %vm3191_vm6, 0.0, %v6766_v40  ;;  %v6776_v40 = vld [vmem:[#allocation65_spill] sm:$0xff] }
 0x4f8   :  { %v6132_v59 = vpop.permute.xlu0 %2064  ;;  %v2420_v33 = vadd.f32 %v2412_v61, %v2378_v53  ;;  %v2416_v45 = vmul.f32 %v5921_v47, %v2406_v10  ;;  %v2407_v39 = vsel %vm3298_vm11, 0.0, %v6767_v34  ;;  %v2463_v49 = vmul.f32 %v5970_v50, %v2453_v38 }
 0x4f9   :  { %v2421_v13 = vadd.f32 %v2413_v24, %v2379_v56  ;;  %v2408_v22 = vsel %vm3298_vm11, 0.0, %v6768_v30  ;;  %v6151_v58 = vadd.f32 %v6769_v4, %v2367_v2  ;;  %v2464_v28 = vmul.f32 %v5970_v50, %v2454_v31  ;;  %v6772_v24 = vld [vmem:[#allocation11_spill] sm:$0xff] }
 0x4fa   :  { %v6154_v6 = vpop.permute.xlu1 %2066  ;;  %v2422_v53 = vadd.f32 %v2414_v57, %v2380_v60  ;;  %v2465_v3 = vmul.f32 %v5970_v50, %v2455_v11  ;;  %v2466_v21 = vmul.f32 %v5970_v50, %v2456_v27  ;;  %v2512_v56 = vsel %vm3298_vm11, 0.0, %v6770_v62  ;;  %v6774_v57 = vld [vmem:[#allocation36_spill] sm:$0xff] }
 0x4fb   :  { %v2423_v61 = vadd.f32 %v2415_v26, %v2381_v19  ;;  %v2417_v18 = vmul.f32 %v5921_v47, %v2407_v39  ;;  %v2470_v63 = vadd.f32 %v2462_v52, %v2420_v33  ;;  %v2513_v44 = vsel %vm3298_vm11, 0.0, %v6771_v14  ;;  %v6775_v26 = vld [vmem:[#allocation26_spill] sm:$0xff] }
 0x4fc   :  { %v6161_v42 = vpop.permute.xlu0 %2068  ;;  %v2424_v60 = vadd.f32 %v2416_v45, %v2382_v25  ;;  %v2418_v35 = vmul.f32 %v5921_v47, %v2408_v22  ;;  %v2471_v2 = vadd.f32 %v2463_v49, %v2421_v13  ;;  %v2514_v43 = vsel %vm3298_vm11, 0.0, %v6772_v24  ;;  %v6777_v33 = vld [vmem:[#allocation66_spill] sm:$0xff]  ;;  %v6778_v13 = vld [vmem:[#allocation63_spill] sm:$0xff] }
 0x4fd   :  { %v2472_v10 = vadd.f32 %v2464_v28, %v2422_v53  ;;  %v2457_v19 = vsel %vm3191_vm6, 0.0, %v6773_v55  ;;  %v2522_v38 = vmul.f32 %v6104_v51, %v2512_v56  ;;  %v2515_v15 = vsel %vm3298_vm11, 0.0, %v6774_v57  ;;  %v6780_v53 = vld [vmem:[#allocation70_spill] sm:$0xff] }
 0x4fe   :  { %v6180_v16 = vpop.permute.xlu1 %2070  ;;  %v2473_v25 = vadd.f32 %v2465_v3, %v2423_v61  ;;  %v2474_v36 = vadd.f32 %v2466_v21, %v2424_v60  ;;  %v2523_v31 = vmul.f32 %v6104_v51, %v2513_v44  ;;  %v2516_v52 = vsel %vm3298_vm11, 0.0, %v6775_v26  ;;  %v6781_v61 = vld [vmem:[#allocation69_spill] sm:$0xff]  ;;  %v6783_v60 = vld [vmem:[#allocation28_spill] sm:$0xff] }
 0x4ff   :  { %v2425_v11 = vadd.f32 %v2417_v18, %v2383_v9  ;;  %v2409_v27 = vsel %vm3298_vm11, 0.0, %v6776_v40  ;;  %v2488_v45 = vadd.f32 %v6777_v33, %v2470_v63  ;;  %v2524_v34 = vmul.f32 %v6104_v51, %v2514_v43  ;;  %v6779_v9 = vld [vmem:[#allocation24_spill] sm:$0xff]  ;;  %v6782_v63 = vld [vmem:[#allocation34_spill] sm:$0xff] }
 0x500   :  { %v2107_v20 = vpop.permute.xlu0 %2106  ;;  %v6193_v39 = vadd.f32 %v2418_v35, %v2384_v46  ;;  %v2467_v49 = vmul.f32 %v5970_v50, %v2457_v19  ;;  %v2489_v30 = vadd.f32 %v6778_v13, %v2471_v2  ;;  %v2525_v22 = vmul.f32 %v6104_v51, %v2515_v15  ;;  %v6784_v19 = vld [vmem:[#allocation12_spill] sm:$0xff]  ;;  %v6785_v33 = vld [vmem:[#allocation62_spill] sm:$0xff] }
 0x501   :  { %v2458_v4 = vsel %vm3191_vm6, 0.0, %v6779_v9  ;;  %v2530_v28 = vadd.f32 %v2522_v38, %v2488_v45  ;;  %v2490_v3 = vadd.f32 %v6780_v53, %v2472_v10  ;;  %v2526_v21 = vmul.f32 %v6104_v51, %v2516_v52 }
 0x502   :  { %v2109_v46 = vpop.permute.xlu1 %2108  ;;  %v6206_v62 = vmul.f32 %v5921_v47, %v2409_v27  ;;  %v2531_v56 = vadd.f32 %v2523_v31, %v2489_v30  ;;  %v2491_v18 = vadd.f32 %v6781_v61, %v2473_v25  ;;  %v2492_v14 = vadd.f32 %v6782_v63, %v2474_v36 }
 0x503   :  { %v2459_v35 = vsel %vm3191_vm6, 0.0, %v6783_v60  ;;  %v2532_v2 = vadd.f32 %v2524_v34, %v2490_v3  ;;  %v6214_v24 = vstv %s6167_s23  ;;  %v2072_v43 = vsel %vm3298_vm11, 0.0, %v6067_v0 }
 0x504   :  { %v2111_v44 = vpop.permute.xlu0 %2110  ;;  %v2475_v10 = vadd.f32 %v2467_v49, %v2425_v11  ;;  %v6220_v47 = vmul.f32 %v5970_v50, %v2458_v4  ;;  %v2533_v55 = vadd.f32 %v2525_v22, %v2491_v18  ;;  %v2517_v38 = vsel %vm3298_vm11, 0.0, %v6784_v19 }
 0x505   :  { %2734 = vtanh.f32 %v2530_v28  ;;  %v2534_v57 = vadd.f32 %v2526_v21, %v2492_v14  ;;  %v6226_v15 = vstv %s6182_s24  ;;  %v2122_v25 = vsel %vm3191_vm6, 0.0, %v2107_v20  ;;  %v6786_v28 = vld [vmem:[#allocation15_spill] sm:$0xff]  ;;  %v6787_v21 = vld [vmem:[#allocation30_spill] sm:$0xff] }
 0x506   :  { %v2113_v36 = vpop.permute.xlu1 %2112  ;;  %v6233_v0 = vmul.f32 %v5970_v50, %v2459_v35  ;;  %2736 = vtanh.f32 %v2531_v56  ;;  %v2082_v31 = vmul.f32 %v6214_v24, %v2072_v43  ;;  %v2073_v26 = vsel %vm3298_vm11, 0.0, %v6088_v48  ;;  %v6788_v35 = vld [vmem:[#allocation44_spill] sm:$0xff] }
 0x507   :  { %2738 = vtanh.f32 %v2532_v2  ;;  %v2527_v11 = vmul.f32 %v6104_v51, %v2517_v38  ;;  %v2074_v20 = vsel %vm3298_vm11, 0.0, %v6097_v7  ;;  %v2075_v50 = vsel %vm3298_vm11, 0.0, %v6124_v17 }
 0x508   :  { %v2115_v52 = vpop.permute.xlu0 %2114  ;;  %2740 = vtanh.f32 %v2533_v55  ;;  %v6247_v40 = vstv %s6198_s25  ;;  %v2132_v27 = vmul.f32 %v6226_v15, %v2122_v25  ;;  %v2123_v48 = vsel %vm3191_vm6, 0.0, %v2109_v46 }
 0x509   :  { %2742 = vtanh.f32 %v2534_v57  ;;  %v2493_v45 = vadd.f32 %v6785_v33, %v2475_v10  ;;  %v2083_v34 = vmul.f32 %v6214_v24, %v2073_v26  ;;  %v2124_v7 = vsel %vm3191_vm6, 0.0, %v2111_v44  ;;  %v6789_v26 = vld [vmem:[#allocation58_spill] sm:$0xff] }
 0x50a   :  { %v2117_v49 = vpop.permute.xlu1 %2116  ;;  %v2090_v13 = vadd.f32 %v2082_v31, %v6005_v23  ;;  %v2084_v17 = vmul.f32 %v6214_v24, %v2074_v20  ;;  %v2085_v30 = vmul.f32 %v6214_v24, %v2075_v50  ;;  %v2076_v22 = vsel %vm3298_vm11, 0.0, %v6132_v59 }
 0x50b   :  { %v6264_v4 = vadd.f32 %v2527_v11, %v2493_v45  ;;  %v2150_v53 = vmul.f32 %v6247_v40, %v6786_v28  ;;  %v2133_v3 = vmul.f32 %v6226_v15, %v2123_v48  ;;  %v2125_v23 = vsel %vm3191_vm6, 0.0, %v2113_v36 }
 0x50c   :  { %v6262_v9 = vpop.permute.xlu0 %2118  ;;  %v2151_v46 = vmul.f32 %v6247_v40, %v6787_v21  ;;  %v2077_v56 = vsel %vm3298_vm11, 0.0, %v6154_v6  ;;  %v2140_v59 = vadd.f32 %v2132_v27, %v2090_v13  ;;  %v2134_v61 = vmul.f32 %v6226_v15, %v2124_v7 }
 0x50d   :  { %v2091_v18 = vadd.f32 %v2083_v34, %v6021_v12  ;;  %v2086_v63 = vmul.f32 %v6214_v24, %v2076_v22  ;;  %v2126_v14 = vsel %vm3191_vm6, 0.0, %v2115_v52  ;;  %v6284_v60 = vstv %s6230_s26  ;;  %v6790_v52 = vld [vmem:[#allocation59_spill] sm:$0xff] }
 0x50e   :  { %v6281_v44 = vpop.permute.xlu1 %2120  ;;  %v2152_v2 = vmul.f32 %v6247_v40, %v6788_v35  ;;  %v2092_v43 = vadd.f32 %v2084_v17, %v6028_v41  ;;  %v2093_v6 = vadd.f32 %v2085_v30, %v6049_v37  ;;  %v2135_v10 = vmul.f32 %v6226_v15, %v2125_v23 }
 0x50f   :  { %v2087_v12 = vmul.f32 %v6214_v24, %v2077_v56  ;;  %v2141_v19 = vadd.f32 %v2133_v3, %v2091_v18  ;;  %v2127_v38 = vsel %vm3191_vm6, 0.0, %v2117_v49  ;;  %v2136_v36 = vmul.f32 %v6226_v15, %v2126_v14 }
 0x510   :  { %v2167_v55 = vpop.permute.xlu0 %2166  ;;  %v2142_v25 = vadd.f32 %v2134_v61, %v2092_v43  ;;  %v2158_v31 = vadd.f32 %v2150_v53, %v2140_v59  ;;  %v2153_v37 = vmul.f32 %v6247_v40, %v6789_v26  ;;  %v2154_v11 = vmul.f32 %v6247_v40, %v6790_v52 }
 0x511   :  { %v2182_v57 = vsel %vm3298_vm11, 0.0, %v2167_v55  ;;  %v2094_v20 = vadd.f32 %v2086_v63, %v6054_v1  ;;  %v2078_v50 = vsel %vm3298_vm11, 0.0, %v6161_v42  ;;  %v2143_v33 = vadd.f32 %v2135_v10, %v2093_v6 }
 0x512   :  { %v2192_v41 = vmul.f32 %v6284_v60, %v2182_v57  ;;  %v2169_v27 = vpop.permute.xlu1 %2168  ;;  %v6306_v48 = vpop.eup %2734  ;;  %v2137_v45 = vmul.f32 %v6226_v15, %v2127_v38  ;;  %v2095_v17 = vadd.f32 %v2087_v12, %v6073_v54  ;;  %v2159_v1 = vadd.f32 %v2151_v46, %v2141_v19  ;;  %v6791_v12 = vld [vmem:[#allocation31_spill] sm:$0xff] }
 0x513   :  { %v2183_v7 = vsel %vm3298_vm11, 0.0, %v2169_v27  ;;  %v6311_v13 = vpop.eup %2736  ;;  %v2144_v28 = vadd.f32 %v2136_v36, %v2094_v20  ;;  %v2160_v53 = vadd.f32 %v2152_v2, %v2142_v25  ;;  %v2088_v21 = vmul.f32 %v6214_v24, %v2078_v50  ;;  %v6792_v50 = vld [vmem:[#allocation45_spill] sm:$0xff] }
 0x514   :  { %v2200_v34 = vadd.f32 %v2192_v41, %v2158_v31  ;;  %v2171_v49 = vpop.permute.xlu0 %2170  ;;  %v2193_v30 = vmul.f32 %v6284_v60, %v2183_v7  ;;  %v6317_v22 = vpop.eup %2738  ;;  %v2079_v54 = vsel %vm3298_vm11, 0.0, %v6180_v16  ;;  %v2128_v46 = vsel %vm3191_vm6, 0.0, %v6262_v9  ;;  %v6793_v27 = vld [vmem:[#allocation61_spill] sm:$0xff] }
 0x515   :  { %v2184_v42 = vsel %vm3298_vm11, 0.0, %v2171_v49  ;;  %v6320_v23 = vpop.eup %2740  ;;  %v2145_v18 = vadd.f32 %v2137_v45, %v2095_v17  ;;  %v2161_v14 = vadd.f32 %v2153_v37, %v2143_v33  ;;  %v2129_v43 = vsel %vm3191_vm6, 0.0, %v6281_v44  ;;  %v6794_v45 = vld [vmem:[#allocation20_spill] sm:$0xff] }
 0x516   :  { %2744 = vtanh.f32 %v2200_v34  ;;  %v2194_v3 = vmul.f32 %v6284_v60, %v2184_v42  ;;  %v2201_v56 = vadd.f32 %v2193_v30, %v2159_v1  ;;  %v2173_v59 = vpop.permute.xlu1 %2172  ;;  %v6329_v61 = vpop.eup %2742  ;;  %v2138_v6 = vmul.f32 %v6226_v15, %v2128_v46 }
 0x517   :  { %v2185_v35 = vsel %vm3298_vm11, 0.0, %v2173_v59  ;;  %v2162_v10 = vadd.f32 %v2154_v11, %v2144_v28  ;;  %v2155_v19 = vmul.f32 %v6247_v40, %v6791_v12  ;;  %v2089_v8 = vmul.f32 %v6214_v24, %v2079_v54  ;;  %v6795_v28 = vld [vmem:[#allocation64_spill] sm:$0xff] }
 0x518   :  { %v2202_v63 = vadd.f32 %v2194_v3, %v2160_v53  ;;  %v2175_v2 = vpop.permute.xlu0 %2174  ;;  %2746 = vtanh.f32 %v2201_v56  ;;  %v2195_v16 = vmul.f32 %v6284_v60, %v2185_v35  ;;  %v2096_v57 = vadd.f32 %v2088_v21, %v6080_v29  ;;  %v6796_v3 = vld [vmem:[#allocation60_spill] sm:$0xff] }
 0x519   :  { %v2186_v9 = vsel %vm3298_vm11, 0.0, %v2175_v2  ;;  %v2139_v25 = vmul.f32 %v6226_v15, %v2129_v43  ;;  %v2163_v26 = vadd.f32 %v2155_v19, %v2145_v18  ;;  %v2476_v24 = vadd.f32 %v6220_v47, %v6193_v39 }
 0x51a   :  { %2748 = vtanh.f32 %v2202_v63  ;;  %v2196_v55 = vmul.f32 %v6284_v60, %v2186_v9  ;;  %v2203_v44 = vadd.f32 %v2195_v16, %v2161_v14  ;;  %v2177_v38 = vpop.permute.xlu1 %2176  ;;  %v2146_v52 = vadd.f32 %v2138_v6, %v2096_v57 }
 0x51b   :  { %2750 = vtanh.f32 %v6264_v4  ;;  %v2187_v31 = vsel %vm3298_vm11, 0.0, %v2177_v38  ;;  %v2427_v29 = vadd.f32 %v6206_v62, %v6151_v58  ;;  %v2097_v15 = vadd.f32 %v2089_v8, %v6106_v5 }
 0x51c   :  { %v2204_v36 = vadd.f32 %v2196_v55, %v2162_v10  ;;  %v2179_v41 = vpop.permute.xlu0 %2178  ;;  %2752 = vtanh.f32 %v2203_v44  ;;  %v2197_v4 = vmul.f32 %v6284_v60, %v2187_v31  ;;  %v2486_v33 = vmul.f32 %v6793_v27, %v6792_v50 }
 0x51d   :  { %v2188_v37 = vsel %vm3298_vm11, 0.0, %v2179_v41  ;;  %v2156_v34 = vmul.f32 %v6247_v40, %v6794_v45  ;;  %v2477_v49 = vadd.f32 %v6233_v0, %v2427_v29  ;;  %v2147_v17 = vadd.f32 %v2139_v25, %v2097_v15 }
 0x51e   :  { %2754 = vtanh.f32 %v2204_v36  ;;  %v2205_v11 = vadd.f32 %v2197_v4, %v2163_v26  ;;  %v2181_v20 = vpop.permute.xlu1 %2180  ;;  %v2198_v7 = vmul.f32 %v6284_v60, %v2188_v37  ;;  %v2554_v58 = vmul.f32 0.6666667, %v6306_v48 }
 0x51f   :  { %v2189_v39 = vsel %vm3298_vm11, 0.0, %v2181_v20  ;;  %v2164_v62 = vadd.f32 %v2156_v34, %v2146_v52  ;;  %v2494_v1 = vadd.f32 %v2486_v33, %v2476_v24  ;;  %v2487_v53 = vmul.f32 %v6795_v28, %v6792_v50 }
 0x520   :  { %v2509_v47 = vpop.permute.xlu0 %2508  ;;  %2756 = vtanh.f32 %v2205_v11  ;;  %v2157_v21 = vmul.f32 %v6247_v40, %v6796_v3  ;;  %v2199_v0 = vmul.f32 %v6284_v60, %v2189_v39  ;;  %v2555_v18 = vmul.f32 0.6666667, %v6311_v13 }
 0x521   :  { %v2518_v5 = vsel %vm3298_vm11, 0.0, %v2509_v47  ;;  %v2206_v56 = vadd.f32 %v2198_v7, %v2164_v62  ;;  %v2495_v14 = vadd.f32 %v2487_v53, %v2477_v49  ;;  %v2556_v43 = vmul.f32 0.6666667, %v6317_v22 }
 0x522   :  { %v2528_v30 = vmul.f32 %v6104_v51, %v2518_v5  ;;  %v2511_v54 = vpop.permute.xlu1 %2510  ;;  %v2165_v63 = vadd.f32 %v2157_v21, %v2147_v17  ;;  %v2557_v13 = vmul.f32 0.6666667, %v6320_v23  ;;  %v2558_v22 = vmul.f32 0.6666667, %v6329_v61 }
 0x523   :  { %v2745_v42 = vpop.eup %2744  ;;  %v2519_v48 = vsel %vm3298_vm11, 0.0, %v2511_v54 }
 0x524   :  { %v2562_v46 = vadd.f32 %v2745_v42, %v2554_v58  ;;  %v2536_v59 = vadd.f32 %v2528_v30, %v2494_v1  ;;  %v2529_v35 = vmul.f32 %v6104_v51, %v2519_v48  ;;  %v2207_v16 = vadd.f32 %v2199_v0, %v2165_v63 }
 0x525   :  { %v2747_v2 = vpop.eup %2746 }
 0x526   :  { %2570 = vst [vmem:[%s6407_s2] sm:$0xff] %v2562_v46  ;;  %2758 = vtanh.f32 %v2536_v59  ;;  %v2563_v60 = vadd.f32 %v2747_v2, %v2555_v18  ;;  %v2537_v9 = vadd.f32 %v2529_v35, %v2495_v14 }
 0x527   :  { %v2749_v40 = vpop.eup %2748  ;;  %2760 = vtanh.f32 %v2206_v56 }
 0x528   :  { %v2751_v32 = vpop.eup %2750  ;;  %v2564_v6 = vadd.f32 %v2749_v40, %v2556_v43  ;;  %2571 = vst [vmem:[%s6407_s2 + $0x8] sm:$0xff] %v2563_v60  ;;  %2762 = vtanh.f32 %v2537_v9 }
 0x529   :  { %v2753_v51 = vpop.eup %2752  ;;  %2764 = vtanh.f32 %v2207_v16  ;;  %v2559_v19 = vmul.f32 0.6666667, %v2751_v32 }
 0x52a   :  { %2572 = vst [vmem:[%s6407_s2 + $0x10] sm:$0xff] %v2564_v6  ;;  %v2565_v55 = vadd.f32 %v2753_v51, %v2557_v13 }
 0x52b   :  { %v2755_v10 = vpop.eup %2754 }
 0x52c   :  { %v2566_v12 = vadd.f32 %v2755_v10, %v2558_v22  ;;  %2573 = vst [vmem:[%s6407_s2 + $0x18] sm:$0xff] %v2565_v55 }
 0x52d   :  { %v2757_v23 = vpop.eup %2756 }
 0x52e   :  { %2574 = vst [vmem:[%s6407_s2 + $0x20] sm:$0xff] %v2566_v12  ;;  %v2567_v8 = vadd.f32 %v2757_v23, %v2559_v19 }
 0x530   :  { %2575 = vst [vmem:[%s6407_s2 + $0x28] sm:$0xff] %v2567_v8 }
 0x533   :  { %v2759_v61 = vpop.eup %2758 }
 0x534   :  { %v2560_v44 = vmul.f32 0.6666667, %v2759_v61  ;;  %v2761_v38 = vpop.eup %2760 }
 0x535   :  { %v2763_v57 = vpop.eup %2762 }
 0x536   :  { %v2568_v25 = vadd.f32 %v2761_v38, %v2560_v44  ;;  %v2561_v36 = vmul.f32 0.6666667, %v2763_v57  ;;  %v2765_v31 = vpop.eup %2764 }
 0x538   :  { %2576 = vst [vmem:[%s6407_s2 + $0x30] sm:$0xff] %v2568_v25  ;;  %v2569_v41 = vadd.f32 %v2765_v31, %v2561_v36 }
 0x53a   :  { %2577 = vst [vmem:[%s6407_s2 + $0x38] sm:$0xff] %v2569_v41 }
 0x53b   :  { %2582 = vsyncpa [#allocation5], 1 }
 0x53c   :  { %2583 = vsyncpa [#allocation6], 1 }

</bundles_post_ra>
